<compile_context>
chip_gen: v7x
topology: tpu7x:2x2x1
jax: 0.10.0
libtpu: 0.0.40
codegen_flags: <defaults>
</compile_context>

<pallas_src>
import functools

import jax
import jax.numpy as jnp
from jax.experimental import pallas as pl
from jax.experimental.pallas import tpu as pltpu

EPS = 1e-5
# Tap order matches a (3,3) HWIO kernel flattened row-major: t = (dy+1)*3 + (dx+1).
TAPS = tuple((dy, dx) for dy in (-1, 0, 1) for dx in (-1, 0, 1))


def _dx_masks(H, W):
    """Per-spatial-position masks killing dx wrap-around columns, (H*W, 1) f32."""
    # NOTE: `% W` is a single AND for power-of-two W; for non-pow2 W build `ww`
    # from a 2-D (H, W) iota instead (integer divide is multi-op on the VPU).
    ww = jax.lax.broadcasted_iota(jnp.int32, (H * W, 1), 0) % W
    mask_l = (ww >= 1).astype(jnp.float32)       # needed by dx == -1 taps
    mask_r = (ww <= W - 2).astype(jnp.float32)   # needed by dx == +1 taps
    return mask_l, mask_r


def _conv3x3(inp, pad_ref, w_ref, mask_l, mask_r, *, H, W, C, PAD):
    """3x3 SAME convolution of one (H*W, C) f32 image resident in VMEM.

    pad_ref : (2*PAD + H*W, C) f32 scratch.  w_ref : (9, C, C) bf16 tap weights.
    Tap (dy, dx) is the H*W-row window at sublane offset PAD + dy*W + dx of the
    zero-padded slab; the zero halo handles the dy (top/bottom) borders and
    mask_l / mask_r the dx wrap-around columns.  Nine accumulating K=C bf16 MXU
    dots with f32 accumulation (spatial dim on M).  Returns (H*W, C) f32, no bias.
    """
    HW = H * W
    pad_ref[0:PAD, :] = jnp.zeros((PAD, C), jnp.float32)
    pad_ref[PAD + HW:PAD + HW + PAD, :] = jnp.zeros((PAD, C), jnp.float32)
    pad_ref[PAD:PAD + HW, :] = inp                  # aligned store (PAD % 8 == 0)
    acc = jnp.zeros((HW, C), jnp.float32)
    for t, (dy, dx) in enumerate(TAPS):
        slab = pad_ref[pl.ds(PAD + dy * W + dx, HW), :]
        if dx == -1:
            slab = slab * mask_l
        elif dx == 1:
            slab = slab * mask_r
        acc = acc + jnp.dot(slab.astype(jnp.bfloat16), w_ref[t],
                            preferred_element_type=jnp.float32)
    return acc


def _conv1_bn_stats_kernel(x_ref, w1_ref, b1_ref,
                           out1_ref, sum_ref, ssq_ref, pad_ref,
                           *, H, W, C, PAD):
    mask_l, mask_r = _dx_masks(H, W)
    out1 = _conv3x3(x_ref[...], pad_ref, w1_ref, mask_l, mask_r,
                    H=H, W=W, C=C, PAD=PAD) + b1_ref[...]
    out1_ref[...] = out1
    # Per-(batch-block, channel) partial sums for training-mode BatchNorm.
    sum_ref[0, :, :] = jnp.sum(out1, axis=0, keepdims=True)
    ssq_ref[0, :, :] = jnp.sum(out1 * out1, axis=0, keepdims=True)


def _bn_relu_conv2_kernel(out1_ref, x_ref, scale_ref, shift_ref, w2_ref, b2_ref,
                          o_ref, pad_ref, *, H, W, C, PAD):
    mask_l, mask_r = _dx_masks(H, W)
    # BN folded to a single scale/shift FMA + ReLU (scale/shift are (1, C)).
    act = jnp.maximum(out1_ref[...] * scale_ref[...] + shift_ref[...], 0.0)
    y = _conv3x3(act, pad_ref, w2_ref, mask_l, mask_r, H=H, W=W, C=C, PAD=PAD)
    o_ref[...] = y + b2_ref[...] + x_ref[...]       # conv2 + bias + residual


def _build_calls(N, C, H, W):
    HW = H * W
    PAD = -(-(W + 1) // 8) * 8                      # smallest multiple of 8 >= W+1
    padded_rows = HW + 2 * PAD

    img_spec = pl.BlockSpec((HW, C), lambda n: (n, 0))           # one batch image
    vec_spec = pl.BlockSpec((1, C), lambda n: (0, 0))            # bias / scale / shift
    tap_spec = pl.BlockSpec((9, C, C), lambda n: (0, 0, 0))      # bf16 tap weights
    stat_spec = pl.BlockSpec((1, 1, C), lambda n: (n, 0, 0))     # per-block BN sums
    params = pltpu.CompilerParams(
        dimension_semantics=("parallel",),          # batch blocks -> both v7x TCs
        vmem_limit_bytes=32 * 1024 * 1024,          # explicit (v5e default: 16 MiB)
    )

    conv1_call = pl.pallas_call(
        functools.partial(_conv1_bn_stats_kernel, H=H, W=W, C=C, PAD=PAD),
        grid=(N,),
        in_specs=[img_spec, tap_spec, vec_spec],
        out_specs=(img_spec, stat_spec, stat_spec),
        out_shape=(jax.ShapeDtypeStruct((N * HW, C), jnp.float32),
                   jax.ShapeDtypeStruct((N, 1, C), jnp.float32),
                   jax.ShapeDtypeStruct((N, 1, C), jnp.float32)),
        scratch_shapes=[pltpu.VMEM((padded_rows, C), jnp.float32)],
        compiler_params=params,
    )

    conv2_call = pl.pallas_call(
        functools.partial(_bn_relu_conv2_kernel, H=H, W=W, C=C, PAD=PAD),
        grid=(N,),
        in_specs=[img_spec, img_spec, vec_spec, vec_spec, tap_spec, vec_spec],
        out_specs=img_spec,
        out_shape=jax.ShapeDtypeStruct((N * HW, C), jnp.float32),
        scratch_shapes=[pltpu.VMEM((padded_rows, C), jnp.float32)],
        compiler_params=params,
    )
    return conv1_call, conv2_call


@jax.jit
def residual_block_forward(x_nchw, w1, b1, gamma, beta, w2, b2):
    """x_nchw: (N, C, H, W) f32.  Conv weights HWIO (3, 3, C, C); vectors (C,)."""
    N, C, H, W = x_nchw.shape
    HW = H * W
    conv1_call, conv2_call = _build_calls(N, C, H, W)

    # NCHW -> (N*H*W, C): spatial on MXU rows / sublanes, channels on lanes.
    x2 = jnp.transpose(x_nchw, (0, 2, 3, 1)).reshape(N * HW, C).astype(jnp.float32)
    # HWIO (3,3,Cin,Cout) -> tap-major (9, Cin, Cout) bf16 MXU operands.
    w1_t = w1.astype(jnp.bfloat16).reshape(9, C, C)
    w2_t = w2.astype(jnp.bfloat16).reshape(9, C, C)
    b1_r = b1.astype(jnp.float32).reshape(1, C)
    b2_r = b2.astype(jnp.float32).reshape(1, C)

    out1, bsum, bssq = conv1_call(x2, w1_t, b1_r)

    # Fold training-mode BN statistics into scale/shift (tiny (C,) math, fused
    # by XLA under jit).  One-pass variance clamped >= 0 to avoid rsqrt(NaN).
    cnt = float(N * HW)
    mean = jnp.sum(bsum, axis=0) / cnt                                   # (1, C)
    var = jnp.maximum(jnp.sum(bssq, axis=0) / cnt - mean * mean, 0.0)    # (1, C)
    scale = gamma.astype(jnp.float32).reshape(1, C) * jax.lax.rsqrt(var + EPS)
    shift = beta.astype(jnp.float32).reshape(1, C) - mean * scale

    out = conv2_call(out1, x2, scale, shift, w2_t, b2_r)
    return jnp.transpose(out.reshape(N, H, W, C), (0, 3, 1, 2))


def _reference_forward(x_nchw, w1, b1, gamma, beta, w2, b2):
    """Pure-JAX f32 reference matching PyTorch semantics (BN in training mode)."""
    x = jnp.transpose(x_nchw, (0, 2, 3, 1)).astype(jnp.float32)

    def conv(y, w, b):
        z = jax.lax.conv_general_dilated(
            y, w.astype(jnp.float32), window_strides=(1, 1), padding="SAME",
            dimension_numbers=("NHWC", "HWIO", "NHWC"))
        return z + b.reshape(1, 1, 1, -1)

    out = conv(x, w1, b1)
    mean = out.mean(axis=(0, 1, 2), keepdims=True)
    var = ((out - mean) ** 2).mean(axis=(0, 1, 2), keepdims=True)
    out = (out - mean) * jax.lax.rsqrt(var + EPS) * gamma.reshape(1, 1, 1, -1) \
          + beta.reshape(1, 1, 1, -1)
    out = jnp.maximum(out, 0.0)
    out = conv(out, w2, b2)
    out = out + x
    return jnp.transpose(out, (0, 3, 1, 2))


if __name__ == "__main__":
    N, C, H, W = 2, 4, 16, 16
    key = jax.random.PRNGKey(0)
    kx, kw1, kb1, kw2, kb2 = jax.random.split(key, 5)

    x = jax.random.normal(kx, (N, C, H, W), dtype=jnp.float32)

    fan_in = C * 3 * 3
    s = 1.0 / jnp.sqrt(fan_in)
    # Deterministic synthetic parameters (HWIO conv weights, default BN params).
    w1 = jax.random.uniform(kw1, (3, 3, C, C), minval=-s, maxval=s)
    b1 = jax.random.uniform(kb1, (C,), minval=-s, maxval=s)
    w2 = jax.random.uniform(kw2, (3, 3, C, C), minval=-s, maxval=s)
    b2 = jax.random.uniform(kb2, (C,), minval=-s, maxval=s)
    gamma = jnp.ones((C,), jnp.float32)
    beta = jnp.zeros((C,), jnp.float32)

    out = jax.block_until_ready(
        residual_block_forward(x, w1, b1, gamma, beta, w2, b2))
    ref = jax.block_until_ready(
        _reference_forward(x, w1, b1, gamma, beta, w2, b2))

    assert out.shape == (N, C, H, W)
    # bf16 MXU operands (f32 accumulation) -> looser tolerance than pure f32.
    assert jnp.max(jnp.abs(out - ref)) < 5e-2, "mismatch vs reference"

    print("KERNEL_OK")
</pallas_src>

<mosaic_0001>
module attributes {stable_mosaic.version = 11 : i64} {
  func.func @_conv1_bn_stats_kernel(%arg0: i32, %arg1: memref<256x4xf32, #tpu.memory_space<vmem>>, %arg2: memref<9x4x4xbf16, #tpu.memory_space<vmem>>, %arg3: memref<1x4xf32, #tpu.memory_space<vmem>>, %arg4: memref<256x4xf32, #tpu.memory_space<vmem>>, %arg5: memref<1x1x4xf32, #tpu.memory_space<vmem>>, %arg6: memref<1x1x4xf32, #tpu.memory_space<vmem>>, %arg7: memref<304x4xf32, #tpu.memory_space<vmem>>) attributes {dimension_semantics = [#tpu.dimension_semantics<parallel>], iteration_bounds = array<i64: 2>, scalar_prefetch = 0 : i64, scratch_operands = 1 : i64, tpu.core_type = #tpu.core_type<tc>, window_params = [{transform_indices = @transform_0, window_bounds = array<i64: 256, 4>}, {pipeline_mode = #tpu.pipeline_mode<synchronous>, transform_indices = @transform_1, window_bounds = array<i64: 9, 4, 4>}, {pipeline_mode = #tpu.pipeline_mode<synchronous>, transform_indices = @transform_2, window_bounds = array<i64: 1, 4>}, {transform_indices = @transform_3, window_bounds = array<i64: 256, 4>}, {transform_indices = @transform_4, window_bounds = array<i64: 1, 1, 4>}, {transform_indices = @transform_5, window_bounds = array<i64: 1, 1, 4>}]} {
    %0 = tpu.iota {dimensions = array<i32: 0>} : vector<256x1xi32>
    %c16_i32 = arith.constant 16 : i32
    %c0_i32 = arith.constant 0 : i32
    %1 = arith.cmpi eq, %c16_i32, %c0_i32 : i32
    %c1_i32 = arith.constant 1 : i32
    %2 = arith.select %1, %c1_i32, %c16_i32 : i32
    %3 = vector.broadcast %2 : i32 to vector<256x1xi32>
    %4 = arith.remsi %0, %3 : vector<256x1xi32>
    %c0_i32_0 = arith.constant 0 : i32
    %5 = vector.broadcast %c0_i32_0 : i32 to vector<256x1xi32>
    %6 = arith.cmpi ne, %4, %5 : vector<256x1xi32>
    %c0_i32_1 = arith.constant 0 : i32
    %7 = vector.broadcast %c0_i32_1 : i32 to vector<256x1xi32>
    %8 = arith.cmpi slt, %4, %7 : vector<256x1xi32>
    %c0_i32_2 = arith.constant 0 : i32
    %9 = arith.cmpi slt, %2, %c0_i32_2 : i32
    %10 = vector.broadcast %9 : i1 to vector<256x1xi1>
    %11 = vector.broadcast %10 : vector<256x1xi1> to vector<256x1xi1>
    %12 = arith.xori %8, %11 : vector<256x1xi1>
    %13 = arith.andi %12, %6 : vector<256x1xi1>
    %14 = vector.broadcast %2 : i32 to vector<256x1xi32>
    %15 = arith.addi %4, %14 : vector<256x1xi32>
    %16 = arith.select %13, %15, %4 : vector<256x1xi1>, vector<256x1xi32>
    %c1_i32_3 = arith.constant 1 : i32
    %17 = vector.broadcast %c1_i32_3 : i32 to vector<256x1xi32>
    %18 = arith.cmpi sge, %16, %17 : vector<256x1xi32>
    %19 = arith.extui %18 : vector<256x1xi1> to vector<256x1xi32>
    %20 = arith.sitofp %19 : vector<256x1xi32> to vector<256x1xf32>
    %c14_i32 = arith.constant 14 : i32
    %21 = vector.broadcast %c14_i32 : i32 to vector<256x1xi32>
    %22 = arith.cmpi sle, %16, %21 : vector<256x1xi32>
    %23 = arith.extui %22 : vector<256x1xi1> to vector<256x1xi32>
    %24 = arith.sitofp %23 : vector<256x1xi32> to vector<256x1xf32>
    %c0 = arith.constant 0 : index
    %c0_4 = arith.constant 0 : index
    %25 = vector.load %arg1[%c0, %c0_4] : memref<256x4xf32, #tpu.memory_space<vmem>>, vector<256x4xf32>
    %cst = arith.constant 0.000000e+00 : f32
    %26 = vector.broadcast %cst : f32 to vector<24x4xf32>
    %c0_5 = arith.constant 0 : index
    %c0_6 = arith.constant 0 : index
    %27 = vector.load %arg7[%c0_5, %c0_6] : memref<304x4xf32, #tpu.memory_space<vmem>>, vector<24x4xf32>
    tpu.vector_store %arg7[%c0_5, %c0_6], %26 {strides = array<i32>} : memref<304x4xf32, #tpu.memory_space<vmem>>, vector<24x4xf32>,
    %cst_7 = arith.constant 0.000000e+00 : f32
    %28 = vector.broadcast %cst_7 : f32 to vector<24x4xf32>
    %c280 = arith.constant 280 : index
    %c0_8 = arith.constant 0 : index
    %29 = vector.load %arg7[%c280, %c0_8] : memref<304x4xf32, #tpu.memory_space<vmem>>, vector<24x4xf32>
    tpu.vector_store %arg7[%c280, %c0_8], %28 {strides = array<i32>} : memref<304x4xf32, #tpu.memory_space<vmem>>, vector<24x4xf32>,
    %c24 = arith.constant 24 : index
    %c0_9 = arith.constant 0 : index
    %30 = vector.load %arg7[%c24, %c0_9] : memref<304x4xf32, #tpu.memory_space<vmem>>, vector<256x4xf32>
    tpu.vector_store %arg7[%c24, %c0_9], %25 {strides = array<i32>} : memref<304x4xf32, #tpu.memory_space<vmem>>, vector<256x4xf32>,
    %cst_10 = arith.constant 0.000000e+00 : f32
    %31 = vector.broadcast %cst_10 : f32 to vector<256x4xf32>
    %c7 = arith.constant 7 : index
    %c0_11 = arith.constant 0 : index
    %32 = vector.load %arg7[%c7, %c0_11] : memref<304x4xf32, #tpu.memory_space<vmem>>, vector<256x4xf32>
    %33 = vector.broadcast %20 : vector<256x1xf32> to vector<256x4xf32>
    %34 = arith.mulf %32, %33 : vector<256x4xf32>
    %35 = arith.truncf %34 : vector<256x4xf32> to vector<256x4xbf16>
    %c0_12 = arith.constant 0 : index
    %c0_13 = arith.constant 0 : index
    %c0_14 = arith.constant 0 : index
    %36 = vector.load %arg2[%c0_12, %c0_13, %c0_14] : memref<9x4x4xbf16, #tpu.memory_space<vmem>>, vector<1x4x4xbf16>
    %37 = vector.shape_cast %36 : vector<1x4x4xbf16> to vector<4x4xbf16>
    %cst_15 = arith.constant dense<0.000000e+00> : vector<256x4xf32>
    %38 = tpu.matmul %35, %37, %cst_15 {dimension_numbers = #tpu.dot_dimension_numbers<[1], [0], [0], [1], [0, 0, 1, 1], [], []>} : vector<256x4xbf16>, vector<4x4xbf16>, vector<256x4xf32> -> vector<256x4xf32>
    %39 = arith.addf %31, %38 : vector<256x4xf32>
    %c8 = arith.constant 8 : index
    %c0_16 = arith.constant 0 : index
    %40 = vector.load %arg7[%c8, %c0_16] : memref<304x4xf32, #tpu.memory_space<vmem>>, vector<256x4xf32>
    %41 = arith.truncf %40 : vector<256x4xf32> to vector<256x4xbf16>
    %c1 = arith.constant 1 : index
    %c0_17 = arith.constant 0 : index
    %c0_18 = arith.constant 0 : index
    %42 = vector.load %arg2[%c1, %c0_17, %c0_18] : memref<9x4x4xbf16, #tpu.memory_space<vmem>>, vector<1x4x4xbf16>
    %43 = vector.shape_cast %42 : vector<1x4x4xbf16> to vector<4x4xbf16>
    %cst_19 = arith.constant dense<0.000000e+00> : vector<256x4xf32>
    %44 = tpu.matmul %41, %43, %cst_19 {dimension_numbers = #tpu.dot_dimension_numbers<[1], [0], [0], [1], [0, 0, 1, 1], [], []>} : vector<256x4xbf16>, vector<4x4xbf16>, vector<256x4xf32> -> vector<256x4xf32>
    %45 = arith.addf %39, %44 : vector<256x4xf32>
    %c9 = arith.constant 9 : index
    %c0_20 = arith.constant 0 : index
    %46 = vector.load %arg7[%c9, %c0_20] : memref<304x4xf32, #tpu.memory_space<vmem>>, vector<256x4xf32>
    %47 = vector.broadcast %24 : vector<256x1xf32> to vector<256x4xf32>
    %48 = arith.mulf %46, %47 : vector<256x4xf32>
    %49 = arith.truncf %48 : vector<256x4xf32> to vector<256x4xbf16>
    %c2 = arith.constant 2 : index
    %c0_21 = arith.constant 0 : index
    %c0_22 = arith.constant 0 : index
    %50 = vector.load %arg2[%c2, %c0_21, %c0_22] : memref<9x4x4xbf16, #tpu.memory_space<vmem>>, vector<1x4x4xbf16>
    %51 = vector.shape_cast %50 : vector<1x4x4xbf16> to vector<4x4xbf16>
    %cst_23 = arith.constant dense<0.000000e+00> : vector<256x4xf32>
    %52 = tpu.matmul %49, %51, %cst_23 {dimension_numbers = #tpu.dot_dimension_numbers<[1], [0], [0], [1], [0, 0, 1, 1], [], []>} : vector<256x4xbf16>, vector<4x4xbf16>, vector<256x4xf32> -> vector<256x4xf32>
    %53 = arith.addf %45, %52 : vector<256x4xf32>
    %c23 = arith.constant 23 : index
    %c0_24 = arith.constant 0 : index
    %54 = vector.load %arg7[%c23, %c0_24] : memref<304x4xf32, #tpu.memory_space<vmem>>, vector<256x4xf32>
    %55 = vector.broadcast %20 : vector<256x1xf32> to vector<256x4xf32>
    %56 = arith.mulf %54, %55 : vector<256x4xf32>
    %57 = arith.truncf %56 : vector<256x4xf32> to vector<256x4xbf16>
    %c3 = arith.constant 3 : index
    %c0_25 = arith.constant 0 : index
    %c0_26 = arith.constant 0 : index
    %58 = vector.load %arg2[%c3, %c0_25, %c0_26] : memref<9x4x4xbf16, #tpu.memory_space<vmem>>, vector<1x4x4xbf16>
    %59 = vector.shape_cast %58 : vector<1x4x4xbf16> to vector<4x4xbf16>
    %cst_27 = arith.constant dense<0.000000e+00> : vector<256x4xf32>
    %60 = tpu.matmul %57, %59, %cst_27 {dimension_numbers = #tpu.dot_dimension_numbers<[1], [0], [0], [1], [0, 0, 1, 1], [], []>} : vector<256x4xbf16>, vector<4x4xbf16>, vector<256x4xf32> -> vector<256x4xf32>
    %61 = arith.addf %53, %60 : vector<256x4xf32>
    %c24_28 = arith.constant 24 : index
    %c0_29 = arith.constant 0 : index
    %62 = vector.load %arg7[%c24_28, %c0_29] : memref<304x4xf32, #tpu.memory_space<vmem>>, vector<256x4xf32>
    %63 = arith.truncf %62 : vector<256x4xf32> to vector<256x4xbf16>
    %c4 = arith.constant 4 : index
    %c0_30 = arith.constant 0 : index
    %c0_31 = arith.constant 0 : index
    %64 = vector.load %arg2[%c4, %c0_30, %c0_31] : memref<9x4x4xbf16, #tpu.memory_space<vmem>>, vector<1x4x4xbf16>
    %65 = vector.shape_cast %64 : vector<1x4x4xbf16> to vector<4x4xbf16>
    %cst_32 = arith.constant dense<0.000000e+00> : vector<256x4xf32>
    %66 = tpu.matmul %63, %65, %cst_32 {dimension_numbers = #tpu.dot_dimension_numbers<[1], [0], [0], [1], [0, 0, 1, 1], [], []>} : vector<256x4xbf16>, vector<4x4xbf16>, vector<256x4xf32> -> vector<256x4xf32>
    %67 = arith.addf %61, %66 : vector<256x4xf32>
    %c25 = arith.constant 25 : index
    %c0_33 = arith.constant 0 : index
    %68 = vector.load %arg7[%c25, %c0_33] : memref<304x4xf32, #tpu.memory_space<vmem>>, vector<256x4xf32>
    %69 = vector.broadcast %24 : vector<256x1xf32> to vector<256x4xf32>
    %70 = arith.mulf %68, %69 : vector<256x4xf32>
    %71 = arith.truncf %70 : vector<256x4xf32> to vector<256x4xbf16>
    %c5 = arith.constant 5 : index
    %c0_34 = arith.constant 0 : index
    %c0_35 = arith.constant 0 : index
    %72 = vector.load %arg2[%c5, %c0_34, %c0_35] : memref<9x4x4xbf16, #tpu.memory_space<vmem>>, vector<1x4x4xbf16>
    %73 = vector.shape_cast %72 : vector<1x4x4xbf16> to vector<4x4xbf16>
    %cst_36 = arith.constant dense<0.000000e+00> : vector<256x4xf32>
    %74 = tpu.matmul %71, %73, %cst_36 {dimension_numbers = #tpu.dot_dimension_numbers<[1], [0], [0], [1], [0, 0, 1, 1], [], []>} : vector<256x4xbf16>, vector<4x4xbf16>, vector<256x4xf32> -> vector<256x4xf32>
    %75 = arith.addf %67, %74 : vector<256x4xf32>
    %c39 = arith.constant 39 : index
    %c0_37 = arith.constant 0 : index
    %76 = vector.load %arg7[%c39, %c0_37] : memref<304x4xf32, #tpu.memory_space<vmem>>, vector<256x4xf32>
    %77 = vector.broadcast %20 : vector<256x1xf32> to vector<256x4xf32>
    %78 = arith.mulf %76, %77 : vector<256x4xf32>
    %79 = arith.truncf %78 : vector<256x4xf32> to vector<256x4xbf16>
    %c6 = arith.constant 6 : index
    %c0_38 = arith.constant 0 : index
    %c0_39 = arith.constant 0 : index
    %80 = vector.load %arg2[%c6, %c0_38, %c0_39] : memref<9x4x4xbf16, #tpu.memory_space<vmem>>, vector<1x4x4xbf16>
    %81 = vector.shape_cast %80 : vector<1x4x4xbf16> to vector<4x4xbf16>
    %cst_40 = arith.constant dense<0.000000e+00> : vector<256x4xf32>
    %82 = tpu.matmul %79, %81, %cst_40 {dimension_numbers = #tpu.dot_dimension_numbers<[1], [0], [0], [1], [0, 0, 1, 1], [], []>} : vector<256x4xbf16>, vector<4x4xbf16>, vector<256x4xf32> -> vector<256x4xf32>
    %83 = arith.addf %75, %82 : vector<256x4xf32>
    %c40 = arith.constant 40 : index
    %c0_41 = arith.constant 0 : index
    %84 = vector.load %arg7[%c40, %c0_41] : memref<304x4xf32, #tpu.memory_space<vmem>>, vector<256x4xf32>
    %85 = arith.truncf %84 : vector<256x4xf32> to vector<256x4xbf16>
    %c7_42 = arith.constant 7 : index
    %c0_43 = arith.constant 0 : index
    %c0_44 = arith.constant 0 : index
    %86 = vector.load %arg2[%c7_42, %c0_43, %c0_44] : memref<9x4x4xbf16, #tpu.memory_space<vmem>>, vector<1x4x4xbf16>
    %87 = vector.shape_cast %86 : vector<1x4x4xbf16> to vector<4x4xbf16>
    %cst_45 = arith.constant dense<0.000000e+00> : vector<256x4xf32>
    %88 = tpu.matmul %85, %87, %cst_45 {dimension_numbers = #tpu.dot_dimension_numbers<[1], [0], [0], [1], [0, 0, 1, 1], [], []>} : vector<256x4xbf16>, vector<4x4xbf16>, vector<256x4xf32> -> vector<256x4xf32>
    %89 = arith.addf %83, %88 : vector<256x4xf32>
    %c41 = arith.constant 41 : index
    %c0_46 = arith.constant 0 : index
    %90 = vector.load %arg7[%c41, %c0_46] : memref<304x4xf32, #tpu.memory_space<vmem>>, vector<256x4xf32>
    %91 = vector.broadcast %24 : vector<256x1xf32> to vector<256x4xf32>
    %92 = arith.mulf %90, %91 : vector<256x4xf32>
    %93 = arith.truncf %92 : vector<256x4xf32> to vector<256x4xbf16>
    %c8_47 = arith.constant 8 : index
    %c0_48 = arith.constant 0 : index
    %c0_49 = arith.constant 0 : index
    %94 = vector.load %arg2[%c8_47, %c0_48, %c0_49] : memref<9x4x4xbf16, #tpu.memory_space<vmem>>, vector<1x4x4xbf16>
    %95 = vector.shape_cast %94 : vector<1x4x4xbf16> to vector<4x4xbf16>
    %cst_50 = arith.constant dense<0.000000e+00> : vector<256x4xf32>
    %96 = tpu.matmul %93, %95, %cst_50 {dimension_numbers = #tpu.dot_dimension_numbers<[1], [0], [0], [1], [0, 0, 1, 1], [], []>} : vector<256x4xbf16>, vector<4x4xbf16>, vector<256x4xf32> -> vector<256x4xf32>
    %97 = arith.addf %89, %96 : vector<256x4xf32>
    %c0_51 = arith.constant 0 : index
    %c0_52 = arith.constant 0 : index
    %98 = vector.load %arg3[%c0_51, %c0_52] : memref<1x4xf32, #tpu.memory_space<vmem>>, vector<1x4xf32>
    %99 = vector.broadcast %98 : vector<1x4xf32> to vector<256x4xf32>
    %100 = arith.addf %97, %99 : vector<256x4xf32>
    %c0_53 = arith.constant 0 : index
    %c0_54 = arith.constant 0 : index
    %101 = vector.load %arg4[%c0_53, %c0_54] : memref<256x4xf32, #tpu.memory_space<vmem>>, vector<256x4xf32>
    tpu.vector_store %arg4[%c0_53, %c0_54], %100 {strides = array<i32>} : memref<256x4xf32, #tpu.memory_space<vmem>>, vector<256x4xf32>,
    %cst_55 = arith.constant dense<0.000000e+00> : vector<4xf32>
    %102 = vector.multi_reduction <add>, %100, %cst_55 [0] : vector<256x4xf32> to vector<4xf32>
    %103 = vector.shape_cast %102 : vector<4xf32> to vector<1x4xf32>
    %c0_56 = arith.constant 0 : index
    %c0_57 = arith.constant 0 : index
    %c0_58 = arith.constant 0 : index
    %104 = vector.load %arg5[%c0_56, %c0_57, %c0_58] : memref<1x1x4xf32, #tpu.memory_space<vmem>>, vector<1x1x4xf32>
    %105 = vector.shape_cast %104 : vector<1x1x4xf32> to vector<1x4xf32>
    %106 = vector.shape_cast %103 : vector<1x4xf32> to vector<1x1x4xf32>
    tpu.vector_store %arg5[%c0_56, %c0_57, %c0_58], %106 {strides = array<i32>} : memref<1x1x4xf32, #tpu.memory_space<vmem>>, vector<1x1x4xf32>,
    %107 = arith.mulf %100, %100 : vector<256x4xf32>
    %cst_59 = arith.constant dense<0.000000e+00> : vector<4xf32>
    %108 = vector.multi_reduction <add>, %107, %cst_59 [0] : vector<256x4xf32> to vector<4xf32>
    %109 = vector.shape_cast %108 : vector<4xf32> to vector<1x4xf32>
    %c0_60 = arith.constant 0 : index
    %c0_61 = arith.constant 0 : index
    %c0_62 = arith.constant 0 : index
    %110 = vector.load %arg6[%c0_60, %c0_61, %c0_62] : memref<1x1x4xf32, #tpu.memory_space<vmem>>, vector<1x1x4xf32>
    %111 = vector.shape_cast %110 : vector<1x1x4xf32> to vector<1x4xf32>
    %112 = vector.shape_cast %109 : vector<1x4xf32> to vector<1x1x4xf32>
    tpu.vector_store %arg6[%c0_60, %c0_61, %c0_62], %112 {strides = array<i32>} : memref<1x1x4xf32, #tpu.memory_space<vmem>>, vector<1x1x4xf32>,
    return
  }
  func.func @transform_0(%arg0: i32) -> (i32, i32) {
    %c0_i32 = arith.constant 0 : i32
    %c0_i32_0 = arith.constant 0 : i32
    return %arg0, %c0_i32 : i32, i32
  }
  func.func @transform_1(%arg0: i32) -> (i32, i32, i32) {
    %c0_i32 = arith.constant 0 : i32
    %c0_i32_0 = arith.constant 0 : i32
    %c0_i32_1 = arith.constant 0 : i32
    %c0_i32_2 = arith.constant 0 : i32
    return %c0_i32, %c0_i32_0, %c0_i32_1 : i32, i32, i32
  }
  func.func @transform_2(%arg0: i32) -> (i32, i32) {
    %c0_i32 = arith.constant 0 : i32
    %c0_i32_0 = arith.constant 0 : i32
    %c0_i32_1 = arith.constant 0 : i32
    return %c0_i32, %c0_i32_0 : i32, i32
  }
  func.func @transform_3(%arg0: i32) -> (i32, i32) {
    %c0_i32 = arith.constant 0 : i32
    %c0_i32_0 = arith.constant 0 : i32
    return %arg0, %c0_i32 : i32, i32
  }
  func.func @transform_4(%arg0: i32) -> (i32, i32, i32) {
    %c0_i32 = arith.constant 0 : i32
    %c0_i32_0 = arith.constant 0 : i32
    %c0_i32_1 = arith.constant 0 : i32
    return %arg0, %c0_i32, %c0_i32_0 : i32, i32, i32
  }
  func.func @transform_5(%arg0: i32) -> (i32, i32, i32) {
    %c0_i32 = arith.constant 0 : i32
    %c0_i32_0 = arith.constant 0 : i32
    %c0_i32_1 = arith.constant 0 : i32
    return %arg0, %c0_i32, %c0_i32_0 : i32, i32, i32
  }
}

module attributes {stable_mosaic.version = 11 : i64} {
  func.func @_bn_relu_conv2_kernel(%arg0: i32, %arg1: memref<256x4xf32, #tpu.memory_space<vmem>>, %arg2: memref<256x4xf32, #tpu.memory_space<vmem>>, %arg3: memref<1x4xf32, #tpu.memory_space<vmem>>, %arg4: memref<1x4xf32, #tpu.memory_space<vmem>>, %arg5: memref<9x4x4xbf16, #tpu.memory_space<vmem>>, %arg6: memref<1x4xf32, #tpu.memory_space<vmem>>, %arg7: memref<256x4xf32, #tpu.memory_space<vmem>>, %arg8: memref<304x4xf32, #tpu.memory_space<vmem>>) attributes {dimension_semantics = [#tpu.dimension_semantics<parallel>], iteration_bounds = array<i64: 2>, scalar_prefetch = 0 : i64, scratch_operands = 1 : i64, tpu.core_type = #tpu.core_type<tc>, window_params = [{transform_indices = @transform_0, window_bounds = array<i64: 256, 4>}, {transform_indices = @transform_1, window_bounds = array<i64: 256, 4>}, {pipeline_mode = #tpu.pipeline_mode<synchronous>, transform_indices = @transform_2, window_bounds = array<i64: 1, 4>}, {pipeline_mode = #tpu.pipeline_mode<synchronous>, transform_indices = @transform_3, window_bounds = array<i64: 1, 4>}, {pipeline_mode = #tpu.pipeline_mode<synchronous>, transform_indices = @transform_4, window_bounds = array<i64: 9, 4, 4>}, {pipeline_mode = #tpu.pipeline_mode<synchronous>, transform_indices = @transform_5, window_bounds = array<i64: 1, 4>}, {transform_indices = @transform_6, window_bounds = array<i64: 256, 4>}]} {
    %0 = tpu.iota {dimensions = array<i32: 0>} : vector<256x1xi32>
    %c16_i32 = arith.constant 16 : i32
    %c0_i32 = arith.constant 0 : i32
    %1 = arith.cmpi eq, %c16_i32, %c0_i32 : i32
    %c1_i32 = arith.constant 1 : i32
    %2 = arith.select %1, %c1_i32, %c16_i32 : i32
    %3 = vector.broadcast %2 : i32 to vector<256x1xi32>
    %4 = arith.remsi %0, %3 : vector<256x1xi32>
    %c0_i32_0 = arith.constant 0 : i32
    %5 = vector.broadcast %c0_i32_0 : i32 to vector<256x1xi32>
    %6 = arith.cmpi ne, %4, %5 : vector<256x1xi32>
    %c0_i32_1 = arith.constant 0 : i32
    %7 = vector.broadcast %c0_i32_1 : i32 to vector<256x1xi32>
    %8 = arith.cmpi slt, %4, %7 : vector<256x1xi32>
    %c0_i32_2 = arith.constant 0 : i32
    %9 = arith.cmpi slt, %2, %c0_i32_2 : i32
    %10 = vector.broadcast %9 : i1 to vector<256x1xi1>
    %11 = vector.broadcast %10 : vector<256x1xi1> to vector<256x1xi1>
    %12 = arith.xori %8, %11 : vector<256x1xi1>
    %13 = arith.andi %12, %6 : vector<256x1xi1>
    %14 = vector.broadcast %2 : i32 to vector<256x1xi32>
    %15 = arith.addi %4, %14 : vector<256x1xi32>
    %16 = arith.select %13, %15, %4 : vector<256x1xi1>, vector<256x1xi32>
    %c1_i32_3 = arith.constant 1 : i32
    %17 = vector.broadcast %c1_i32_3 : i32 to vector<256x1xi32>
    %18 = arith.cmpi sge, %16, %17 : vector<256x1xi32>
    %19 = arith.extui %18 : vector<256x1xi1> to vector<256x1xi32>
    %20 = arith.sitofp %19 : vector<256x1xi32> to vector<256x1xf32>
    %c14_i32 = arith.constant 14 : i32
    %21 = vector.broadcast %c14_i32 : i32 to vector<256x1xi32>
    %22 = arith.cmpi sle, %16, %21 : vector<256x1xi32>
    %23 = arith.extui %22 : vector<256x1xi1> to vector<256x1xi32>
    %24 = arith.sitofp %23 : vector<256x1xi32> to vector<256x1xf32>
    %c0 = arith.constant 0 : index
    %c0_4 = arith.constant 0 : index
    %25 = vector.load %arg1[%c0, %c0_4] : memref<256x4xf32, #tpu.memory_space<vmem>>, vector<256x4xf32>
    %c0_5 = arith.constant 0 : index
    %c0_6 = arith.constant 0 : index
    %26 = vector.load %arg3[%c0_5, %c0_6] : memref<1x4xf32, #tpu.memory_space<vmem>>, vector<1x4xf32>
    %27 = vector.broadcast %26 : vector<1x4xf32> to vector<256x4xf32>
    %28 = arith.mulf %25, %27 : vector<256x4xf32>
    %c0_7 = arith.constant 0 : index
    %c0_8 = arith.constant 0 : index
    %29 = vector.load %arg4[%c0_7, %c0_8] : memref<1x4xf32, #tpu.memory_space<vmem>>, vector<1x4xf32>
    %30 = vector.broadcast %29 : vector<1x4xf32> to vector<256x4xf32>
    %31 = arith.addf %28, %30 : vector<256x4xf32>
    %cst = arith.constant 0.000000e+00 : f32
    %32 = vector.broadcast %cst : f32 to vector<256x4xf32>
    %33 = arith.maximumf %31, %32 : vector<256x4xf32>
    %cst_9 = arith.constant 0.000000e+00 : f32
    %34 = vector.broadcast %cst_9 : f32 to vector<24x4xf32>
    %c0_10 = arith.constant 0 : index
    %c0_11 = arith.constant 0 : index
    %35 = vector.load %arg8[%c0_10, %c0_11] : memref<304x4xf32, #tpu.memory_space<vmem>>, vector<24x4xf32>
    tpu.vector_store %arg8[%c0_10, %c0_11], %34 {strides = array<i32>} : memref<304x4xf32, #tpu.memory_space<vmem>>, vector<24x4xf32>,
    %cst_12 = arith.constant 0.000000e+00 : f32
    %36 = vector.broadcast %cst_12 : f32 to vector<24x4xf32>
    %c280 = arith.constant 280 : index
    %c0_13 = arith.constant 0 : index
    %37 = vector.load %arg8[%c280, %c0_13] : memref<304x4xf32, #tpu.memory_space<vmem>>, vector<24x4xf32>
    tpu.vector_store %arg8[%c280, %c0_13], %36 {strides = array<i32>} : memref<304x4xf32, #tpu.memory_space<vmem>>, vector<24x4xf32>,
    %c24 = arith.constant 24 : index
    %c0_14 = arith.constant 0 : index
    %38 = vector.load %arg8[%c24, %c0_14] : memref<304x4xf32, #tpu.memory_space<vmem>>, vector<256x4xf32>
    tpu.vector_store %arg8[%c24, %c0_14], %33 {strides = array<i32>} : memref<304x4xf32, #tpu.memory_space<vmem>>, vector<256x4xf32>,
    %cst_15 = arith.constant 0.000000e+00 : f32
    %39 = vector.broadcast %cst_15 : f32 to vector<256x4xf32>
    %c7 = arith.constant 7 : index
    %c0_16 = arith.constant 0 : index
    %40 = vector.load %arg8[%c7, %c0_16] : memref<304x4xf32, #tpu.memory_space<vmem>>, vector<256x4xf32>
    %41 = vector.broadcast %20 : vector<256x1xf32> to vector<256x4xf32>
    %42 = arith.mulf %40, %41 : vector<256x4xf32>
    %43 = arith.truncf %42 : vector<256x4xf32> to vector<256x4xbf16>
    %c0_17 = arith.constant 0 : index
    %c0_18 = arith.constant 0 : index
    %c0_19 = arith.constant 0 : index
    %44 = vector.load %arg5[%c0_17, %c0_18, %c0_19] : memref<9x4x4xbf16, #tpu.memory_space<vmem>>, vector<1x4x4xbf16>
    %45 = vector.shape_cast %44 : vector<1x4x4xbf16> to vector<4x4xbf16>
    %cst_20 = arith.constant dense<0.000000e+00> : vector<256x4xf32>
    %46 = tpu.matmul %43, %45, %cst_20 {dimension_numbers = #tpu.dot_dimension_numbers<[1], [0], [0], [1], [0, 0, 1, 1], [], []>} : vector<256x4xbf16>, vector<4x4xbf16>, vector<256x4xf32> -> vector<256x4xf32>
    %47 = arith.addf %39, %46 : vector<256x4xf32>
    %c8 = arith.constant 8 : index
    %c0_21 = arith.constant 0 : index
    %48 = vector.load %arg8[%c8, %c0_21] : memref<304x4xf32, #tpu.memory_space<vmem>>, vector<256x4xf32>
    %49 = arith.truncf %48 : vector<256x4xf32> to vector<256x4xbf16>
    %c1 = arith.constant 1 : index
    %c0_22 = arith.constant 0 : index
    %c0_23 = arith.constant 0 : index
    %50 = vector.load %arg5[%c1, %c0_22, %c0_23] : memref<9x4x4xbf16, #tpu.memory_space<vmem>>, vector<1x4x4xbf16>
    %51 = vector.shape_cast %50 : vector<1x4x4xbf16> to vector<4x4xbf16>
    %cst_24 = arith.constant dense<0.000000e+00> : vector<256x4xf32>
    %52 = tpu.matmul %49, %51, %cst_24 {dimension_numbers = #tpu.dot_dimension_numbers<[1], [0], [0], [1], [0, 0, 1, 1], [], []>} : vector<256x4xbf16>, vector<4x4xbf16>, vector<256x4xf32> -> vector<256x4xf32>
    %53 = arith.addf %47, %52 : vector<256x4xf32>
    %c9 = arith.constant 9 : index
    %c0_25 = arith.constant 0 : index
    %54 = vector.load %arg8[%c9, %c0_25] : memref<304x4xf32, #tpu.memory_space<vmem>>, vector<256x4xf32>
    %55 = vector.broadcast %24 : vector<256x1xf32> to vector<256x4xf32>
    %56 = arith.mulf %54, %55 : vector<256x4xf32>
    %57 = arith.truncf %56 : vector<256x4xf32> to vector<256x4xbf16>
    %c2 = arith.constant 2 : index
    %c0_26 = arith.constant 0 : index
    %c0_27 = arith.constant 0 : index
    %58 = vector.load %arg5[%c2, %c0_26, %c0_27] : memref<9x4x4xbf16, #tpu.memory_space<vmem>>, vector<1x4x4xbf16>
    %59 = vector.shape_cast %58 : vector<1x4x4xbf16> to vector<4x4xbf16>
    %cst_28 = arith.constant dense<0.000000e+00> : vector<256x4xf32>
    %60 = tpu.matmul %57, %59, %cst_28 {dimension_numbers = #tpu.dot_dimension_numbers<[1], [0], [0], [1], [0, 0, 1, 1], [], []>} : vector<256x4xbf16>, vector<4x4xbf16>, vector<256x4xf32> -> vector<256x4xf32>
    %61 = arith.addf %53, %60 : vector<256x4xf32>
    %c23 = arith.constant 23 : index
    %c0_29 = arith.constant 0 : index
    %62 = vector.load %arg8[%c23, %c0_29] : memref<304x4xf32, #tpu.memory_space<vmem>>, vector<256x4xf32>
    %63 = vector.broadcast %20 : vector<256x1xf32> to vector<256x4xf32>
    %64 = arith.mulf %62, %63 : vector<256x4xf32>
    %65 = arith.truncf %64 : vector<256x4xf32> to vector<256x4xbf16>
    %c3 = arith.constant 3 : index
    %c0_30 = arith.constant 0 : index
    %c0_31 = arith.constant 0 : index
    %66 = vector.load %arg5[%c3, %c0_30, %c0_31] : memref<9x4x4xbf16, #tpu.memory_space<vmem>>, vector<1x4x4xbf16>
    %67 = vector.shape_cast %66 : vector<1x4x4xbf16> to vector<4x4xbf16>
    %cst_32 = arith.constant dense<0.000000e+00> : vector<256x4xf32>
    %68 = tpu.matmul %65, %67, %cst_32 {dimension_numbers = #tpu.dot_dimension_numbers<[1], [0], [0], [1], [0, 0, 1, 1], [], []>} : vector<256x4xbf16>, vector<4x4xbf16>, vector<256x4xf32> -> vector<256x4xf32>
    %69 = arith.addf %61, %68 : vector<256x4xf32>
    %c24_33 = arith.constant 24 : index
    %c0_34 = arith.constant 0 : index
    %70 = vector.load %arg8[%c24_33, %c0_34] : memref<304x4xf32, #tpu.memory_space<vmem>>, vector<256x4xf32>
    %71 = arith.truncf %70 : vector<256x4xf32> to vector<256x4xbf16>
    %c4 = arith.constant 4 : index
    %c0_35 = arith.constant 0 : index
    %c0_36 = arith.constant 0 : index
    %72 = vector.load %arg5[%c4, %c0_35, %c0_36] : memref<9x4x4xbf16, #tpu.memory_space<vmem>>, vector<1x4x4xbf16>
    %73 = vector.shape_cast %72 : vector<1x4x4xbf16> to vector<4x4xbf16>
    %cst_37 = arith.constant dense<0.000000e+00> : vector<256x4xf32>
    %74 = tpu.matmul %71, %73, %cst_37 {dimension_numbers = #tpu.dot_dimension_numbers<[1], [0], [0], [1], [0, 0, 1, 1], [], []>} : vector<256x4xbf16>, vector<4x4xbf16>, vector<256x4xf32> -> vector<256x4xf32>
    %75 = arith.addf %69, %74 : vector<256x4xf32>
    %c25 = arith.constant 25 : index
    %c0_38 = arith.constant 0 : index
    %76 = vector.load %arg8[%c25, %c0_38] : memref<304x4xf32, #tpu.memory_space<vmem>>, vector<256x4xf32>
    %77 = vector.broadcast %24 : vector<256x1xf32> to vector<256x4xf32>
    %78 = arith.mulf %76, %77 : vector<256x4xf32>
    %79 = arith.truncf %78 : vector<256x4xf32> to vector<256x4xbf16>
    %c5 = arith.constant 5 : index
    %c0_39 = arith.constant 0 : index
    %c0_40 = arith.constant 0 : index
    %80 = vector.load %arg5[%c5, %c0_39, %c0_40] : memref<9x4x4xbf16, #tpu.memory_space<vmem>>, vector<1x4x4xbf16>
    %81 = vector.shape_cast %80 : vector<1x4x4xbf16> to vector<4x4xbf16>
    %cst_41 = arith.constant dense<0.000000e+00> : vector<256x4xf32>
    %82 = tpu.matmul %79, %81, %cst_41 {dimension_numbers = #tpu.dot_dimension_numbers<[1], [0], [0], [1], [0, 0, 1, 1], [], []>} : vector<256x4xbf16>, vector<4x4xbf16>, vector<256x4xf32> -> vector<256x4xf32>
    %83 = arith.addf %75, %82 : vector<256x4xf32>
    %c39 = arith.constant 39 : index
    %c0_42 = arith.constant 0 : index
    %84 = vector.load %arg8[%c39, %c0_42] : memref<304x4xf32, #tpu.memory_space<vmem>>, vector<256x4xf32>
    %85 = vector.broadcast %20 : vector<256x1xf32> to vector<256x4xf32>
    %86 = arith.mulf %84, %85 : vector<256x4xf32>
    %87 = arith.truncf %86 : vector<256x4xf32> to vector<256x4xbf16>
    %c6 = arith.constant 6 : index
    %c0_43 = arith.constant 0 : index
    %c0_44 = arith.constant 0 : index
    %88 = vector.load %arg5[%c6, %c0_43, %c0_44] : memref<9x4x4xbf16, #tpu.memory_space<vmem>>, vector<1x4x4xbf16>
    %89 = vector.shape_cast %88 : vector<1x4x4xbf16> to vector<4x4xbf16>
    %cst_45 = arith.constant dense<0.000000e+00> : vector<256x4xf32>
    %90 = tpu.matmul %87, %89, %cst_45 {dimension_numbers = #tpu.dot_dimension_numbers<[1], [0], [0], [1], [0, 0, 1, 1], [], []>} : vector<256x4xbf16>, vector<4x4xbf16>, vector<256x4xf32> -> vector<256x4xf32>
    %91 = arith.addf %83, %90 : vector<256x4xf32>
    %c40 = arith.constant 40 : index
    %c0_46 = arith.constant 0 : index
    %92 = vector.load %arg8[%c40, %c0_46] : memref<304x4xf32, #tpu.memory_space<vmem>>, vector<256x4xf32>
    %93 = arith.truncf %92 : vector<256x4xf32> to vector<256x4xbf16>
    %c7_47 = arith.constant 7 : index
    %c0_48 = arith.constant 0 : index
    %c0_49 = arith.constant 0 : index
    %94 = vector.load %arg5[%c7_47, %c0_48, %c0_49] : memref<9x4x4xbf16, #tpu.memory_space<vmem>>, vector<1x4x4xbf16>
    %95 = vector.shape_cast %94 : vector<1x4x4xbf16> to vector<4x4xbf16>
    %cst_50 = arith.constant dense<0.000000e+00> : vector<256x4xf32>
    %96 = tpu.matmul %93, %95, %cst_50 {dimension_numbers = #tpu.dot_dimension_numbers<[1], [0], [0], [1], [0, 0, 1, 1], [], []>} : vector<256x4xbf16>, vector<4x4xbf16>, vector<256x4xf32> -> vector<256x4xf32>
    %97 = arith.addf %91, %96 : vector<256x4xf32>
    %c41 = arith.constant 41 : index
    %c0_51 = arith.constant 0 : index
    %98 = vector.load %arg8[%c41, %c0_51] : memref<304x4xf32, #tpu.memory_space<vmem>>, vector<256x4xf32>
    %99 = vector.broadcast %24 : vector<256x1xf32> to vector<256x4xf32>
    %100 = arith.mulf %98, %99 : vector<256x4xf32>
    %101 = arith.truncf %100 : vector<256x4xf32> to vector<256x4xbf16>
    %c8_52 = arith.constant 8 : index
    %c0_53 = arith.constant 0 : index
    %c0_54 = arith.constant 0 : index
    %102 = vector.load %arg5[%c8_52, %c0_53, %c0_54] : memref<9x4x4xbf16, #tpu.memory_space<vmem>>, vector<1x4x4xbf16>
    %103 = vector.shape_cast %102 : vector<1x4x4xbf16> to vector<4x4xbf16>
    %cst_55 = arith.constant dense<0.000000e+00> : vector<256x4xf32>
    %104 = tpu.matmul %101, %103, %cst_55 {dimension_numbers = #tpu.dot_dimension_numbers<[1], [0], [0], [1], [0, 0, 1, 1], [], []>} : vector<256x4xbf16>, vector<4x4xbf16>, vector<256x4xf32> -> vector<256x4xf32>
    %105 = arith.addf %97, %104 : vector<256x4xf32>
    %c0_56 = arith.constant 0 : index
    %c0_57 = arith.constant 0 : index
    %106 = vector.load %arg6[%c0_56, %c0_57] : memref<1x4xf32, #tpu.memory_space<vmem>>, vector<1x4xf32>
    %107 = vector.broadcast %106 : vector<1x4xf32> to vector<256x4xf32>
    %108 = arith.addf %105, %107 : vector<256x4xf32>
    %c0_58 = arith.constant 0 : index
    %c0_59 = arith.constant 0 : index
    %109 = vector.load %arg2[%c0_58, %c0_59] : memref<256x4xf32, #tpu.memory_space<vmem>>, vector<256x4xf32>
    %110 = arith.addf %108, %109 : vector<256x4xf32>
    %c0_60 = arith.constant 0 : index
    %c0_61 = arith.constant 0 : index
    %111 = vector.load %arg7[%c0_60, %c0_61] : memref<256x4xf32, #tpu.memory_space<vmem>>, vector<256x4xf32>
    tpu.vector_store %arg7[%c0_60, %c0_61], %110 {strides = array<i32>} : memref<256x4xf32, #tpu.memory_space<vmem>>, vector<256x4xf32>,
    return
  }
  func.func @transform_0(%arg0: i32) -> (i32, i32) {
    %c0_i32 = arith.constant 0 : i32
    %c0_i32_0 = arith.constant 0 : i32
    return %arg0, %c0_i32 : i32, i32
  }
  func.func @transform_1(%arg0: i32) -> (i32, i32) {
    %c0_i32 = arith.constant 0 : i32
    %c0_i32_0 = arith.constant 0 : i32
    return %arg0, %c0_i32 : i32, i32
  }
  func.func @transform_2(%arg0: i32) -> (i32, i32) {
    %c0_i32 = arith.constant 0 : i32
    %c0_i32_0 = arith.constant 0 : i32
    %c0_i32_1 = arith.constant 0 : i32
    return %c0_i32, %c0_i32_0 : i32, i32
  }
  func.func @transform_3(%arg0: i32) -> (i32, i32) {
    %c0_i32 = arith.constant 0 : i32
    %c0_i32_0 = arith.constant 0 : i32
    %c0_i32_1 = arith.constant 0 : i32
    return %c0_i32, %c0_i32_0 : i32, i32
  }
  func.func @transform_4(%arg0: i32) -> (i32, i32, i32) {
    %c0_i32 = arith.constant 0 : i32
    %c0_i32_0 = arith.constant 0 : i32
    %c0_i32_1 = arith.constant 0 : i32
    %c0_i32_2 = arith.constant 0 : i32
    return %c0_i32, %c0_i32_0, %c0_i32_1 : i32, i32, i32
  }
  func.func @transform_5(%arg0: i32) -> (i32, i32) {
    %c0_i32 = arith.constant 0 : i32
    %c0_i32_0 = arith.constant 0 : i32
    %c0_i32_1 = arith.constant 0 : i32
    return %c0_i32, %c0_i32_0 : i32, i32
  }
  func.func @transform_6(%arg0: i32) -> (i32, i32) {
    %c0_i32 = arith.constant 0 : i32
    %c0_i32_0 = arith.constant 0 : i32
    return %arg0, %c0_i32 : i32, i32
  }
}

</mosaic_0001>

<bundles_post_ra>
// kernel: residual_block_forward.2
= control target key start
LH: loop header
LB: loop body
LE: loop exit
PB: predicated region body
PF: predicated region fallthrough
CT: control target
= control target key end

     0   :  { %s5022_s18 = smov 0   ;;  %s6313_s0 = inlined_call_operand.vmem [shape: f32[512,4], index: 0, kind: input, shape index: {}]   ;;  %s6314_s1 = inlined_call_operand.vmem [shape: bf16[9,4,4], index: 1, kind: input, shape index: {}]   ;;  %s6315_s2 = inlined_call_operand.vmem [shape: f32[1,4], index: 2, kind: input, shape index: {}]   ;;  %s6316_s3 = inlined_call_operand.vmem [shape: f32[512,4], index: 3, kind: output, shape index: {0}]   ;;  %s6317_s4 = inlined_call_operand.vmem [shape: f32[2,1,4], index: 4, kind: output, shape index: {1}]   ;;  %s6318_s5 = inlined_call_operand.vmem [shape: f32[2,1,4], index: 5, kind: output, shape index: {2}]  }
   0x1 LB: > { %s5028_s19 = sadd.s32 4294967295, %s4989_s18   ;;  %p4054_p0 = scmp.ge.s32.totalorder %s4989_s18, 1  ;;  %s4989_s18 = sphi %s5022_s18, %s16_s18  }
   0x2   : > { %p193_p1 = scmp.lt.s32.totalorder %s4989_s18, 3 }
   0x4   : > { %p194_p2 = pnand %p4054_p0, %p193_p1 }
   0x6   : > { %197 = sbr.rel (%p194_p2) target bundleno = 556 (0x22c), region = 32 }
   0xd   : > { %v4091_v0 = vld [vmem:[%s6314_s1 + $0x2] sm:$0x3]  ;;  %vm1105_vm0 = vcmask 1041408   ;;  %v4158_v1 = vld [vmem:[%s6314_s1 + $0x8] sm:$0x3]  ;;  %vm887_vm1 = vcmask 31744   ;;  %v246_v29 = vlaneseq }
   0xe   : > { %4963 = vmatprep.subr.msk.bf16.mxu1 %vm1105_vm0, %v4091_v0  ;;  %4967 = vmatprep.subr.msk.bf16.mxu0 %vm1105_vm0, %v4158_v1  ;;  %v1107_v2 = vsel %vm1105_vm0, %v4091_v0, 0  ;;  %v5042_v3 = vsel %vm1105_vm0, %v4158_v1, 0  ;;  %s4055_s24 = sshll.u32 %s5028_s19, 5  ;;  %v5048_v4 = vld [vmem:[%s6314_s1] sm:$0x3]  ;;  %v6321_v5 = vmov 0.0  }
   0xf   : > { %6369 = vst [vmem:[#allocation3_spill] sm:$0xff] %v5042_v3  ;;  %4400 = vmatpush3.bf16.msra.mxu1 %v1107_v2  ;;  %4536 = vmatpush3.bf16.msra.mxu0 %v5042_v3  ;;  %889 = vst.msk [vmem:[#allocation2 + $0x8] sm:$0xff] %vm887_vm1, %v6321_v5  ;;  %p228_p3 = scmp.lt.s32.totalorder %s4055_s24, 63  ;;  %v4175_v6 = vld [vmem:[%s6314_s1 + $0xa] sm:$0x3]  ;;  %v1319_v37 = vsel %vm1105_vm0, %v5048_v4, 0 }
  0x10   : > { %890 = vst.msk [vmem:[#allocation2 + $0x10] sm:$0xff] %vm887_vm1, %v6321_v5  ;;  %888 = vst.msk [vmem:[#allocation2] sm:$0xff] %vm887_vm1, %v6321_v5  ;;  %4964 = vmatprep.subr.msk.bf16.mxu1 %vm1105_vm0, %v5048_v4  ;;  %4969 = vmatprep.subr.msk.bf16.mxu0 %vm1105_vm0, %v4175_v6  ;;  %v2559_v40 = vsel %vm1105_vm0, %v4175_v6, 0  ;;  %v5129_v44 = vshrl.u32 %v246_v29, 7  ;;  %v5134_v45 = vld [vmem:[%s6314_s1 + $0xc] sm:$0x3] }
  0x11   : > { %891 = vst.msk [vmem:[#allocation2 + $0x118] sm:$0xff] %vm887_vm1, %v6321_v5  ;;  %892 = vst.msk [vmem:[#allocation2 + $0x120] sm:$0xff] %vm887_vm1, %v6321_v5  ;;  %s6517_s24 = smov (!%p228_p3, %s4055_s24), 63  ;;  %v5140_v46 = vld [vmem:[%s6314_s1 + $0x4] sm:$0x3]  ;;  %p239_p4 = scmp.lt.s32.totalorder %s5028_s19, 1 }
  0x12   : > { %893 = vst.msk [vmem:[#allocation2 + $0x128] sm:$0xff] %vm887_vm1, %v6321_v5  ;;  %s4056_s29 = sshll.u32 %s6517_s24, 3  ;;  %v248_v51 = vadd.s32 8, %v5129_v44  ;;  %v250_v61 = vadd.s32 24, %v5129_v44  ;;  %v252_v6 = vadd.s32 40, %v5129_v44 }
  0x13   : > { %s5077_s7 = scalar_lea.vmem %s6313_s0, %s4056_s29  ;;  %s6132_s27 = scalar_lea.vmem %s6316_s3, %s4056_s29 }
  0x14   : > { %v855_v7 = vld [vmem:[%s5077_s7] sm:$0xff]  ;;  %v856_v8 = vld [vmem:[%s5077_s7 + $0x8] sm:$0xff]  ;;  %v857_v9 = vld [vmem:[%s5077_s7 + $0x10] sm:$0xff]  ;;  %v290_v57 = vand.u32 15, %v248_v51  ;;  %s6519_s19 = smov (!%p239_p4, %s5028_s19), 1 }
  0x15   : > { %894 = vst.msk [vmem:[#allocation2 + $0x18] sm:$0xff] %vm887_vm1, %v855_v7  ;;  %895 = vst.msk [vmem:[#allocation2 + $0x20] sm:$0xff] %vm887_vm1, %v856_v8  ;;  %v858_v12 = vld [vmem:[%s5077_s7 + $0x18] sm:$0xff]  ;;  %v859_v14 = vld [vmem:[%s5077_s7 + $0x20] sm:$0xff]  ;;  %v254_v7 = vadd.s32 56, %v5129_v44  ;;  %s241_s29 = scalar_lea.vmem %s6317_s4, %s6519_s19 }
  0x16   : > { %v1007_v10 = vld [vmem:[#allocation2 + $0x8] sm:$0xff]  ;;  %896 = vst.msk [vmem:[#allocation2 + $0x28] sm:$0xff] %vm887_vm1, %v857_v9  ;;  %897 = vst.msk [vmem:[#allocation2 + $0x30] sm:$0xff] %vm887_vm1, %v858_v12  ;;  %v861_v16 = vld [vmem:[%s5077_s7 + $0x30] sm:$0xff]  ;;  %vm760_vm2 = vcmp.le.s32.totalorder %v290_v57, 14  ;;  %v304_v9 = vand.u32 15, %v250_v61 }
  0x17   : > { %v1008_v11 = vld [vmem:[#allocation2 + $0x10] sm:$0xff]  ;;  %v860_v15 = vld [vmem:[%s5077_s7 + $0x28] sm:$0xff]  ;;  %898 = vst.msk [vmem:[#allocation2 + $0x38] sm:$0xff] %vm887_vm1, %v859_v14  ;;  %v862_v17 = vld [vmem:[%s5077_s7 + $0x38] sm:$0xff]  ;;  %v5176_v14 = vsel %vm760_vm2, 1.0, %v6321_v5 }
  0x18   : > { %v1039_v13 = vpack.c.bf16 %v1008_v11, %v1007_v10  ;;  %899 = vst.msk [vmem:[#allocation2 + $0x40] sm:$0xff] %vm887_vm1, %v860_v15  ;;  %900 = vst.msk [vmem:[#allocation2 + $0x48] sm:$0xff] %vm887_vm1, %v861_v16  ;;  %v863_v18 = vld [vmem:[%s5077_s7 + $0x40] sm:$0xff]  ;;  %v864_v19 = vld [vmem:[%s5077_s7 + $0x48] sm:$0xff]  ;;  %v256_v10 = vadd.s32 72, %v5129_v44  ;;  %v258_v11 = vadd.s32 88, %v5129_v44 }
  0x19   : > { %901 = vst.msk [vmem:[#allocation2 + $0x50] sm:$0xff] %vm887_vm1, %v862_v17  ;;  %902 = vst.msk [vmem:[#allocation2 + $0x58] sm:$0xff] %vm887_vm1, %v863_v18  ;;  %v865_v20 = vld [vmem:[%s5077_s7 + $0x50] sm:$0xff]  ;;  %v866_v21 = vld [vmem:[%s5077_s7 + $0x58] sm:$0xff]  ;;  %v262_v16 = vadd.s32 120, %v5129_v44  ;;  %v318_v17 = vand.u32 15, %v252_v6 }
  0x1a   : > { %4401 = vmatprep.mubr.msk.bf16.mxu1 %vm887_vm1, %v1039_v13  ;;  %903 = vst.msk [vmem:[#allocation2 + $0x60] sm:$0xff] %vm887_vm1, %v864_v19  ;;  %v867_v22 = vld [vmem:[%s5077_s7 + $0x60] sm:$0xff]  ;;  %904 = vst.msk [vmem:[#allocation2 + $0x68] sm:$0xff] %vm887_vm1, %v865_v20  ;;  %v868_v23 = vld [vmem:[%s5077_s7 + $0x68] sm:$0xff]  ;;  %v260_v13 = vadd.s32 104, %v5129_v44  ;;  %vm762_vm3 = vcmp.le.s32.totalorder %v304_v9, 14 }
  0x1b   : > { %905 = vst.msk [vmem:[#allocation2 + $0x70] sm:$0xff] %vm887_vm1, %v866_v21  ;;  %906 = vst.msk [vmem:[#allocation2 + $0x78] sm:$0xff] %vm887_vm1, %v867_v22  ;;  %v869_v24 = vld [vmem:[%s5077_s7 + $0x70] sm:$0xff]  ;;  %v870_v25 = vld [vmem:[%s5077_s7 + $0x78] sm:$0xff]  ;;  %v332_v18 = vand.u32 15, %v254_v7  ;;  %v346_v19 = vand.u32 15, %v256_v10 }
  0x1c   : > { %907 = vst.msk [vmem:[#allocation2 + $0x80] sm:$0xff] %vm887_vm1, %v868_v23  ;;  %908 = vst.msk [vmem:[#allocation2 + $0x88] sm:$0xff] %vm887_vm1, %v869_v24  ;;  %v871_v26 = vld [vmem:[%s5077_s7 + $0x80] sm:$0xff]  ;;  %v872_v27 = vld [vmem:[%s5077_s7 + $0x88] sm:$0xff]  ;;  %v360_v20 = vand.u32 15, %v258_v11  ;;  %v374_v24 = vand.u32 15, %v260_v13 }
  0x1d   : > { %909 = vst.msk [vmem:[#allocation2 + $0x90] sm:$0xff] %vm887_vm1, %v870_v25  ;;  %v873_v28 = vld [vmem:[%s5077_s7 + $0x90] sm:$0xff]  ;;  %910 = vst.msk [vmem:[#allocation2 + $0x98] sm:$0xff] %vm887_vm1, %v871_v26  ;;  %v874_v30 = vld [vmem:[%s5077_s7 + $0x98] sm:$0xff]  ;;  %v388_v26 = vand.u32 15, %v262_v16  ;;  %vm764_vm4 = vcmp.le.s32.totalorder %v318_v17, 14 }
  0x1e   : > { %911 = vst.msk [vmem:[#allocation2 + $0xa0] sm:$0xff] %vm887_vm1, %v872_v27  ;;  %912 = vst.msk [vmem:[#allocation2 + $0xa8] sm:$0xff] %vm887_vm1, %v873_v28  ;;  %v875_v31 = vld [vmem:[%s5077_s7 + $0xa0] sm:$0xff]  ;;  %v876_v32 = vld [vmem:[%s5077_s7 + $0xa8] sm:$0xff]  ;;  %v278_v27 = vadd.s32 248, %v5129_v44  ;;  %v5191_v28 = vsel %vm762_vm3, 1.0, %v6321_v5 }
  0x1f   : > { %v1009_v33 = vld [vmem:[#allocation2 + $0x18] sm:$0xff]  ;;  %v1010_v34 = vld [vmem:[#allocation2 + $0x20] sm:$0xff]  ;;  %v2136_v35 = vld [vmem:[#allocation2 + $0x28] sm:$0xff]  ;;  %913 = vst.msk [vmem:[#allocation2 + $0xb0] sm:$0xff] %vm887_vm1, %v874_v30  ;;  %vm766_vm5 = vcmp.le.s32.totalorder %v332_v18, 14  ;;  %vm768_vm6 = vcmp.le.s32.totalorder %v346_v19, 14 }
  0x20   : > { %914 = vst.msk [vmem:[#allocation2 + $0xb8] sm:$0xff] %vm887_vm1, %v875_v31  ;;  %915 = vst.msk [vmem:[#allocation2 + $0xc0] sm:$0xff] %vm887_vm1, %v876_v32  ;;  %v1040_v36 = vpack.c.bf16 %v1010_v34, %v1009_v33  ;;  %v2137_v38 = vld [vmem:[#allocation2 + $0x30] sm:$0xff]  ;;  %v1013_v41 = vld [vmem:[#allocation2 + $0x38] sm:$0xff]  ;;  %vm5193_vm7 = vcmp.le.s32.totalorder %v360_v20, 14  ;;  %vm5200_vm8 = vcmp.le.s32.totalorder %v374_v24, 14 }
  0x21   : > { %v2167_v39 = vpack.c.bf16 %v2137_v38, %v2136_v35  ;;  %v1014_v42 = vld [vmem:[#allocation2 + $0x40] sm:$0xff]  ;;  %v2140_v47 = vld [vmem:[#allocation2 + $0x48] sm:$0xff]  ;;  %v2141_v48 = vld [vmem:[#allocation2 + $0x50] sm:$0xff]  ;;  %6370 = vst [vmem:[#allocation4_spill] sm:$0xff] %v5191_v28  ;;  %v500_v34 = vand.u32 15, %v278_v27  ;;  %v263_v35 = vadd.s32 128, %v5129_v44 }
  0x22   : > { %4402 = vmatmul.mubr.msk.bf16.vlgmr.msra.gmra.mrb[0].mxu1 %vm887_vm1, %v1040_v36  ;;  %4537 = vmatprep.mubr.msk.bf16.mxu0 %vm887_vm1, %v1040_v36  ;;  %v1042_v43 = vpack.c.bf16 %v1014_v42, %v1013_v41  ;;  %v1017_v49 = vld [vmem:[#allocation2 + $0x58] sm:$0xff]  ;;  %v1018_v50 = vld [vmem:[#allocation2 + $0x60] sm:$0xff]  ;;  %v2169_v52 = vpack.c.bf16 %v2141_v48, %v2140_v47  ;;  %v877_v54 = vld [vmem:[%s5077_s7 + $0xb0] sm:$0xff]  ;;  %v5206_v36 = vsel %vm764_vm4, 1.0, %v6321_v5  ;;  %vm5210_vm9 = vcmp.le.s32.totalorder %v388_v26, 14 }
  0x23   : > { %4434 = vmatpush3.bf16.msra.mxu1 %v1319_v37  ;;  %4538 = vmatmul.mubr.msk.bf16.vlgmr.msra.gmra.mrb[0].mxu0 %vm887_vm1, %v2167_v39  ;;  %v1044_v53 = vpack.c.bf16 %v1018_v50, %v1017_v49  ;;  %v878_v55 = vld [vmem:[%s5077_s7 + $0xb8] sm:$0xff]  ;;  %v879_v56 = vld [vmem:[%s5077_s7 + $0xc0] sm:$0xff]  ;;  %916 = vst.msk [vmem:[#allocation2 + $0xc8] sm:$0xff] %vm887_vm1, %v877_v54  ;;  %v880_v58 = vld [vmem:[%s5077_s7 + $0xc8] sm:$0xff]  ;;  %v2885_v41 = vsel %vm1105_vm0, %v5134_v45, 0  ;;  %v5222_v42 = vsel %vm766_vm5, 1.0, %v6321_v5 }
  0x24   : > { %4570 = vmatpush3.bf16.msra.mxu0 %v2559_v40  ;;  %4405 = vmatprep.mubr.msk.bf16.mxu1 %vm887_vm1, %v2167_v39  ;;  %917 = vst.msk [vmem:[#allocation2 + $0xd0] sm:$0xff] %vm887_vm1, %v878_v55  ;;  %918 = vst.msk [vmem:[#allocation2 + $0xd8] sm:$0xff] %vm887_vm1, %v879_v56  ;;  %v2144_v59 = vld [vmem:[#allocation2 + $0x68] sm:$0xff]  ;;  %v2145_v60 = vld [vmem:[#allocation2 + $0x70] sm:$0xff]  ;;  %v249_v39 = vadd.s32 16, %v5129_v44  ;;  %v5216_v40 = vadd.s32 136, %v5129_v44 }
  0x25   : > { %4541 = vmatprep.mubr.msk.bf16.mxu0 %vm887_vm1, %v1042_v43  ;;  %4970 = vmatprep.subr.msk.bf16.mxu0 %vm1105_vm0, %v5134_v45  ;;  %919 = vst.msk [vmem:[#allocation2 + $0xe0] sm:$0xff] %vm887_vm1, %v880_v58  ;;  %v881_v62 = vld [vmem:[%s5077_s7 + $0xd0] sm:$0xff]  ;;  %v882_v63 = vld [vmem:[%s5077_s7 + $0xd8] sm:$0xff]  ;;  %v883_v0 = vld [vmem:[%s5077_s7 + $0xe0] sm:$0xff]  ;;  %v2171_v8 = vpack.c.bf16 %v2145_v60, %v2144_v59  ;;  %v283_v47 = vand.u32 15, %v5129_v44  ;;  %v5236_v45 = vsel %vm5193_vm7, 1.0, %v6321_v5 }
  0x26   : > { %4965 = vmatprep.subr.msk.bf16.mxu1 %vm1105_vm0, %v5140_v46  ;;  %920 = vst.msk [vmem:[#allocation2 + $0xe8] sm:$0xff] %vm887_vm1, %v881_v62  ;;  %v884_v1 = vld [vmem:[%s5077_s7 + $0xe8] sm:$0xff]  ;;  %v1021_v2 = vld [vmem:[#allocation2 + $0x78] sm:$0xff]  ;;  %v1022_v4 = vld [vmem:[#allocation2 + $0x80] sm:$0xff]  ;;  %vm790_vm10 = vcmp.le.s32.totalorder %v500_v34, 14  ;;  %v5253_v58 = vsel %vm5210_vm9, 1.0, %v6321_v5 }
  0x27   : > { %921 = vst.msk [vmem:[#allocation2 + $0xf0] sm:$0xff] %vm887_vm1, %v882_v63  ;;  %922 = vst.msk [vmem:[#allocation2 + $0xf8] sm:$0xff] %vm887_vm1, %v883_v0  ;;  %v1046_v12 = vpack.c.bf16 %v1022_v4, %v1021_v2  ;;  %v5178_v15 = vld [vmem:[#allocation2 + $0x21] sm:$0xff]  ;;  %v2149_v22 = vld [vmem:[#allocation2 + $0x90] sm:$0xff]  ;;  %v5256_v59 = vsel %vm790_vm10, 1.0, %v6321_v5  ;;  %v395_v60 = vand.u32 15, %v263_v35 }
  0x28   : > { %923 = vst.msk [vmem:[#allocation2 + $0x100] sm:$0xff] %vm887_vm1, %v884_v1  ;;  %v2148_v21 = vld [vmem:[#allocation2 + $0x88] sm:$0xff]  ;;  %v2461_v23 = vmul.f32 %v5176_v14, %v5178_v15  ;;  %v5187_v25 = vld [vmem:[#allocation2 + $0x19] sm:$0xff]  ;;  %v5198_v32 = vld [vmem:[#allocation2 + $0x31] sm:$0xff]  ;;  %v297_v62 = vand.u32 15, %v249_v39  ;;  %v402_v63 = vand.u32 15, %v5216_v40 }
  0x29   : > { %v2173_v29 = vpack.c.bf16 %v2149_v22, %v2148_v21  ;;  %6375 = vst [vmem:[#allocation5_spill] sm:$0xff] %v5206_v36  ;;  %v5208_v37 = vld [vmem:[#allocation2 + $0x41] sm:$0xff]  ;;  %6378 = vst [vmem:[#allocation6_spill] sm:$0xff] %v5222_v42  ;;  %v885_v48 = vld [vmem:[%s5077_s7 + $0xf0] sm:$0xff]  ;;  %v2463_v51 = vmul.f32 %v5191_v28, %v5198_v32  ;;  %v5263_v0 = vadd.s32 152, %v5129_v44  ;;  %v265_v1 = vadd.s32 144, %v5129_v44 }
  0x2a   : > { %4406 = vmatmul.mubr.msk.bf16.gmra.mrb[4].mxu1 %vm887_vm1, %v1042_v43  ;;  %v2492_v31 = vpack.c.bf16 %v2461_v23, %v5187_v25  ;;  %v5225_v43 = vsel %vm768_vm6, 1.0, %v6321_v5  ;;  %v1025_v49 = vld [vmem:[#allocation2 + $0x98] sm:$0xff]  ;;  %v1026_v50 = vld [vmem:[#allocation2 + $0xa0] sm:$0xff]  ;;  %6380 = vst [vmem:[#allocation8_spill] sm:$0xff] %v5236_v45  ;;  %924 = vst.msk [vmem:[#allocation2 + $0x108] sm:$0xff] %vm887_vm1, %v885_v48  ;;  %v2465_v57 = vmul.f32 %v5206_v36, %v5208_v37  ;;  %vm5266_vm11 = vcmp.ge.s32.totalorder %v283_v47, 1 }
  0x2b   : > { %4542 = vmatmul.mubr.msk.bf16.gmra.mrb[4].mxu0 %vm887_vm1, %v2169_v52  ;;  %4409 = vmatprep.mubr.msk.bf16.mxu1 %vm887_vm1, %v2169_v52  ;;  %6379 = vst [vmem:[#allocation7_spill] sm:$0xff] %v5225_v43  ;;  %v5241_v52 = vsel %vm5200_vm8, 1.0, %v6321_v5  ;;  %v5246_v54 = vld [vmem:[#allocation2 + $0x29] sm:$0xff]  ;;  %6382 = vst [vmem:[#allocation10_spill] sm:$0xff] %v5253_v58  ;;  %v5259_v61 = vld [vmem:[#allocation2 + $0x39] sm:$0xff]  ;;  %v1048_v2 = vpack.c.bf16 %v1026_v50, %v1025_v49  ;;  %vm679_vm12 = vcmp.ge.s32.totalorder %v395_v60, 1 }
  0x2c   : > { %4545 = vmatprep.mubr.msk.bf16.mxu0 %vm887_vm1, %v1044_v53  ;;  %6381 = vst [vmem:[#allocation9_spill] sm:$0xff] %v5241_v52  ;;  %v1027_v55 = vld [vmem:[#allocation2 + $0xa8] sm:$0xff]  ;;  %v1028_v56 = vld [vmem:[#allocation2 + $0xb0] sm:$0xff]  ;;  %6383 = vst [vmem:[#allocation11_spill] sm:$0xff] %v5256_v59  ;;  %v267_v6 = vadd.s32 160, %v5129_v44  ;;  %v269_v7 = vadd.s32 176, %v5129_v44  ;;  %v5329_v60 = vmul.f32 %v5191_v28, %v5178_v15  ;;  %v5416_v4 = vmul.f32 %v5222_v42, %v5208_v37 }
  0x2d   : > { %v1049_v9 = vpack.c.bf16 %v1028_v56, %v1027_v55  ;;  %v5274_v10 = vsel %vm679_vm12, 1.0, %v6321_v5  ;;  %v409_v11 = vand.u32 15, %v265_v1  ;;  %v5277_v13 = vld [vmem:[#allocation2 + $0x51] sm:$0xff]  ;;  %v251_v16 = vadd.s32 32, %v5129_v44  ;;  %v5280_v19 = vld [vmem:[#allocation2 + $0x61] sm:$0xff]  ;;  %v5312_v35 = vld [vmem:[#allocation2 + $0x49] sm:$0xff] }
  0x2e   : > { %v423_v17 = vand.u32 15, %v267_v6  ;;  %v437_v18 = vand.u32 15, %v269_v7  ;;  %v268_v20 = vadd.s32 168, %v5129_v44  ;;  %v271_v21 = vadd.s32 192, %v5129_v44  ;;  %v5296_v26 = vld [vmem:[%s6314_s1 + $0xe] sm:$0x3] }
  0x2f   : > { %vm681_vm13 = vcmp.ge.s32.totalorder %v409_v11, 1  ;;  %v273_v22 = vadd.s32 208, %v5129_v44  ;;  %vm5286_vm14 = vcmp.ge.s32.totalorder %v297_v62, 1  ;;  %v1029_v27 = vld [vmem:[#allocation2 + $0xb8] sm:$0xff]  ;;  %v2467_v30 = vmul.f32 %v5222_v42, %v5277_v13  ;;  %v1031_v38 = vld [vmem:[#allocation2 + $0xc8] sm:$0xff]  ;;  %v1032_v39 = vld [vmem:[#allocation2 + $0xd0] sm:$0xff] }
  0x30   : > { %v5291_v24 = vsel %vm681_vm13, 1.0, %v6321_v5  ;;  %vm683_vm15 = vcmp.ge.s32.totalorder %v423_v17, 1  ;;  %vm685_vm2 = vcmp.ge.s32.totalorder %v437_v18, 1  ;;  %v2469_v40 = vmul.f32 %v5225_v43, %v5280_v19  ;;  %v5321_v50 = vld [vmem:[#allocation2 + $0x59] sm:$0xff]  ;;  %v926_v17 = vld [vmem:[#allocation2 + $0x7] sm:$0xff]  ;;  %v5523_v3 = vld [vmem:[#allocation2 + $0xf1] sm:$0xff] }
  0x31   : > { %v5306_v33 = vsel %vm683_vm15, 1.0, %v6321_v5  ;;  %v5309_v34 = vsel %vm685_vm2, 1.0, %v6321_v5  ;;  %vm5316_vm3 = vcmp.le.s32.totalorder %v402_v63, 14  ;;  %v416_v48 = vand.u32 15, %v5263_v0  ;;  %v1038_v37 = vld [vmem:[#allocation2 + $0x100] sm:$0xff]  ;;  %v5498_v42 = vld [vmem:[#allocation2 + $0xa9] sm:$0xff] }
  0x32   : > { %4410 = vmatmul.mubr.msk.bf16.gmra.mrb[8].mxu1 %vm887_vm1, %v1044_v53  ;;  %v886_v53 = vld [vmem:[%s5077_s7 + $0xf8] sm:$0xff]  ;;  %v451_v49 = vand.u32 15, %v271_v21  ;;  %v465_v55 = vand.u32 15, %v273_v22  ;;  %v2495_v62 = vpack.c.bf16 %v2467_v30, %v5312_v35  ;;  %v1051_v63 = vpack.c.bf16 %v1032_v39, %v1031_v38  ;;  %v1034_v22 = vld [vmem:[#allocation2 + $0xe0] sm:$0xff]  ;;  %v5376_v38 = vld [vmem:[#allocation2 + $0x69] sm:$0xff]  ;;  %s244_s7 = scalar_lea.vmem %s6318_s5, %s6519_s19 }
  0x33   : > { %4546 = vmatmul.mubr.msk.bf16.gmra.mrb[8].mxu0 %vm887_vm1, %v2171_v8  ;;  %4413 = vmatprep.mubr.msk.bf16.mxu1 %vm887_vm1, %v2171_v8  ;;  %925 = vst.msk [vmem:[#allocation2 + $0x110] sm:$0xff] %vm887_vm1, %v886_v53  ;;  %v2493_v8 = vpack.c.bf16 %v2463_v51, %v5246_v54  ;;  %v311_v51 = vand.u32 15, %v251_v16  ;;  %v270_v53 = vadd.s32 184, %v5129_v44  ;;  %v2496_v1 = vpack.c.bf16 %v2469_v40, %v5321_v50  ;;  %v1033_v21 = vld [vmem:[#allocation2 + $0xd8] sm:$0xff]  ;;  %v1035_v39 = vld [vmem:[#allocation2 + $0xe8] sm:$0xff]  ;;  %v1036_v40 = vld [vmem:[#allocation2 + $0xf0] sm:$0xff] }
  0x34   : > { %4549 = vmatprep.mubr.msk.bf16.mxu0 %vm887_vm1, %v1046_v12  ;;  %vm687_vm4 = vcmp.ge.s32.totalorder %v451_v49, 1  ;;  %vm689_vm5 = vcmp.ge.s32.totalorder %v465_v55, 1  ;;  %v275_v7 = vadd.s32 224, %v5129_v44  ;;  %v5346_v15 = vsel %vm5266_vm11, 1.0, %v6321_v5  ;;  %v5382_v49 = vld [vmem:[#allocation2 + $0x79] sm:$0xff]  ;;  %v5521_v28 = vld [vmem:[#allocation2 + $0xc9] sm:$0xff] }
  0x35   : > { %v5333_v0 = vsel %vm687_vm4, 1.0, %v6321_v5  ;;  %v5337_v6 = vsel %vm689_vm5, 1.0, %v6321_v5  ;;  %v5351_v11 = vsel %vm5286_vm14, 1.0, %v6321_v5  ;;  %vm5360_vm6 = vcmp.le.s32.totalorder %v416_v48, 14  ;;  %6420 = vst [vmem:[#allocation27_spill] sm:$0xff] %v5521_v28 }
  0x36   : > { %vm5364_vm7 = vcmp.ge.s32.totalorder %v311_v51, 1  ;;  %v479_v18 = vand.u32 15, %v275_v7  ;;  %v5387_v51 = vsel %vm5360_vm6, 1.0, %v6321_v5  ;;  %v255_v48 = vadd.s32 64, %v5129_v44 }
  0x37   : > { %6397 = vst [vmem:[#allocation13_spill] sm:$0xff] %v5387_v51 }
  0x38   : > { %vm691_vm9 = vcmp.ge.s32.totalorder %v479_v18, 1 }
  0x3a   : > { %4414 = vmatmul.mubr.msk.bf16.gmra.mrb[12].mxu1 %vm887_vm1, %v1046_v12  ;;  %v2494_v12 = vpack.c.bf16 %v2465_v57, %v5259_v61  ;;  %v272_v57 = vadd.s32 200, %v5129_v44 }
  0x3b   : > { %4550 = vmatmul.mubr.msk.bf16.gmra.mrb[12].mxu0 %vm887_vm1, %v2173_v29  ;;  %4417 = vmatprep.mubr.msk.bf16.mxu1 %vm887_vm1, %v2173_v29  ;;  %v1030_v29 = vld [vmem:[#allocation2 + $0xc0] sm:$0xff] }
  0x3c   : > { %4571 = vmatprep.mubr.msk.bf16.mxu0 %vm887_vm1, %v2492_v31  ;;  %v5303_v31 = vadd.s32 48, %v5129_v44  ;;  %v1050_v56 = vpack.c.bf16 %v1030_v29, %v1029_v27  ;;  %v444_v29 = vand.u32 15, %v270_v53  ;;  %v458_v30 = vand.u32 15, %v272_v57  ;;  %v2443_v57 = vld [vmem:[#allocation2 + $0x91] sm:$0xff] }
  0x3d   : > { %v5391_v53 = vsel %vm691_vm9, 1.0, %v6321_v5  ;;  %v2475_v27 = vmul.f32 %v5253_v58, %v2443_v57 }
  0x3e   : > { %vm5419_vm11 = vcmp.le.s32.totalorder %v444_v29, 14  ;;  %vm5423_vm12 = vcmp.le.s32.totalorder %v458_v30, 14  ;;  %v5437_v29 = vld [vmem:[#allocation2 + $0x89] sm:$0xff]  ;;  %v958_v30 = vmul.f32 %v5346_v15, %v926_v17 }
  0x3f   : > { %6404 = vst [vmem:[#allocation16_spill] sm:$0xff] %v5437_v29  ;;  %v5464_v17 = vsel %vm5419_vm11, 1.0, %v6321_v5  ;;  %v5469_v16 = vsel %vm5423_vm12, 1.0, %v6321_v5 }
  0x40   : > { %6406 = vst [vmem:[#allocation18_spill] sm:$0xff] %v5464_v17  ;;  %6407 = vst [vmem:[#allocation19_spill] sm:$0xff] %v5469_v16 }
  0x42   : > { %4418 = vmatmul.mubr.msk.bf16.gmra.mrb[16].mxu1 %vm887_vm1, %v1048_v2  ;;  %v2439_v2 = vld [vmem:[#allocation2 + $0x71] sm:$0xff] }
  0x43   : > { %4572 = vmatmul.mubr.msk.bf16.vlgmr.msra.gmra.mrb[0].mxu0 %vm887_vm1, %v2493_v8  ;;  %4421 = vmatprep.mubr.msk.bf16.mxu1 %vm887_vm1, %v1049_v9  ;;  %v277_v8 = vadd.s32 240, %v5129_v44  ;;  %v5341_v9 = vld [vmem:[#allocation2 + $0x81] sm:$0xff]  ;;  %v2471_v23 = vmul.f32 %v5236_v45, %v2439_v2 }
  0x44   : > { %4604 = vmatpush3.bf16.msra.mxu0 %v2885_v41  ;;  %4575 = vmatprep.mubr.msk.bf16.mxu0 %vm887_vm1, %v2494_v12  ;;  %v430_v41 = vand.u32 15, %v268_v20  ;;  %v5356_v12 = vsel %vm5316_vm3, 1.0, %v6321_v5  ;;  %v2473_v47 = vmul.f32 %v5241_v52, %v5341_v9 }
  0x45   : > { %4971 = vmatprep.subr.msk.bf16.mxu0 %vm1105_vm0, %v5296_v26  ;;  %6390 = vst [vmem:[#allocation12_spill] sm:$0xff] %v5356_v12  ;;  %v493_v20 = vand.u32 15, %v277_v8  ;;  %v2497_v7 = vpack.c.bf16 %v2471_v23, %v5376_v38  ;;  %v5407_v8 = vpack.c.bf16 %v1036_v40, %v1035_v39  ;;  %v5434_v40 = vmul.f32 %v5225_v43, %v5277_v13  ;;  %v1037_v13 = vld [vmem:[#allocation2 + $0xf8] sm:$0xff] }
  0x46   : > { %vm5371_vm8 = vcmp.le.s32.totalorder %v430_v41, 14  ;;  %v274_v41 = vadd.s32 216, %v5129_v44  ;;  %v5442_v23 = vmul.f32 %v5236_v45, %v5280_v19  ;;  %v5456_v19 = vmul.f32 %v5253_v58, %v5341_v9  ;;  %v2447_v58 = vld [vmem:[#allocation2 + $0xb1] sm:$0xff]  ;;  %v2449_v45 = vld [vmem:[#allocation2 + $0xc1] sm:$0xff] }
  0x47   : > { %vm693_vm10 = vcmp.ge.s32.totalorder %v493_v20, 1  ;;  %6398 = vst [vmem:[#allocation14_spill] sm:$0xff] %v5407_v8  ;;  %v5412_v18 = vsel %vm5371_vm8, 1.0, %v6321_v5  ;;  %v2498_v20 = vpack.c.bf16 %v2473_v47, %v5382_v49  ;;  %v928_v43 = vld [vmem:[#allocation2 + $0x17] sm:$0xff] }
  0x48   : > { %v5394_v55 = vsel %vm693_vm10, 1.0, %v6321_v5  ;;  %6399 = vst [vmem:[#allocation15_spill] sm:$0xff] %v5412_v18  ;;  %v472_v39 = vand.u32 15, %v274_v41  ;;  %v5445_v41 = vmul.f32 %v5241_v52, %v2439_v2  ;;  %v927_v2 = vld [vmem:[#allocation2 + $0xf] sm:$0xff] }
  0x49   : > { %v990_v9 = vpack.c.bf16 %v927_v2, %v958_v30 }
  0x4a   : > { %4422 = vmatmul.mubr.msk.bf16.gmra.mrb[20].mxu1 %vm887_vm1, %v1050_v56  ;;  %v1052_v56 = vpack.c.bf16 %v1034_v22, %v1033_v21  ;;  %v2445_v21 = vld [vmem:[#allocation2 + $0xa1] sm:$0xff]  ;;  %vm5476_vm13 = vcmp.le.s32.totalorder %v472_v39, 14  ;;  %v5483_v22 = vmul.f32 %v5356_v12, %v2443_v57  ;;  %v5495_v39 = vmul.f32 %v5412_v18, %v2447_v58  ;;  %v2451_v57 = vld [vmem:[#allocation2 + $0xd1] sm:$0xff] }
  0x4b   : > { %4576 = vmatmul.mubr.msk.bf16.gmra.mrb[4].mxu0 %vm887_vm1, %v2495_v62  ;;  %4425 = vmatprep.mubr.msk.bf16.mxu1 %vm887_vm1, %v1051_v63  ;;  %v5399_v62 = vsel %vm5364_vm7, 1.0, %v6321_v5  ;;  %v276_v63 = vadd.s32 232, %v5129_v44  ;;  %v5485_v5 = vpack.c.bf16 %v1038_v37, %v1037_v13  ;;  %v5505_v13 = vld [vmem:[#allocation2 + $0xb9] sm:$0xff]  ;;  %v5517_v2 = vmul.f32 %v5469_v16, %v2451_v57  ;;  %v5519_v37 = vld [vmem:[#allocation2 + $0x27] sm:$0xff] }
  0x4c   : > { %4579 = vmatprep.mubr.msk.bf16.mxu0 %vm887_vm1, %v2496_v1  ;;  %v5404_v1 = vmul.f32 %v5206_v36, %v5198_v32  ;;  %6414 = vst [vmem:[#allocation22_spill] sm:$0xff] %v5495_v39  ;;  %6416 = vst [vmem:[#allocation24_spill] sm:$0xff] %v5505_v13  ;;  %v960_v39 = vmul.f32 %v5351_v11, %v928_v43 }
  0x4d   : > { %v486_v47 = vand.u32 15, %v276_v63  ;;  %6410 = vst [vmem:[#allocation20_spill] sm:$0xff] %v5485_v5  ;;  %6419 = vst [vmem:[#allocation26_spill] sm:$0xff] %v5517_v2  ;;  %v5544_v63 = vld [vmem:[#allocation2 + $0xd9] sm:$0xff]  ;;  %v5575_v2 = vld [vmem:[#allocation2 + $0x2f] sm:$0xff] }
  0x4e   : > { %6426 = vst [vmem:[#allocation30_spill] sm:$0xff] %v5544_v63 }
  0x4f   : > { %vm5487_vm14 = vcmp.le.s32.totalorder %v486_v47, 14  ;;  %v5503_v47 = vmul.f32 %v5464_v17, %v2449_v45 }
  0x51   : > { %6415 = vst [vmem:[#allocation23_spill] sm:$0xff] %v5503_v47  ;;  %v5558_v47 = vld [vmem:[#allocation2 + $0xe9] sm:$0xff] }
  0x52   : > { %4426 = vmatmul.mubr.msk.bf16.gmra.mrb[24].mxu1 %vm887_vm1, %v1052_v56  ;;  %v2477_v56 = vmul.f32 %v5356_v12, %v2445_v21  ;;  %v6417_v12 = vmov 0.0   ;;  %6429 = vst [vmem:[#allocation33_spill] sm:$0xff] %v5558_v47 }
  0x53   : > { %4580 = vmatmul.mubr.msk.bf16.gmra.mrb[8].mxu0 %vm887_vm1, %v2497_v7  ;;  %4429 = vmatprep.mubr.msk.bf16.mxu1 %vm887_vm1, %v5407_v8  ;;  %v5459_v7 = vld [vmem:[#allocation2 + $0x99] sm:$0xff]  ;;  %v5510_v36 = vsel %vm5476_vm13, 1.0, %v6417_v12  ;;  %v339_v8 = vand.u32 15, %v255_v48  ;;  %v5528_v52 = vsel %vm5487_vm14, 1.0, %v6417_v12  ;;  %v6423_v48 = vand.u32 15, %v5303_v31 }
  0x54   : > { %4583 = vmatprep.mubr.msk.bf16.mxu0 %vm887_vm1, %v2498_v20  ;;  %6405 = vst [vmem:[#allocation17_spill] sm:$0xff] %v5459_v7  ;;  %v2499_v20 = vpack.c.bf16 %v2475_v27, %v5437_v29  ;;  %v5492_v27 = vmul.f32 %v5387_v51, %v2445_v21  ;;  %v2500_v32 = vpack.c.bf16 %v2477_v56, %v5459_v7  ;;  %v2453_v21 = vld [vmem:[#allocation2 + $0xe1] sm:$0xff]  ;;  %6418 = vst [vmem:[#allocation25_spill] sm:$0xff] %v5510_v36 }
  0x55   : > { %6421 = vst [vmem:[#allocation28_spill] sm:$0xff] %v5528_v52  ;;  %v5533_v56 = vmul.f32 %v5510_v36, %v2453_v21  ;;  %vm5540_vm15 = vcmp.ge.s32.totalorder %v6423_v48, 1  ;;  %v5550_v30 = vmul.f32 %v5528_v52, %v5523_v3  ;;  %v2479_v31 = vmul.f32 %v5387_v51, %v2447_v58 }
  0x56   : > { %6413 = vst [vmem:[#allocation21_spill] sm:$0xff] %v5492_v27  ;;  %v257_v48 = vadd.s32 80, %v5129_v44  ;;  %v5563_v27 = vmul.f32 %v5346_v15, %v928_v43  ;;  %v5573_v51 = vmul.f32 %v5351_v11, %v5519_v37  ;;  %vm671_vm2 = vcmp.ge.s32.totalorder %v339_v8, 1  ;;  %v5591_v8 = vld [vmem:[#allocation2 + $0x37] sm:$0xff] }
  0x57   : > { %6422 = vst [vmem:[#allocation29_spill] sm:$0xff] %v5533_v56  ;;  %6427 = vst [vmem:[#allocation31_spill] sm:$0xff] %v5550_v30  ;;  %v259_v43 = vadd.s32 96, %v5129_v44  ;;  %v1613_v58 = vsel %vm1105_vm0, %v5140_v46, 0  ;;  %v5589_v30 = vsel %vm5540_vm15, 1.0, %v6417_v12 }
  0x58   : > { %6430 = vst [vmem:[#allocation34_spill] sm:$0xff] %v5563_v27  ;;  %6431 = vst [vmem:[#allocation35_spill] sm:$0xff] %v5573_v51  ;;  %v353_v51 = vand.u32 15, %v257_v48  ;;  %v964_v7 = vmul.f32 %v5589_v30, %v5591_v8 }
  0x59   : > { %v367_v46 = vand.u32 15, %v259_v43  ;;  %v5620_v43 = vld [vmem:[#allocation2 + $0x4f] sm:$0xff] }
  0x5a   : > { %4430 = vmatmul.mubr.msk.bf16.gmra.mrb[28].mxu1 %vm887_vm1, %v5485_v5  ;;  %v5554_v5 = vld [vmem:[#allocation2 + $0x1f] sm:$0xff]  ;;  %vm673_vm3 = vcmp.ge.s32.totalorder %v353_v51, 1 }
  0x5b   : > { %4584 = vmatmul.mubr.msk.bf16.gmra.mrb[12].mxu0 %vm887_vm1, %v2499_v20  ;;  %4435 = vmatprep.mubr.msk.bf16.mxu1 %vm887_vm1, %v990_v9  ;;  %6428 = vst [vmem:[#allocation32_spill] sm:$0xff] %v5554_v5  ;;  %v962_v20 = vmul.f32 %v5399_v62, %v5519_v37  ;;  %v2481_v9 = vmul.f32 %v5412_v18, %v2449_v45  ;;  %v5598_v45 = vld [vmem:[#allocation2 + $0x47] sm:$0xff]  ;;  %vm675_vm4 = vcmp.ge.s32.totalorder %v367_v46, 1 }
  0x5c   : > { %4587 = vmatprep.mubr.msk.bf16.mxu0 %vm887_vm1, %v2500_v32  ;;  %v991_v29 = vpack.c.bf16 %v5554_v5, %v960_v39  ;;  %v2501_v18 = vpack.c.bf16 %v2479_v31, %v5498_v42  ;;  %v5596_v39 = vsel %vm671_vm2, 1.0, %v6417_v12  ;;  %v5606_v31 = vld [vmem:[%s6314_s1 + $0x6] sm:$0x3]  ;;  %v5644_v27 = vsel %vm675_vm4, 1.0, %v6417_v12 }
  0x5d   : > { %v992_v56 = vpack.c.bf16 %v5575_v2, %v962_v20  ;;  %v2502_v32 = vpack.c.bf16 %v2481_v9, %v5505_v13  ;;  %v5609_v20 = vld [vmem:[#allocation2 + $0x3f] sm:$0xff]  ;;  %v2483_v9 = vmul.f32 %v5464_v17, %v2451_v57  ;;  %v966_v48 = vmul.f32 %v5596_v39, %v5598_v45  ;;  %v5640_v17 = vld [vmem:[#allocation2 + $0x57] sm:$0xff] }
  0x5e   : > { %v5626_v57 = vmul.f32 %v5589_v30, %v5598_v45  ;;  %v5691_v13 = vld [vmem:[#allocation2 + $0x111] sm:$0xff] }
  0x5f   : > { %6438 = vst [vmem:[#allocation42_spill] sm:$0xff] %v5691_v13 }
  0x60   : > { %6433 = vst [vmem:[#allocation37_spill] sm:$0xff] %v5626_v57  ;;  %v5713_v57 = vld [vmem:[#allocation2 + $0x109] sm:$0xff] }
  0x61   : > { %6440 = vst [vmem:[#allocation44_spill] sm:$0xff] %v5713_v57 }
  0x62   : > { %4436 = vmatmul.mubr.msk.bf16.vlgmr.msra.gmra.mrb[0].mxu1 %vm887_vm1, %v991_v29  ;;  %v5616_v29 = vmul.f32 %v5399_v62, %v5591_v8 }
  0x63   : > { %4468 = vmatpush3.bf16.msra.mxu1 %v1613_v58  ;;  %4588 = vmatmul.mubr.msk.bf16.gmra.mrb[16].mxu0 %vm887_vm1, %v2501_v18  ;;  %v2485_v18 = vmul.f32 %v5469_v16, %v2453_v21  ;;  %v261_v58 = vadd.s32 112, %v5129_v44  ;;  %v2503_v21 = vpack.c.bf16 %v2483_v9, %v5521_v28  ;;  %v994_v44 = vpack.c.bf16 %v5620_v43, %v966_v48 }
  0x64   : > { %6432 = vst [vmem:[#allocation36_spill] sm:$0xff] %v5616_v29  ;;  %4439 = vmatprep.mubr.msk.bf16.mxu1 %vm887_vm1, %v992_v56  ;;  %4591 = vmatprep.mubr.msk.bf16.mxu0 %vm887_vm1, %v2502_v32  ;;  %v993_v32 = vpack.c.bf16 %v5609_v20, %v964_v7  ;;  %v5638_v16 = vsel %vm673_vm3, 1.0, %v6417_v12  ;;  %v5646_v56 = vld [vmem:[#allocation2 + $0x67] sm:$0xff]  ;;  %v2487_v48 = vmul.f32 %v5510_v36, %v5523_v3  ;;  %v5670_v3 = vld [vmem:[#allocation2 + $0x6f] sm:$0xff] }
  0x65   : > { %4966 = vmatprep.subr.msk.bf16.mxu1 %vm1105_vm0, %v5606_v31  ;;  %v2504_v46 = vpack.c.bf16 %v2485_v18, %v5544_v63  ;;  %v381_v7 = vand.u32 15, %v261_v58  ;;  %v5648_v29 = vld [vmem:[#allocation2 + $0x101] sm:$0xff]  ;;  %v968_v9 = vmul.f32 %v5638_v16, %v5640_v17  ;;  %v970_v51 = vmul.f32 %v5644_v27, %v5646_v56 }
  0x66   : > { %6434 = vst [vmem:[#allocation38_spill] sm:$0xff] %v5648_v29  ;;  %v5657_v18 = vld [vmem:[#allocation2 + $0x5f] sm:$0xff]  ;;  %v5663_v58 = vmul.f32 %v5596_v39, %v5640_v17  ;;  %v2505_v63 = vpack.c.bf16 %v2487_v48, %v5558_v47 }
  0x67   : > { %vm677_vm5 = vcmp.ge.s32.totalorder %v381_v7, 1  ;;  %v995_v5 = vpack.c.bf16 %v5657_v18, %v968_v9  ;;  %v5686_v7 = vld [vmem:[#allocation2 + $0x77] sm:$0xff] }
  0x68   : > { %6435 = vst [vmem:[#allocation39_spill] sm:$0xff] %v5663_v58  ;;  %v5684_v28 = vsel %vm677_vm5, 1.0, %v6417_v12  ;;  %v5700_v12 = vld [vmem:[#allocation2 + $0x7f] sm:$0xff] }
  0x69   : > { %v972_v9 = vmul.f32 %v5684_v28, %v5686_v7 }
  0x6a   : > { %4440 = vmatmul.mubr.msk.bf16.gmra.mrb[4].mxu1 %vm887_vm1, %v993_v32  ;;  %v5667_v32 = vmul.f32 %v5638_v16, %v5646_v56 }
  0x6b   : > { %4592 = vmatmul.mubr.msk.bf16.gmra.mrb[20].mxu0 %vm887_vm1, %v2503_v21  ;;  %4443 = vmatprep.mubr.msk.bf16.mxu1 %vm887_vm1, %v994_v44  ;;  %v2489_v21 = vmul.f32 %v5528_v52, %v5648_v29  ;;  %v5674_v44 = vld [vmem:[#allocation2 + $0xf9] sm:$0xff]  ;;  %v5688_v52 = vld [vmem:[#allocation2 + $0x87] sm:$0xff] }
  0x6c   : > { %6436 = vst [vmem:[#allocation40_spill] sm:$0xff] %v5667_v32  ;;  %4595 = vmatprep.mubr.msk.bf16.mxu0 %vm887_vm1, %v2504_v46  ;;  %6437 = vst [vmem:[#allocation41_spill] sm:$0xff] %v5674_v44  ;;  %v996_v46 = vpack.c.bf16 %v5670_v3, %v970_v51  ;;  %v974_v48 = vmul.f32 %v5274_v10, %v5688_v52  ;;  %v2491_v51 = vmul.f32 %v5256_v59, %v5691_v13  ;;  %v5729_v59 = vld [vmem:[#allocation2 + $0xa7] sm:$0xff] }
  0x6d   : > { %v2506_v29 = vpack.c.bf16 %v2489_v21, %v5674_v44  ;;  %v5706_v21 = vmul.f32 %v5644_v27, %v5686_v7  ;;  %v997_v32 = vpack.c.bf16 %v5700_v12, %v972_v9  ;;  %v5738_v9 = vld [vmem:[#allocation2 + $0x9f] sm:$0xff] }
  0x6e   : > { %v2507_v58 = vpack.c.bf16 %v2491_v51, %v5713_v57  ;;  %v5762_v57 = vld [vmem:[#allocation2 + $0xb7] sm:$0xff] }
  0x72   : > { %4444 = vmatmul.mubr.msk.bf16.gmra.mrb[8].mxu1 %vm887_vm1, %v995_v5  ;;  %v5710_v5 = vmul.f32 %v5684_v28, %v5688_v52 }
  0x73   : > { %4596 = vmatmul.mubr.msk.bf16.gmra.mrb[24].mxu0 %vm887_vm1, %v2505_v63  ;;  %4447 = vmatprep.mubr.msk.bf16.mxu1 %vm887_vm1, %v996_v46  ;;  %v5715_v63 = vld [vmem:[#allocation2 + $0x8f] sm:$0xff]  ;;  %v2786_v46 = vmul.f32 %v5346_v15, %v5519_v37  ;;  %v2788_v37 = vmul.f32 %v5351_v11, %v5591_v8  ;;  %v2790_v8 = vmul.f32 %v5399_v62, %v5598_v45  ;;  %v3179_v62 = vsel %vm1105_vm0, %v5296_v26, 0 }
  0x74   : > { %6439 = vst [vmem:[#allocation43_spill] sm:$0xff] %v5710_v5  ;;  %4599 = vmatprep.mubr.msk.bf16.mxu0 %vm887_vm1, %v2506_v29  ;;  %v998_v44 = vpack.c.bf16 %v5715_v63, %v974_v48  ;;  %v5726_v29 = vld [vmem:[#allocation2 + $0x97] sm:$0xff]  ;;  %v978_v48 = vmul.f32 %v5306_v33, %v5729_v59  ;;  %v5751_v11 = vld [vmem:[#allocation2 + $0xaf] sm:$0xff]  ;;  %v5765_v5 = vld [vmem:[#allocation2 + $0xc7] sm:$0xff]  ;;  %v980_v45 = vmul.f32 %v5309_v34, %v5762_v57 }
  0x75   : > { %v2818_v47 = vpack.c.bf16 %v5575_v2, %v2786_v46  ;;  %v976_v15 = vmul.f32 %v5291_v24, %v5726_v29  ;;  %v5744_v51 = vmul.f32 %v5274_v10, %v5726_v29  ;;  %v2819_v13 = vpack.c.bf16 %v5609_v20, %v2788_v37  ;;  %v5777_v37 = vld [vmem:[%s6314_s1 + $0x10] sm:$0x3] }
  0x76   : > { %v1000_v36 = vpack.c.bf16 %v5751_v11, %v978_v48  ;;  %v5781_v48 = vld [vmem:[#allocation2 + $0xbf] sm:$0xff]  ;;  %v982_v26 = vmul.f32 %v5333_v0, %v5765_v5 }
  0x77   : > { %v999_v46 = vpack.c.bf16 %v5738_v9, %v976_v15  ;;  %v2792_v15 = vmul.f32 %v5589_v30, %v5640_v17  ;;  %v5791_v17 = vmul.f32 %v5309_v34, %v5765_v5  ;;  %v5794_v30 = vld [vmem:[#allocation2 + $0xcf] sm:$0xff] }
  0x79   : > { %6443 = vst [vmem:[#allocation47_spill] sm:$0xff] %v5791_v17 }
  0x7a   : > { %4448 = vmatmul.mubr.msk.bf16.gmra.mrb[12].mxu1 %vm887_vm1, %v997_v32  ;;  %v5748_v32 = vmul.f32 %v5291_v24, %v5729_v59 }
  0x7b   : > { %4600 = vmatmul.mubr.msk.bf16.gmra.mrb[28].mxu0 %vm887_vm1, %v2507_v58  ;;  %4451 = vmatprep.mubr.msk.bf16.mxu1 %vm887_vm1, %v998_v44  ;;  %v1001_v44 = vpack.c.bf16 %v5781_v48, %v980_v45  ;;  %v5807_v58 = vld [vmem:[#allocation2 + $0xd7] sm:$0xff]  ;;  %v2796_v45 = vmul.f32 %v5638_v16, %v5686_v7 }
  0x7c   : > { %6441 = vst [vmem:[#allocation45_spill] sm:$0xff] %v5748_v32  ;;  %4605 = vmatprep.mubr.msk.bf16.mxu0 %vm887_vm1, %v2818_v47  ;;  %v2820_v47 = vpack.c.bf16 %v5620_v43, %v2790_v8  ;;  %v5787_v8 = vmul.f32 %v5306_v33, %v5762_v57  ;;  %v5833_v7 = vld [vmem:[#allocation2 + $0xf7] sm:$0xff] }
  0x7e   : > { %6442 = vst [vmem:[#allocation46_spill] sm:$0xff] %v5787_v8  ;;  %v1483_v8 = vld [vmem:[#allocation2 + $0x11] sm:$0xff] }
  0x82   : > { %4452 = vmatmul.mubr.msk.bf16.gmra.mrb[16].mxu1 %vm887_vm1, %v999_v46  ;;  %v5815_v46 = vld [vmem:[#allocation2 + $0xdf] sm:$0xff] }
  0x83   : > { %4606 = vmatmul.mubr.msk.bf16.vlgmr.msra.gmra.mrb[0].mxu0 %vm887_vm1, %v2819_v13  ;;  %4455 = vmatprep.mubr.msk.bf16.mxu1 %vm887_vm1, %v1000_v36  ;;  %v2794_v36 = vmul.f32 %v5596_v39, %v5646_v56  ;;  %v954_v39 = vld [vmem:[#allocation2 + $0xe7] sm:$0xff]  ;;  %v984_v56 = vmul.f32 %v5337_v6, %v5807_v58  ;;  %v2823_v13 = vpack.c.bf16 %v5700_v12, %v2796_v45 }
  0x84   : > { %4638 = vmatpush3.bf16.msra.mxu0 %v3179_v62  ;;  %4609 = vmatprep.mubr.msk.bf16.mxu0 %vm887_vm1, %v2820_v47  ;;  %v2821_v62 = vpack.c.bf16 %v5657_v18, %v2792_v15  ;;  %v1002_v47 = vpack.c.bf16 %v5794_v30, %v982_v26  ;;  %v986_v15 = vmul.f32 %v5391_v53, %v954_v39 }
  0x85   : > { %4972 = vmatprep.subr.msk.bf16.mxu0 %vm1105_vm0, %v5777_v37  ;;  %v2822_v32 = vpack.c.bf16 %v5670_v3, %v2794_v36  ;;  %v5821_v26 = vmul.f32 %v5337_v6, %v954_v39  ;;  %v2798_v36 = vmul.f32 %v5644_v27, %v5688_v52  ;;  %v2782_v27 = vld [vmem:[#allocation2 + $0x107] sm:$0xff]  ;;  %v5841_v52 = vld [vmem:[#allocation2 + $0xff] sm:$0xff]  ;;  %v1515_v45 = vmul.f32 %v5176_v14, %v1483_v8 }
  0x87   : > { %v2824_v17 = vpack.c.bf16 %v5715_v63, %v2798_v36  ;;  %v1482_v36 = vld [vmem:[#allocation2 + $0x9] sm:$0xff] }
  0x8a   : > { %4456 = vmatmul.mubr.msk.bf16.gmra.mrb[20].mxu1 %vm887_vm1, %v1001_v44  ;;  %v5824_v44 = vld [vmem:[#allocation2 + $0xef] sm:$0xff] }
  0x8b   : > { %4610 = vmatmul.mubr.msk.bf16.gmra.mrb[4].mxu0 %vm887_vm1, %v2821_v62  ;;  %4459 = vmatprep.mubr.msk.bf16.mxu1 %vm887_vm1, %v1002_v47  ;;  %v1003_v47 = vpack.c.bf16 %v5815_v46, %v984_v56  ;;  %v1004_v16 = vpack.c.bf16 %v5824_v44, %v986_v15  ;;  %v2800_v56 = vmul.f32 %v5684_v28, %v5726_v29  ;;  %v5852_v62 = vld [vmem:[#allocation2 + $0x10f] sm:$0xff] }
  0x8c   : > { %4613 = vmatprep.mubr.msk.bf16.mxu0 %vm887_vm1, %v2822_v32  ;;  %v988_v32 = vmul.f32 %v5394_v55, %v5833_v7  ;;  %v5847_v15 = vmul.f32 %v5394_v55, %v2782_v27  ;;  %v1546_v29 = vpack.c.bf16 %v1515_v45, %v1482_v36  ;;  %v6444_v45 = vpack.c.bf16 %v5329_v60, %v5187_v25  ;;  %v4982_v25 = vld [vmem:[%s6314_s1 + $0x8] sm:$0x3] }
  0x8d   : > { %v2825_v28 = vpack.c.bf16 %v5738_v9, %v2800_v56  ;;  %v6448_v36 = vpack.c.bf16 %v5442_v23, %v5321_v50  ;;  %v6450_v50 = vpack.c.bf16 %v5456_v19, %v5382_v49  ;;  %v3505_v49 = vsel %vm1105_vm0, %v5777_v37, 0  ;;  %v6453_v19 = vld [vmem:[#allocation21_spill] sm:$0xff] }
  0x92   : > { %4460 = vmatmul.mubr.msk.bf16.gmra.mrb[24].mxu1 %vm887_vm1, %v1003_v47  ;;  %v2802_v47 = vmul.f32 %v5274_v10, %v5729_v59  ;;  %v2804_v59 = vmul.f32 %v5291_v24, %v5762_v57  ;;  %v2806_v10 = vmul.f32 %v5306_v33, %v5765_v5  ;;  %v2808_v24 = vmul.f32 %v5309_v34, %v5807_v58 }
  0x93   : > { %4614 = vmatmul.mubr.msk.bf16.gmra.mrb[8].mxu0 %vm887_vm1, %v2823_v13  ;;  %4463 = vmatprep.mubr.msk.bf16.mxu1 %vm887_vm1, %v1004_v16  ;;  %v1887_v13 = vpack.c.bf16 %v5852_v62, %v5847_v15  ;;  %v1005_v16 = vpack.c.bf16 %v5841_v52, %v988_v32  ;;  %v1939_v32 = vsel %vm1105_vm0, %v5606_v31, 0  ;;  %v6445_v33 = vpack.c.bf16 %v5404_v1, %v5246_v54 }
  0x94   : > { %4617 = vmatprep.mubr.msk.bf16.mxu0 %vm887_vm1, %v2824_v17  ;;  %v2826_v8 = vpack.c.bf16 %v5751_v11, %v2802_v47  ;;  %v2827_v17 = vpack.c.bf16 %v5781_v48, %v2804_v59  ;;  %v2828_v56 = vpack.c.bf16 %v5794_v30, %v2806_v10  ;;  %v2810_v31 = vmul.f32 %v5333_v0, %v954_v39  ;;  %v3081_v47 = vld [vmem:[#allocation2 + $0x30] sm:$0xff] }
  0x95   : > { %v2829_v60 = vpack.c.bf16 %v5815_v46, %v2808_v24  ;;  %v6446_v34 = vpack.c.bf16 %v5416_v4, %v5259_v61  ;;  %v6447_v54 = vpack.c.bf16 %v5434_v40, %v5312_v35  ;;  %v2812_v1 = vmul.f32 %v5337_v6, %v5833_v7  ;;  %v2784_v4 = vld [vmem:[#allocation2 + $0x117] sm:$0xff]  ;;  %v2785_v40 = vld [vmem:[#allocation2 + $0x11f] sm:$0xff] }
  0x96   : > { %v2830_v57 = vpack.c.bf16 %v5824_v44, %v2810_v31  ;;  %v2814_v5 = vmul.f32 %v5391_v53, %v2782_v27  ;;  %v6449_v35 = vpack.c.bf16 %v5445_v41, %v5376_v38  ;;  %v2816_v6 = vmul.f32 %v5394_v55, %v2784_v4  ;;  %v3080_v27 = vld [vmem:[#allocation2 + $0x28] sm:$0xff]  ;;  %v6451_v38 = vld [vmem:[#allocation16_spill] sm:$0xff]  ;;  %v3083_v41 = vld [vmem:[#allocation2 + $0x40] sm:$0xff] }
  0x97   : > { %v2831_v39 = vpack.c.bf16 %v5841_v52, %v2812_v1  ;;  %v6452_v23 = vpack.c.bf16 %v5483_v22, %v6451_v38  ;;  %v3082_v55 = vld [vmem:[#allocation2 + $0x38] sm:$0xff]  ;;  %v6456_v22 = vld [vmem:[#allocation22_spill] sm:$0xff]  ;;  %v3087_v24 = vld [vmem:[#allocation2 + $0x60] sm:$0xff] }
  0x98   : > { %v2832_v61 = vpack.c.bf16 %v5852_v62, %v2814_v5  ;;  %v3113_v59 = vpack.c.bf16 %v3083_v41, %v3082_v55  ;;  %v3089_v31 = vld [vmem:[#allocation2 + $0x70] sm:$0xff]  ;;  %v3090_v5 = vld [vmem:[#allocation2 + $0x78] sm:$0xff]  ;;  %v6470_v38 = vld [vmem:[#allocation33_spill] sm:$0xff] }
  0x99   : > { %v3093_v4 = vld [vmem:[#allocation2 + $0x90] sm:$0xff]  ;;  %v3094_v55 = vld [vmem:[#allocation2 + $0x98] sm:$0xff]  ;;  %v3095_v41 = vld [vmem:[#allocation2 + $0xa0] sm:$0xff] }
  0x9a   : > { %4464 = vmatmul.mubr.msk.bf16.gmra.mrb[28].mxu1 %vm887_vm1, %v1005_v16  ;;  %v2833_v16 = vpack.c.bf16 %v2785_v40, %v2816_v6  ;;  %v6464_v6 = vld [vmem:[#allocation29_spill] sm:$0xff]  ;;  %v6465_v40 = vld [vmem:[#allocation30_spill] sm:$0xff] }
  0x9b   : > { %4618 = vmatmul.mubr.msk.bf16.gmra.mrb[12].mxu0 %vm887_vm1, %v2825_v28  ;;  %4469 = vmatprep.mubr.msk.bf16.mxu1 %vm887_vm1, %v1546_v29  ;;  %v3112_v28 = vpack.c.bf16 %v3081_v47, %v3080_v27  ;;  %v3084_v29 = vld [vmem:[#allocation2 + $0x48] sm:$0xff]  ;;  %v6466_v27 = vpack.c.bf16 %v6464_v6, %v6465_v40  ;;  %v3375_v40 = vld [vmem:[#allocation2 + $0x31] sm:$0xff] }
  0x9c   : > { %4621 = vmatprep.mubr.msk.bf16.mxu0 %vm887_vm1, %v2826_v8  ;;  %v3085_v8 = vld [vmem:[#allocation2 + $0x50] sm:$0xff]  ;;  %v6467_v47 = vld [vmem:[#allocation38_spill] sm:$0xff] }
  0x9d   : > { %v3114_v10 = vpack.c.bf16 %v3085_v8, %v3084_v29  ;;  %v3096_v29 = vld [vmem:[#allocation2 + $0xa8] sm:$0xff]  ;;  %v3097_v8 = vld [vmem:[#allocation2 + $0xb0] sm:$0xff] }
  0x9e   : > { %v6510_v62 = vld [vmem:[#allocation18_spill] sm:$0xff] }
  0xa2   : > { %4470 = vmatmul.mubr.msk.bf16.vlgmr.msra.gmra.mrb[0].mxu1 %vm887_vm1, %v6444_v45  ;;  %v3086_v45 = vld [vmem:[#allocation2 + $0x58] sm:$0xff] }
  0xa3   : > { %4502 = vmatpush3.bf16.msra.mxu1 %v1939_v32  ;;  %4622 = vmatmul.mubr.msk.bf16.gmra.mrb[16].mxu0 %vm887_vm1, %v2827_v17  ;;  %v6454_v17 = vld [vmem:[#allocation17_spill] sm:$0xff]  ;;  %v3115_v37 = vpack.c.bf16 %v3087_v24, %v3086_v45  ;;  %v3100_v24 = vld [vmem:[#allocation2 + $0xc8] sm:$0xff] }
  0xa4   : > { %4473 = vmatprep.mubr.msk.bf16.mxu1 %vm887_vm1, %v6445_v33  ;;  %4625 = vmatprep.mubr.msk.bf16.mxu0 %vm887_vm1, %v2828_v56  ;;  %v6455_v32 = vpack.c.bf16 %v6453_v19, %v6454_v17  ;;  %v6457_v56 = vpack.c.bf16 %v6456_v22, %v5498_v42  ;;  %v3088_v33 = vld [vmem:[#allocation2 + $0x68] sm:$0xff]  ;;  %v6462_v42 = vld [vmem:[#allocation27_spill] sm:$0xff]  ;;  %v5963_v19 = vpack.c.bf16 %v3097_v8, %v3096_v29  ;;  %v6473_v17 = vld [vmem:[#allocation32_spill] sm:$0xff] }
  0xa5   : > { %4968 = vmatprep.subr.msk.bf16.mxu1 %vm1105_vm0, %v4982_v25  ;;  %v3116_v25 = vpack.c.bf16 %v3089_v31, %v3088_v33  ;;  %v3099_v45 = vld [vmem:[#allocation2 + $0xc0] sm:$0xff]  ;;  %v3101_v33 = vld [vmem:[#allocation2 + $0xd0] sm:$0xff]  ;;  %vm3840_vm0 = vcmask 24576  }
  0xa6   : > { %v3377_v29 = vld [vmem:[#allocation2 + $0x41] sm:$0xff]  ;;  %v3379_v8 = vld [vmem:[#allocation2 + $0x51] sm:$0xff] }
  0xaa   : > { %4474 = vmatmul.mubr.msk.bf16.gmra.mrb[4].mxu1 %vm887_vm1, %v6446_v34 }
  0xab   : > { %4626 = vmatmul.mubr.msk.bf16.gmra.mrb[20].mxu0 %vm887_vm1, %v2829_v60  ;;  %4477 = vmatprep.mubr.msk.bf16.mxu1 %vm887_vm1, %v6447_v54  ;;  %v6458_v60 = vld [vmem:[#allocation23_spill] sm:$0xff]  ;;  %v6461_v54 = vld [vmem:[#allocation26_spill] sm:$0xff] }
  0xac   : > { %4629 = vmatprep.mubr.msk.bf16.mxu0 %vm887_vm1, %v2830_v57  ;;  %v6459_v57 = vld [vmem:[#allocation24_spill] sm:$0xff]  ;;  %v6463_v1 = vpack.c.bf16 %v6461_v54, %v6462_v42 }
  0xad   : > { %v6460_v34 = vpack.c.bf16 %v6458_v60, %v6459_v57  ;;  %v6478_v57 = vld [vmem:[#allocation3_spill] sm:$0xff]  ;;  %v3102_v42 = vld [vmem:[#allocation2 + $0xd8] sm:$0xff] }
  0xb2   : > { %4478 = vmatmul.mubr.msk.bf16.gmra.mrb[8].mxu1 %vm887_vm1, %v6448_v36 }
  0xb3   : > { %4630 = vmatmul.mubr.msk.bf16.gmra.mrb[24].mxu0 %vm887_vm1, %v2831_v39  ;;  %4481 = vmatprep.mubr.msk.bf16.mxu1 %vm887_vm1, %v6449_v35  ;;  %v3091_v39 = vld [vmem:[#allocation2 + $0x80] sm:$0xff] }
  0xb4   : > { %4633 = vmatprep.mubr.msk.bf16.mxu0 %vm887_vm1, %v2832_v61  ;;  %v3092_v61 = vld [vmem:[#allocation2 + $0x88] sm:$0xff]  ;;  %v3117_v36 = vpack.c.bf16 %v3091_v39, %v3090_v5 }
  0xb5   : > { %v3118_v35 = vpack.c.bf16 %v3093_v4, %v3092_v61  ;;  %v6483_v61 = vld [vmem:[#allocation39_spill] sm:$0xff]  ;;  %v6485_v4 = vld [vmem:[#allocation14_spill] sm:$0xff] }
  0xba   : > { %4482 = vmatmul.mubr.msk.bf16.gmra.mrb[12].mxu1 %vm887_vm1, %v6450_v50  ;;  %v6469_v50 = vld [vmem:[#allocation31_spill] sm:$0xff] }
  0xbb   : > { %4634 = vmatmul.mubr.msk.bf16.gmra.mrb[28].mxu0 %vm887_vm1, %v2833_v16  ;;  %4485 = vmatprep.mubr.msk.bf16.mxu1 %vm887_vm1, %v6452_v23  ;;  %v6468_v16 = vld [vmem:[#allocation11_spill] sm:$0xff]  ;;  %v6471_v23 = vpack.c.bf16 %v6469_v50, %v6470_v38  ;;  %v3110_v50 = vld [vmem:[#allocation2 + $0x118] sm:$0xff]  ;;  %v3111_v38 = vld [vmem:[#allocation2 + $0x120] sm:$0xff] }
  0xbc   : > { %4639 = vmatprep.mubr.msk.bf16.mxu0 %vm887_vm1, %v3112_v28  ;;  %v1545_v28 = vmul.f32 %v6468_v16, %v6467_v47 }
  0xc2   : > { %4486 = vmatmul.mubr.msk.bf16.gmra.mrb[16].mxu1 %vm887_vm1, %v6455_v32  ;;  %v6474_v32 = vld [vmem:[#allocation34_spill] sm:$0xff] }
  0xc3   : > { %4640 = vmatmul.mubr.msk.bf16.vlgmr.msra.gmra.mrb[0].mxu0 %vm887_vm1, %v3113_v59  ;;  %4489 = vmatprep.mubr.msk.bf16.mxu1 %vm887_vm1, %v6457_v56  ;;  %v6472_v59 = vld [vmem:[#allocation41_spill] sm:$0xff]  ;;  %v6475_v22 = vpack.c.bf16 %v6473_v17, %v6474_v32  ;;  %v3098_v56 = vld [vmem:[#allocation2 + $0xb8] sm:$0xff] }
  0xc4   : > { %4672 = vmatpush3.bf16.msra.mxu0 %v3505_v49  ;;  %4643 = vmatprep.mubr.msk.bf16.mxu0 %vm887_vm1, %v3114_v10  ;;  %v1561_v10 = vpack.c.bf16 %v1545_v28, %v6472_v59  ;;  %v5961_v49 = vpack.c.bf16 %v3095_v41, %v3094_v55  ;;  %v5974_v31 = vpack.c.bf16 %v3099_v45, %v3098_v56  ;;  %v6488_v28 = vld [vmem:[#allocation20_spill] sm:$0xff]  ;;  %v3374_v55 = vld [vmem:[#allocation2 + $0x29] sm:$0xff] }
  0xc5   : > { %v3127_v41 = vpack.c.bf16 %v3111_v38, %v3110_v50  ;;  %v3378_v45 = vld [vmem:[#allocation2 + $0x49] sm:$0xff] }
  0xca   : > { %4490 = vmatmul.mubr.msk.bf16.gmra.mrb[20].mxu1 %vm887_vm1, %v6460_v34  ;;  %v6479_v34 = vld [vmem:[#allocation36_spill] sm:$0xff] }
  0xcb   : > { %4644 = vmatmul.mubr.msk.bf16.gmra.mrb[4].mxu0 %vm887_vm1, %v3115_v37  ;;  %4493 = vmatprep.mubr.msk.bf16.mxu1 %vm887_vm1, %v6463_v1  ;;  %v5976_v37 = vpack.c.bf16 %v3101_v33, %v3100_v24  ;;  %v6480_v54 = vpack.c.bf16 %v5609_v20, %v6479_v34  ;;  %v3103_v1 = vld [vmem:[#allocation2 + $0xe0] sm:$0xff]  ;;  %v6484_v20 = vpack.c.bf16 %v5657_v18, %v6483_v61  ;;  %v6499_v34 = vld [vmem:[#allocation6_spill] sm:$0xff] }
  0xcc   : > { %4647 = vmatprep.mubr.msk.bf16.mxu0 %vm887_vm1, %v3116_v25  ;;  %v6476_v25 = vld [vmem:[#allocation35_spill] sm:$0xff]  ;;  %v5991_v5 = vpack.c.bf16 %v3103_v1, %v3102_v42  ;;  %v6489_v18 = vpack.c.bf16 %v5700_v12, %v5706_v21  ;;  %v6492_v12 = vpack.c.bf16 %v5738_v9, %v5744_v51  ;;  %v6493_v21 = vld [vmem:[#allocation4_spill] sm:$0xff]  ;;  %v6497_v9 = vld [vmem:[#allocation46_spill] sm:$0xff]  ;;  %v1864_v42 = vmul.f32 %v5333_v0, %v5807_v58 }
  0xcd   : > { %v6477_v60 = vpack.c.bf16 %v5575_v2, %v6476_v25  ;;  %v6481_v2 = vld [vmem:[#allocation37_spill] sm:$0xff]  ;;  %v3409_v32 = vmul.f32 %v6493_v21, %v3377_v29  ;;  %v3383_v25 = vld [vmem:[#allocation2 + $0x71] sm:$0xff]  ;;  %v6498_v51 = vpack.c.bf16 %v5781_v48, %v6497_v9 }
  0xce   : > { %v6482_v39 = vpack.c.bf16 %v5620_v43, %v6481_v2  ;;  %v6486_v43 = vld [vmem:[#allocation40_spill] sm:$0xff]  ;;  %v6500_v2 = vld [vmem:[#allocation7_spill] sm:$0xff] }
  0xcf   : > { %v3380_v1 = vld [vmem:[#allocation2 + $0x59] sm:$0xff]  ;;  %v6501_v48 = vld [vmem:[#allocation47_spill] sm:$0xff] }
  0xd0   : > { %v6503_v0 = vld [vmem:[#allocation8_spill] sm:$0xff] }
  0xd1   : > { %v6507_v29 = vld [vmem:[#allocation12_spill] sm:$0xff] }
  0xd2   : > { %4494 = vmatmul.mubr.msk.bf16.gmra.mrb[24].mxu1 %vm887_vm1, %v6466_v27  ;;  %v6487_v27 = vpack.c.bf16 %v5670_v3, %v6486_v43  ;;  %v1868_v43 = vmul.f32 %v5391_v53, %v5833_v7  ;;  %v6506_v53 = vld [vmem:[#allocation10_spill] sm:$0xff]  ;;  %v3395_v21 = vld [vmem:[#allocation2 + $0xd1] sm:$0xff] }
  0xd3   : > { %4648 = vmatmul.mubr.msk.bf16.gmra.mrb[8].mxu0 %vm887_vm1, %v3117_v36  ;;  %4497 = vmatprep.mubr.msk.bf16.mxu1 %vm887_vm1, %v6471_v23  ;;  %v3108_v36 = vld [vmem:[#allocation2 + $0x108] sm:$0xff]  ;;  %v3407_v23 = vmul.f32 %v5176_v14, %v3375_v40  ;;  %v3376_v14 = vld [vmem:[#allocation2 + $0x39] sm:$0xff]  ;;  %v6502_v40 = vpack.c.bf16 %v5794_v30, %v6501_v48 }
  0xd4   : > { %4651 = vmatprep.mubr.msk.bf16.mxu0 %vm887_vm1, %v3118_v35  ;;  %v3109_v35 = vld [vmem:[#allocation2 + $0x110] sm:$0xff]  ;;  %v3439_v24 = vpack.c.bf16 %v3409_v32, %v3376_v14  ;;  %v1886_v30 = vpack.c.bf16 %v5841_v52, %v1868_v43  ;;  %v3392_v32 = vld [vmem:[#allocation2 + $0xb9] sm:$0xff] }
  0xd5   : > { %v6005_v6 = vpack.c.bf16 %v3109_v35, %v3108_v36  ;;  %v3438_v3 = vpack.c.bf16 %v3407_v23, %v3374_v55  ;;  %v3385_v36 = vld [vmem:[#allocation2 + $0x81] sm:$0xff]  ;;  %v3387_v35 = vld [vmem:[#allocation2 + $0x91] sm:$0xff]  ;;  %v3390_v52 = vld [vmem:[#allocation2 + $0xa9] sm:$0xff] }
  0xd6   : > { %v3417_v58 = vmul.f32 %v6503_v0, %v3385_v36  ;;  %v3389_v23 = vld [vmem:[#allocation2 + $0xa1] sm:$0xff]  ;;  %v3391_v55 = vld [vmem:[#allocation2 + $0xb1] sm:$0xff] }
  0xd7   : > { %v3421_v7 = vmul.f32 %v6506_v53, %v3389_v23  ;;  %v6509_v14 = vld [vmem:[#allocation15_spill] sm:$0xff]  ;;  %v3405_v36 = vld [vmem:[#allocation2 + $0x121] sm:$0xff] }
  0xda   : > { %4498 = vmatmul.mubr.msk.bf16.gmra.mrb[28].mxu1 %vm887_vm1, %v1561_v10  ;;  %v6490_v10 = vld [vmem:[#allocation43_spill] sm:$0xff] }
  0xdb   : > { %4652 = vmatmul.mubr.msk.bf16.gmra.mrb[12].mxu0 %vm887_vm1, %v5961_v49  ;;  %4503 = vmatprep.mubr.msk.bf16.mxu1 %vm887_vm1, %v6475_v22  ;;  %v6491_v17 = vpack.c.bf16 %v5715_v63, %v6490_v10  ;;  %v6494_v22 = vld [vmem:[#allocation5_spill] sm:$0xff] }
  0xdc   : > { %4655 = vmatprep.mubr.msk.bf16.mxu0 %vm887_vm1, %v5963_v19  ;;  %v3411_v56 = vmul.f32 %v6494_v22, %v3379_v8  ;;  %v3381_v63 = vld [vmem:[#allocation2 + $0x61] sm:$0xff]  ;;  %v3423_v8 = vmul.f32 %v6507_v29, %v3391_v55  ;;  %v3427_v22 = vmul.f32 %v6509_v14, %v3395_v21 }
  0xde   : > { %v3440_v33 = vpack.c.bf16 %v3411_v56, %v3378_v45  ;;  %v3394_v56 = vld [vmem:[#allocation2 + $0xc9] sm:$0xff] }
  0xe2   : > { %4504 = vmatmul.mubr.msk.bf16.vlgmr.msra.gmra.mrb[0].mxu1 %vm887_vm1, %v6477_v60  ;;  %v6495_v60 = vld [vmem:[#allocation45_spill] sm:$0xff] }
  0xe3   : > { %4706 = vmatpush3.bf16.msra.mxu1 %v6478_v57  ;;  %4656 = vmatmul.mubr.msk.bf16.gmra.mrb[16].mxu0 %vm887_vm1, %v5974_v31  ;;  %v6496_v57 = vpack.c.bf16 %v5751_v11, %v6495_v60  ;;  %v3382_v11 = vld [vmem:[#allocation2 + $0x69] sm:$0xff] }
  0xe4   : > { %4507 = vmatprep.mubr.msk.bf16.mxu1 %vm887_vm1, %v6480_v54  ;;  %4659 = vmatprep.mubr.msk.bf16.mxu0 %vm887_vm1, %v5976_v37  ;;  %v3413_v54 = vmul.f32 %v6499_v34, %v3381_v63  ;;  %v3399_v63 = vld [vmem:[#allocation2 + $0xf1] sm:$0xff]  ;;  %v3398_v60 = vld [vmem:[#allocation2 + $0xe9] sm:$0xff] }
  0xe6   : > { %v3441_v61 = vpack.c.bf16 %v3413_v54, %v3380_v1  ;;  %v2162_v54 = vld [vmem:[#allocation2 + $0xf8] sm:$0xff]  ;;  %v6513_v1 = vld [vmem:[#allocation42_spill] sm:$0xff] }
  0xea   : > { %4508 = vmatmul.mubr.msk.bf16.gmra.mrb[4].mxu1 %vm887_vm1, %v6482_v39  ;;  %v3415_v39 = vmul.f32 %v6500_v2, %v3383_v25  ;;  %v6514_v2 = vld [vmem:[#allocation28_spill] sm:$0xff] }
  0xeb   : > { %4660 = vmatmul.mubr.msk.bf16.gmra.mrb[20].mxu0 %vm887_vm1, %v5991_v5  ;;  %4511 = vmatprep.mubr.msk.bf16.mxu1 %vm887_vm1, %v6484_v20  ;;  %v1884_v20 = vpack.c.bf16 %v5815_v46, %v1864_v42  ;;  %v3384_v46 = vld [vmem:[#allocation2 + $0x79] sm:$0xff] }
  0xec   : > { %4663 = vmatprep.mubr.msk.bf16.mxu0 %vm887_vm1, %v6485_v4  ;;  %v3442_v4 = vpack.c.bf16 %v3415_v39, %v3382_v11  ;;  %v3443_v50 = vpack.c.bf16 %v3417_v58, %v3384_v46  ;;  %v2163_v42 = vld [vmem:[#allocation2 + $0x100] sm:$0xff]  ;;  %v3435_v39 = vmul.f32 %v6514_v2, %v6513_v1 }
  0xf2   : > { %4512 = vmatmul.mubr.msk.bf16.gmra.mrb[8].mxu1 %vm887_vm1, %v6487_v27  ;;  %v6504_v27 = vld [vmem:[#allocation9_spill] sm:$0xff] }
  0xf3   : > { %4664 = vmatmul.mubr.msk.bf16.gmra.mrb[24].mxu0 %vm887_vm1, %v6488_v28  ;;  %4515 = vmatprep.mubr.msk.bf16.mxu1 %vm887_vm1, %v6489_v18  ;;  %v3419_v28 = vmul.f32 %v6504_v27, %v3387_v35  ;;  %v3386_v18 = vld [vmem:[#allocation2 + $0x89] sm:$0xff] }
  0xf4   : > { %4667 = vmatprep.mubr.msk.bf16.mxu0 %vm887_vm1, %v6005_v6 }
  0xf5   : > { %v3444_v38 = vpack.c.bf16 %v3419_v28, %v3386_v18 }
  0xfa   : > { %4516 = vmatmul.mubr.msk.bf16.gmra.mrb[12].mxu1 %vm887_vm1, %v6491_v17  ;;  %v3446_v17 = vpack.c.bf16 %v3423_v8, %v3390_v52 }
  0xfb   : > { %4668 = vmatmul.mubr.msk.bf16.gmra.mrb[28].mxu0 %vm887_vm1, %v3127_v41  ;;  %4519 = vmatprep.mubr.msk.bf16.mxu1 %vm887_vm1, %v6492_v12  ;;  %v6505_v41 = vpack.c.bf16 %v5824_v44, %v5821_v26  ;;  %v3393_v12 = vld [vmem:[#allocation2 + $0xc1] sm:$0xff] }
  0xfc   : > { %4673 = vmatprep.mubr.msk.bf16.mxu0 %vm887_vm1, %v3438_v3  ;;  %v3388_v3 = vld [vmem:[#allocation2 + $0x99] sm:$0xff] }
  0xfd   : > { %v3445_v10 = vpack.c.bf16 %v3421_v7, %v3388_v3  ;;  %v6508_v26 = vld [vmem:[#allocation13_spill] sm:$0xff] }
  0xfe   : > { %v3425_v44 = vmul.f32 %v6508_v26, %v3393_v12 }
 0x100   : > { %v3447_v45 = vpack.c.bf16 %v3425_v44, %v3392_v32 }
 0x102   : > { %4520 = vmatmul.mubr.msk.bf16.gmra.mrb[16].mxu1 %vm887_vm1, %v6496_v57 }
 0x103   : > { %4674 = vmatmul.mubr.msk.bf16.vlgmr.msra.gmra.mrb[0].mxu0 %vm887_vm1, %v3439_v24  ;;  %4523 = vmatprep.mubr.msk.bf16.mxu1 %vm887_vm1, %v6498_v51  ;;  %v3448_v24 = vpack.c.bf16 %v3427_v22, %v3394_v56  ;;  %v6512_v51 = vld [vmem:[#allocation25_spill] sm:$0xff] }
 0x104   : > { %4677 = vmatprep.mubr.msk.bf16.mxu0 %vm887_vm1, %v3440_v33  ;;  %v3397_v33 = vld [vmem:[#allocation2 + $0xe1] sm:$0xff]  ;;  %v3433_v34 = vmul.f32 %v6512_v51, %v6467_v47  ;;  %v3437_v47 = vmul.f32 %v6468_v16, %v3405_v36 }
 0x105   : > { %v3429_v15 = vmul.f32 %v6510_v62, %v3397_v33 }
 0x10a   : > { %4524 = vmatmul.mubr.msk.bf16.gmra.mrb[20].mxu1 %vm887_vm1, %v6502_v40 }
 0x10b   : > { %4678 = vmatmul.mubr.msk.bf16.gmra.mrb[4].mxu0 %vm887_vm1, %v3441_v61  ;;  %4527 = vmatprep.mubr.msk.bf16.mxu1 %vm887_vm1, %v1884_v20  ;;  %v2180_v61 = vpack.c.bf16 %v2163_v42, %v2162_v54  ;;  %v6515_v20 = vld [vmem:[#allocation44_spill] sm:$0xff] }
 0x10c   : > { %4681 = vmatprep.mubr.msk.bf16.mxu0 %vm887_vm1, %v3442_v4  ;;  %v3452_v4 = vpack.c.bf16 %v3435_v39, %v6515_v20 }
 0x112   : > { %4528 = vmatmul.mubr.msk.bf16.gmra.mrb[24].mxu1 %vm887_vm1, %v6505_v41  ;;  %v6125_v41 = vld [vmem:[%s6315_s2] ss:$0 sm:$0xff] }
 0x113   : > { %4682 = vmatmul.mubr.msk.bf16.gmra.mrb[8].mxu0 %vm887_vm1, %v3443_v50  ;;  %4531 = vmatprep.mubr.msk.bf16.mxu1 %vm887_vm1, %v1886_v30 }
 0x114   : > { %4685 = vmatprep.mubr.msk.bf16.mxu0 %vm887_vm1, %v3444_v38 }
 0x11a   : > { %4532 = vmatmul.mubr.msk.bf16.gmra.mrb[28].mxu1 %vm887_vm1, %v1887_v13  ;;  %v3396_v13 = vld [vmem:[#allocation2 + $0xd9] sm:$0xff] }
 0x11b   : > { %4686 = vmatmul.mubr.msk.bf16.gmra.mrb[12].mxu0 %vm887_vm1, %v3445_v10  ;;  %4553 = vmatprep.mubr.msk.bf16.mxu1 %vm887_vm1, %v5961_v49  ;;  %v6511_v49 = vld [vmem:[#allocation19_spill] sm:$0xff]  ;;  %v3449_v57 = vpack.c.bf16 %v3429_v15, %v3396_v13 }
 0x11c   : > { %4689 = vmatprep.mubr.msk.bf16.mxu0 %vm887_vm1, %v3446_v17  ;;  %v3431_v25 = vmul.f32 %v6511_v49, %v3399_v63 }
 0x11e   : > { %v3450_v9 = vpack.c.bf16 %v3431_v25, %v3398_v60 }
 0x122   : > { %4554 = vmatmul.mubr.msk.bf16.vlgmr.msra.gmra.mrb[16].mxu1 %vm887_vm1, %v5963_v19  ;;  %v2160_v19 = vld [vmem:[#allocation2 + $0xe8] sm:$0xff] }
 0x123   : > { %4690 = vmatmul.mubr.msk.bf16.gmra.mrb[16].mxu0 %vm887_vm1, %v3447_v45  ;;  %4557 = vmatprep.mubr.msk.bf16.mxu1 %vm887_vm1, %v5974_v31  ;;  %v2161_v31 = vld [vmem:[#allocation2 + $0xf0] sm:$0xff] }
 0x124   : > { %4693 = vmatprep.mubr.msk.bf16.mxu0 %vm887_vm1, %v3448_v24  ;;  %v2179_v11 = vpack.c.bf16 %v2161_v31, %v2160_v19 }
 0x12a   : > { %4558 = vmatmul.mubr.msk.bf16.gmra.mrb[20].mxu1 %vm887_vm1, %v5976_v37  ;;  %v3451_v37 = vpack.c.bf16 %v3433_v34, %v6472_v59 }
 0x12b   : > { %4694 = vmatmul.mubr.msk.bf16.gmra.mrb[20].mxu0 %vm887_vm1, %v3449_v57  ;;  %4561 = vmatprep.mubr.msk.bf16.mxu1 %vm887_vm1, %v5991_v5  ;;  %v3404_v5 = vld [vmem:[#allocation2 + $0x119] sm:$0xff] }
 0x12c   : > { %4697 = vmatprep.mubr.msk.bf16.mxu0 %vm887_vm1, %v3450_v9  ;;  %v3453_v35 = vpack.c.bf16 %v3437_v47, %v3404_v5 }
 0x132   : > { %4562 = vmatmul.mubr.msk.bf16.gmra.mrb[24].mxu1 %vm887_vm1, %v2179_v11 }
 0x133   : > { %4698 = vmatmul.mubr.msk.bf16.gmra.mrb[24].mxu0 %vm887_vm1, %v3451_v37  ;;  %4565 = vmatprep.mubr.msk.bf16.mxu1 %vm887_vm1, %v2180_v61 }
 0x134   : > { %4701 = vmatprep.mubr.msk.bf16.mxu0 %vm887_vm1, %v3452_v4 }
 0x13a   : > { %4566 = vmatmul.mubr.msk.bf16.gmra.mrb[28].mxu1 %vm887_vm1, %v6005_v6 }
 0x13b   : > { %4702 = vmatmul.mubr.msk.bf16.gmra.mrb[28].mxu0 %vm887_vm1, %v3453_v35 }
 0x1b5   : > { %v4505_v59 = vpop.f32.mrb[0].mxu1 }
 0x1b6   : > { %v1975_v48 = vpop.f32.mrb[1].mxu1 }
 0x1b7   : > { %v4506_v40 = vpop.f32.mrb[2].mxu1 }
 0x1b8   : > { %v1978_v0 = vpop.f32.mrb[3].mxu1 }
 0x1bd   : > { %v4509_v58 = vpop.f32.mrb[4].mxu1 }
 0x1be   : > { %v1991_v43 = vpop.f32.mrb[5].mxu1 }
 0x1bf   : > { %v4510_v46 = vpop.f32.mrb[6].mxu1 }
 0x1c0   : > { %v1994_v27 = vpop.f32.mrb[7].mxu1 }
 0x1c5   : > { %v6106_v28 = vpop.f32.mrb[8].mxu1 }
 0x1c6   : > { %v6108_v16 = vpop.f32.mrb[9].mxu1 }
 0x1c7   : > { %v6110_v18 = vpop.f32.mrb[10].mxu1 }
 0x1c8   : > { %v6112_v50 = vpop.f32.mrb[11].mxu1 }
 0x1cd   : > { %v6114_v6 = vpop.f32.mrb[12].mxu1 }
 0x1ce   : > { %v6116_v30 = vpop.f32.mrb[13].mxu1 }
 0x1cf   : > { %v6118_v38 = vpop.f32.mrb[14].mxu1 }
 0x1d0   : > { %v6120_v23 = vpop.f32.mrb[15].mxu1 }
 0x1d6   : > { %v4675_v55 = vpop.f32.mrb[0].mxu0 }
 0x1d7   : > { %v4707_v53 = vadd.f32 %v4675_v55, %v4505_v59  ;;  %v3541_v7 = vpop.f32.mrb[1].mxu0 }
 0x1d8   : > { %v4708_v3 = vadd.f32 %v3541_v7, %v1975_v48  ;;  %v4676_v29 = vpop.f32.mrb[2].mxu0 }
 0x1d9   : > { %v3709_v8 = vadd.f32 %v4707_v53, %v6125_v41  ;;  %v4709_v52 = vadd.f32 %v4676_v29, %v4506_v40  ;;  %v3544_v10 = vpop.f32.mrb[3].mxu0 }
 0x1da   : > { %v3707_v17 = vadd.f32 %v4708_v3, %v6125_v41  ;;  %v4710_v12 = vadd.f32 %v3544_v10, %v1978_v0 }
 0x1db   : > { %3741 = vst.msk [vmem:[%s6132_s27 + $0x10] sm:$0xff] %vm887_vm1, %v3709_v8  ;;  %v3710_v21 = vadd.f32 %v4709_v52, %v6125_v41  ;;  %v3844_v32 = vmul.f32 %v3709_v8, %v3709_v8  ;;  %v3774_v15 = vsel %vm887_vm1, %v3709_v8, 0.0 }
 0x1dc   : > { %3739 = vst.msk [vmem:[%s6132_s27] sm:$0xff] %vm887_vm1, %v3707_v17  ;;  %v3842_v26 = vmul.f32 %v3707_v17, %v3707_v17  ;;  %v3708_v44 = vadd.f32 %v4710_v12, %v6125_v41  ;;  %v3771_v14 = vsel %vm887_vm1, %v3707_v17, 0.0 }
 0x1dd   : > { %3742 = vst.msk [vmem:[%s6132_s27 + $0x18] sm:$0xff] %vm887_vm1, %v3710_v21  ;;  %v3845_v24 = vmul.f32 %v3710_v21, %v3710_v21  ;;  %v3877_v34 = vsel %vm887_vm1, %v3844_v32, 0.0  ;;  %v3776_v54 = vsel %vm887_vm1, %v3710_v21, 0.0 }
 0x1de   : > { %3740 = vst.msk [vmem:[%s6132_s27 + $0x8] sm:$0xff] %vm887_vm1, %v3708_v44  ;;  %v3772_v22 = vsel %vm887_vm1, %v3708_v44, 0.0  ;;  %v3843_v56 = vmul.f32 %v3708_v44, %v3708_v44  ;;  %v4679_v45 = vpop.f32.mrb[4].mxu0  ;;  %v3874_v13 = vsel %vm887_vm1, %v3842_v26, 0.0 }
 0x1df   : > { %v3773_v33 = vadd.f32 %v3772_v22, %v3771_v14  ;;  %v4711_v63 = vadd.f32 %v4679_v45, %v4509_v58  ;;  %v3557_v62 = vpop.f32.mrb[5].mxu0  ;;  %v3879_v2 = vsel %vm887_vm1, %v3845_v24, 0.0 }
 0x1e0   : > { %v3875_v49 = vsel %vm887_vm1, %v3843_v56, 0.0  ;;  %v4712_v25 = vadd.f32 %v3557_v62, %v1991_v43  ;;  %v4680_v60 = vpop.f32.mrb[6].mxu0 }
 0x1e1   : > { %v3775_v57 = vadd.f32 %v3774_v15, %v3773_v33  ;;  %v3876_v9 = vadd.f32 %v3875_v49, %v3874_v13  ;;  %v3713_v19 = vadd.f32 %v4711_v63, %v6125_v41  ;;  %v4713_v31 = vadd.f32 %v4680_v60, %v4510_v46  ;;  %v3560_v51 = vpop.f32.mrb[7].mxu0 }
 0x1e2   : > { %v3711_v42 = vadd.f32 %v4712_v25, %v6125_v41  ;;  %v4714_v1 = vadd.f32 %v3560_v51, %v1994_v27 }
 0x1e3   : > { %v3878_v39 = vadd.f32 %v3877_v34, %v3876_v9  ;;  %3745 = vst.msk [vmem:[%s6132_s27 + $0x30] sm:$0xff] %vm887_vm1, %v3713_v19  ;;  %v3777_v11 = vadd.f32 %v3776_v54, %v3775_v57  ;;  %v3714_v20 = vadd.f32 %v4713_v31, %v6125_v41  ;;  %v3848_v5 = vmul.f32 %v3713_v19, %v3713_v19 }
 0x1e4   : > { %3743 = vst.msk [vmem:[%s6132_s27 + $0x20] sm:$0xff] %vm887_vm1, %v3711_v42  ;;  %v3778_v37 = vsel %vm887_vm1, %v3711_v42, 0.0  ;;  %v3846_v61 = vmul.f32 %v3711_v42, %v3711_v42  ;;  %v3712_v4 = vadd.f32 %v4714_v1, %v6125_v41  ;;  %v3782_v27 = vsel %vm887_vm1, %v3713_v19, 0.0 }
 0x1e5   : > { %v3779_v36 = vadd.f32 %v3778_v37, %v3777_v11  ;;  %v3880_v47 = vadd.f32 %v3879_v2, %v3878_v39  ;;  %3746 = vst.msk [vmem:[%s6132_s27 + $0x38] sm:$0xff] %vm887_vm1, %v3714_v20  ;;  %v3849_v55 = vmul.f32 %v3714_v20, %v3714_v20 }
 0x1e6   : > { %v3881_v35 = vsel %vm887_vm1, %v3846_v61, 0.0  ;;  %3744 = vst.msk [vmem:[%s6132_s27 + $0x28] sm:$0xff] %vm887_vm1, %v3712_v4  ;;  %v3780_v59 = vsel %vm887_vm1, %v3712_v4, 0.0  ;;  %v4683_v48 = vpop.f32.mrb[8].mxu0  ;;  %v3847_v58 = vmul.f32 %v3712_v4, %v3712_v4 }
 0x1e7   : > { %v3882_v40 = vadd.f32 %v3881_v35, %v3880_v47  ;;  %v3781_v0 = vadd.f32 %v3780_v59, %v3779_v36  ;;  %v4715_v43 = vadd.f32 %v4683_v48, %v6106_v28  ;;  %v3573_v46 = vpop.f32.mrb[9].mxu0  ;;  %v3784_v28 = vsel %vm887_vm1, %v3714_v20, 0.0 }
 0x1e8   : > { %v4716_v53 = vadd.f32 %v3573_v46, %v6108_v16  ;;  %v4684_v7 = vpop.f32.mrb[10].mxu0  ;;  %v3883_v29 = vsel %vm887_vm1, %v3847_v58, 0.0  ;;  %v3885_v16 = vsel %vm887_vm1, %v3848_v5, 0.0  ;;  %v3887_v56 = vsel %vm887_vm1, %v3849_v55, 0.0 }
 0x1e9   : > { %v3783_v3 = vadd.f32 %v3782_v27, %v3781_v0  ;;  %v3717_v8 = vadd.f32 %v4715_v43, %v6125_v41  ;;  %v4717_v52 = vadd.f32 %v4684_v7, %v6110_v18  ;;  %v3576_v10 = vpop.f32.mrb[11].mxu0  ;;  %v3884_v17 = vadd.f32 %v3883_v29, %v3882_v40 }
 0x1ea   : > { %v3715_v12 = vadd.f32 %v4716_v53, %v6125_v41  ;;  %v4718_v21 = vadd.f32 %v3576_v10, %v6112_v50 }
 0x1eb   : > { %3749 = vst.msk [vmem:[%s6132_s27 + $0x50] sm:$0xff] %vm887_vm1, %v3717_v8  ;;  %v3785_v26 = vadd.f32 %v3784_v28, %v3783_v3  ;;  %v3718_v44 = vadd.f32 %v4717_v52, %v6125_v41  ;;  %v3886_v32 = vadd.f32 %v3885_v16, %v3884_v17  ;;  %v3852_v15 = vmul.f32 %v3717_v8, %v3717_v8 }
 0x1ec   : > { %3747 = vst.msk [vmem:[%s6132_s27 + $0x40] sm:$0xff] %vm887_vm1, %v3715_v12  ;;  %v3786_v18 = vsel %vm887_vm1, %v3715_v12, 0.0  ;;  %v3850_v14 = vmul.f32 %v3715_v12, %v3715_v12  ;;  %v3716_v22 = vadd.f32 %v4718_v21, %v6125_v41  ;;  %v3790_v60 = vsel %vm887_vm1, %v3717_v8, 0.0 }
 0x1ed   : > { %v3787_v45 = vadd.f32 %v3786_v18, %v3785_v26  ;;  %3750 = vst.msk [vmem:[%s6132_s27 + $0x58] sm:$0xff] %vm887_vm1, %v3718_v44  ;;  %v3888_v50 = vadd.f32 %v3887_v56, %v3886_v32  ;;  %v3853_v51 = vmul.f32 %v3718_v44, %v3718_v44 }
 0x1ee   : > { %v3889_v24 = vsel %vm887_vm1, %v3850_v14, 0.0  ;;  %3748 = vst.msk [vmem:[%s6132_s27 + $0x48] sm:$0xff] %vm887_vm1, %v3716_v22  ;;  %v3788_v33 = vsel %vm887_vm1, %v3716_v22, 0.0  ;;  %v3851_v63 = vmul.f32 %v3716_v22, %v3716_v22  ;;  %v4687_v62 = vpop.f32.mrb[12].mxu0 }
 0x1ef   : > { %v3789_v13 = vadd.f32 %v3788_v33, %v3787_v45  ;;  %v4719_v49 = vadd.f32 %v4687_v62, %v6114_v6  ;;  %v3589_v25 = vpop.f32.mrb[13].mxu0  ;;  %v3890_v57 = vadd.f32 %v3889_v24, %v3888_v50  ;;  %v3792_v6 = vsel %vm887_vm1, %v3718_v44, 0.0 }
 0x1f0   : > { %v3891_v9 = vsel %vm887_vm1, %v3851_v63, 0.0  ;;  %v4720_v19 = vadd.f32 %v3589_v25, %v6116_v30  ;;  %v4688_v31 = vpop.f32.mrb[14].mxu0  ;;  %v3893_v30 = vsel %vm887_vm1, %v3852_v15, 0.0  ;;  %v3895_v47 = vsel %vm887_vm1, %v3853_v51, 0.0 }
 0x1f1   : > { %v3791_v34 = vadd.f32 %v3790_v60, %v3789_v13  ;;  %v3721_v54 = vadd.f32 %v4719_v49, %v6125_v41  ;;  %v4721_v42 = vadd.f32 %v4688_v31, %v6118_v38  ;;  %v3592_v1 = vpop.f32.mrb[15].mxu0  ;;  %v3892_v2 = vadd.f32 %v3891_v9, %v3890_v57 }
 0x1f2   : > { %v3719_v39 = vadd.f32 %v4720_v19, %v6125_v41  ;;  %v4722_v11 = vadd.f32 %v3592_v1, %v6120_v23 }
 0x1f3   : > { %3753 = vst.msk [vmem:[%s6132_s27 + $0x70] sm:$0xff] %vm887_vm1, %v3721_v54  ;;  %v3793_v37 = vadd.f32 %v3792_v6, %v3791_v34  ;;  %v3722_v61 = vadd.f32 %v4721_v42, %v6125_v41  ;;  %v3894_v20 = vadd.f32 %v3893_v30, %v3892_v2  ;;  %v3856_v43 = vmul.f32 %v3721_v54, %v3721_v54 }
 0x1f4   : > { %3751 = vst.msk [vmem:[%s6132_s27 + $0x60] sm:$0xff] %vm887_vm1, %v3719_v39  ;;  %v3794_v38 = vsel %vm887_vm1, %v3719_v39, 0.0  ;;  %v3854_v4 = vmul.f32 %v3719_v39, %v3719_v39  ;;  %v3720_v36 = vadd.f32 %v4722_v11, %v6125_v41  ;;  %v3798_v7 = vsel %vm887_vm1, %v3721_v54, 0.0 }
 0x1f5   : > { %v3795_v5 = vadd.f32 %v3794_v38, %v3793_v37  ;;  %3754 = vst.msk [vmem:[%s6132_s27 + $0x78] sm:$0xff] %vm887_vm1, %v3722_v61  ;;  %v4555_v23 = vpop.f32.mrb[16].mxu1  ;;  %v3896_v35 = vadd.f32 %v3895_v47, %v3894_v20  ;;  %v3857_v28 = vmul.f32 %v3722_v61, %v3722_v61  ;;  %v3800_v26 = vsel %vm887_vm1, %v3722_v61, 0.0 }
 0x1f6   : > { %v3897_v59 = vsel %vm887_vm1, %v3854_v4, 0.0  ;;  %3752 = vst.msk [vmem:[%s6132_s27 + $0x68] sm:$0xff] %vm887_vm1, %v3720_v36  ;;  %v3796_v48 = vsel %vm887_vm1, %v3720_v36, 0.0  ;;  %v3855_v40 = vmul.f32 %v3720_v36, %v3720_v36  ;;  %v2333_v0 = vpop.f32.mrb[17].mxu1  ;;  %v4691_v58 = vpop.f32.mrb[16].mxu0  ;;  %v3901_v14 = vsel %vm887_vm1, %v3856_v43, 0.0 }
 0x1f7   : > { %v3797_v46 = vadd.f32 %v3796_v48, %v3795_v5  ;;  %v4723_v27 = vadd.f32 %v4691_v58, %v4555_v23  ;;  %v4556_v55 = vpop.f32.mrb[18].mxu1  ;;  %v3605_v53 = vpop.f32.mrb[17].mxu0  ;;  %v3898_v3 = vadd.f32 %v3897_v59, %v3896_v35  ;;  %v3903_v63 = vsel %vm887_vm1, %v3857_v28, 0.0 }
 0x1f8   : > { %v3899_v29 = vsel %vm887_vm1, %v3855_v40, 0.0  ;;  %v4724_v8 = vadd.f32 %v3605_v53, %v2333_v0  ;;  %v2336_v52 = vpop.f32.mrb[19].mxu1  ;;  %v4692_v10 = vpop.f32.mrb[18].mxu0 }
 0x1f9   : > { %v3799_v17 = vadd.f32 %v3798_v7, %v3797_v46  ;;  %v3725_v12 = vadd.f32 %v4723_v27, %v6125_v41  ;;  %v4725_v21 = vadd.f32 %v4692_v10, %v4556_v55  ;;  %v3608_v16 = vpop.f32.mrb[19].mxu0  ;;  %v3900_v44 = vadd.f32 %v3899_v29, %v3898_v3 }
 0x1fa   : > { %v3723_v32 = vadd.f32 %v4724_v8, %v6125_v41  ;;  %v4726_v18 = vadd.f32 %v3608_v16, %v2336_v52 }
 0x1fb   : > { %3757 = vst.msk [vmem:[%s6132_s27 + $0x90] sm:$0xff] %vm887_vm1, %v3725_v12  ;;  %v3801_v22 = vadd.f32 %v3800_v26, %v3799_v17  ;;  %v3726_v56 = vadd.f32 %v4725_v21, %v6125_v41  ;;  %v3902_v45 = vadd.f32 %v3901_v14, %v3900_v44  ;;  %v3860_v19 = vmul.f32 %v3725_v12, %v3725_v12 }
 0x1fc   : > { %3755 = vst.msk [vmem:[%s6132_s27 + $0x80] sm:$0xff] %vm887_vm1, %v3723_v32  ;;  %v3802_v50 = vsel %vm887_vm1, %v3723_v32, 0.0  ;;  %v3858_v24 = vmul.f32 %v3723_v32, %v3723_v32  ;;  %v3724_v33 = vadd.f32 %v4726_v18, %v6125_v41  ;;  %v3806_v42 = vsel %vm887_vm1, %v3725_v12, 0.0 }
 0x1fd   : > { %v3803_v62 = vadd.f32 %v3802_v50, %v3801_v22  ;;  %3758 = vst.msk [vmem:[%s6132_s27 + $0x98] sm:$0xff] %vm887_vm1, %v3726_v56  ;;  %v4559_v15 = vpop.f32.mrb[20].mxu1  ;;  %v3904_v13 = vadd.f32 %v3903_v63, %v3902_v45  ;;  %v3861_v30 = vmul.f32 %v3726_v56, %v3726_v56  ;;  %v3808_v4 = vsel %vm887_vm1, %v3726_v56, 0.0 }
 0x1fe   : > { %v3905_v49 = vsel %vm887_vm1, %v3858_v24, 0.0  ;;  %3756 = vst.msk [vmem:[%s6132_s27 + $0x88] sm:$0xff] %vm887_vm1, %v3724_v33  ;;  %v3804_v25 = vsel %vm887_vm1, %v3724_v33, 0.0  ;;  %v3859_v60 = vmul.f32 %v3724_v33, %v3724_v33  ;;  %v2349_v57 = vpop.f32.mrb[21].mxu1  ;;  %v4695_v9 = vpop.f32.mrb[20].mxu0  ;;  %v3909_v23 = vsel %vm887_vm1, %v3860_v19, 0.0 }
 0x1ff   : > { %v3805_v31 = vadd.f32 %v3804_v25, %v3803_v62  ;;  %v4727_v51 = vadd.f32 %v4695_v9, %v4559_v15  ;;  %v4560_v34 = vpop.f32.mrb[22].mxu1  ;;  %v3621_v54 = vpop.f32.mrb[21].mxu0  ;;  %v3906_v1 = vadd.f32 %v3905_v49, %v3904_v13  ;;  %v3911_v43 = vsel %vm887_vm1, %v3861_v30, 0.0 }
 0x200   : > { %v3907_v6 = vsel %vm887_vm1, %v3859_v60, 0.0  ;;  %v4728_v2 = vadd.f32 %v3621_v54, %v2349_v57  ;;  %v2352_v39 = vpop.f32.mrb[23].mxu1  ;;  %v4696_v11 = vpop.f32.mrb[22].mxu0 }
 0x201   : > { %v3807_v37 = vadd.f32 %v3806_v42, %v3805_v31  ;;  %v3729_v61 = vadd.f32 %v4727_v51, %v6125_v41  ;;  %v4729_v20 = vadd.f32 %v4696_v11, %v4560_v34  ;;  %v3624_v38 = vpop.f32.mrb[23].mxu0  ;;  %v3908_v36 = vadd.f32 %v3907_v6, %v3906_v1 }
 0x202   : > { %v3727_v47 = vadd.f32 %v4728_v2, %v6125_v41  ;;  %v4730_v5 = vadd.f32 %v3624_v38, %v2352_v39 }
 0x203   : > { %3761 = vst.msk [vmem:[%s6132_s27 + $0xb0] sm:$0xff] %vm887_vm1, %v3729_v61  ;;  %v3809_v35 = vadd.f32 %v3808_v4, %v3807_v37  ;;  %v3730_v59 = vadd.f32 %v4729_v20, %v6125_v41  ;;  %v3910_v48 = vadd.f32 %v3909_v23, %v3908_v36  ;;  %v3864_v52 = vmul.f32 %v3729_v61, %v3729_v61 }
 0x204   : > { %3759 = vst.msk [vmem:[%s6132_s27 + $0xa0] sm:$0xff] %vm887_vm1, %v3727_v47  ;;  %v3810_v40 = vsel %vm887_vm1, %v3727_v47, 0.0  ;;  %v3862_v0 = vmul.f32 %v3727_v47, %v3727_v47  ;;  %v3728_v58 = vadd.f32 %v4730_v5, %v6125_v41  ;;  %v3814_v21 = vsel %vm887_vm1, %v3729_v61, 0.0 }
 0x205   : > { %v3811_v46 = vadd.f32 %v3810_v40, %v3809_v35  ;;  %3762 = vst.msk [vmem:[%s6132_s27 + $0xb8] sm:$0xff] %vm887_vm1, %v3730_v59  ;;  %v4563_v27 = vpop.f32.mrb[24].mxu1  ;;  %v3912_v55 = vadd.f32 %v3911_v43, %v3910_v48  ;;  %v3865_v14 = vmul.f32 %v3730_v59, %v3730_v59  ;;  %v3816_v24 = vsel %vm887_vm1, %v3730_v59, 0.0 }
 0x206   : > { %v3913_v53 = vsel %vm887_vm1, %v3862_v0, 0.0  ;;  %3760 = vst.msk [vmem:[%s6132_s27 + $0xa8] sm:$0xff] %vm887_vm1, %v3728_v58  ;;  %v3812_v7 = vsel %vm887_vm1, %v3728_v58, 0.0  ;;  %v3863_v3 = vmul.f32 %v3728_v58, %v3728_v58  ;;  %v2365_v29 = vpop.f32.mrb[25].mxu1  ;;  %v4699_v8 = vpop.f32.mrb[24].mxu0  ;;  %v3917_v15 = vsel %vm887_vm1, %v3864_v52, 0.0 }
 0x207   : > { %v3813_v10 = vadd.f32 %v3812_v7, %v3811_v46  ;;  %v4731_v28 = vadd.f32 %v4699_v8, %v4563_v27  ;;  %v4564_v17 = vpop.f32.mrb[26].mxu1  ;;  %v3637_v12 = vpop.f32.mrb[25].mxu0  ;;  %v3914_v16 = vadd.f32 %v3913_v53, %v3912_v55  ;;  %v3919_v19 = vsel %vm887_vm1, %v3865_v14, 0.0 }
 0x208   : > { %v3915_v26 = vsel %vm887_vm1, %v3863_v3, 0.0  ;;  %v4732_v44 = vadd.f32 %v3637_v12, %v2365_v29  ;;  %v2368_v32 = vpop.f32.mrb[27].mxu1  ;;  %v4700_v18 = vpop.f32.mrb[26].mxu0 }
 0x209   : > { %v3815_v22 = vadd.f32 %v3814_v21, %v3813_v10  ;;  %v3733_v56 = vadd.f32 %v4731_v28, %v6125_v41  ;;  %v4733_v45 = vadd.f32 %v4700_v18, %v4564_v17  ;;  %v3640_v50 = vpop.f32.mrb[27].mxu0  ;;  %v3916_v33 = vadd.f32 %v3915_v26, %v3914_v16 }
 0x20a   : > { %v3731_v63 = vadd.f32 %v4732_v44, %v6125_v41  ;;  %v4734_v62 = vadd.f32 %v3640_v50, %v2368_v32 }
 0x20b   : > { %3765 = vst.msk [vmem:[%s6132_s27 + $0xd0] sm:$0xff] %vm887_vm1, %v3733_v56  ;;  %v3817_v13 = vadd.f32 %v3816_v24, %v3815_v22  ;;  %v3734_v49 = vadd.f32 %v4733_v45, %v6125_v41  ;;  %v3918_v25 = vadd.f32 %v3917_v15, %v3916_v33  ;;  %v3868_v39 = vmul.f32 %v3733_v56, %v3733_v56 }
 0x20c   : > { %3763 = vst.msk [vmem:[%s6132_s27 + $0xc0] sm:$0xff] %vm887_vm1, %v3731_v63  ;;  %v3818_v60 = vsel %vm887_vm1, %v3731_v63, 0.0  ;;  %v3866_v57 = vmul.f32 %v3731_v63, %v3731_v63  ;;  %v3732_v9 = vadd.f32 %v4734_v62, %v6125_v41  ;;  %v3822_v20 = vsel %vm887_vm1, %v3733_v56, 0.0 }
 0x20d   : > { %v3819_v31 = vadd.f32 %v3818_v60, %v3817_v13  ;;  %3766 = vst.msk [vmem:[%s6132_s27 + $0xd8] sm:$0xff] %vm887_vm1, %v3734_v49  ;;  %v4567_v51 = vpop.f32.mrb[28].mxu1  ;;  %v3920_v34 = vadd.f32 %v3919_v19, %v3918_v25  ;;  %v3869_v23 = vmul.f32 %v3734_v49, %v3734_v49  ;;  %v3824_v0 = vsel %vm887_vm1, %v3734_v49, 0.0 }
 0x20e   : > { %v3921_v54 = vsel %vm887_vm1, %v3866_v57, 0.0  ;;  %3764 = vst.msk [vmem:[%s6132_s27 + $0xc8] sm:$0xff] %vm887_vm1, %v3732_v9  ;;  %v3820_v42 = vsel %vm887_vm1, %v3732_v9, 0.0  ;;  %v3867_v1 = vmul.f32 %v3732_v9, %v3732_v9  ;;  %v2381_v6 = vpop.f32.mrb[29].mxu1  ;;  %v4703_v2 = vpop.f32.mrb[28].mxu0  ;;  %v3925_v27 = vsel %vm887_vm1, %v3868_v39, 0.0 }
 0x20f   : > { %v3821_v11 = vadd.f32 %v3820_v42, %v3819_v31  ;;  %v4735_v30 = vadd.f32 %v4703_v2, %v4567_v51  ;;  %v4568_v37 = vpop.f32.mrb[30].mxu1  ;;  %v3653_v61 = vpop.f32.mrb[29].mxu0  ;;  %v3922_v38 = vadd.f32 %v3921_v54, %v3920_v34  ;;  %v3927_v52 = vsel %vm887_vm1, %v3869_v23, 0.0 }
 0x210   : > { %v3923_v4 = vsel %vm887_vm1, %v3867_v1, 0.0  ;;  %v4736_v36 = vadd.f32 %v3653_v61, %v2381_v6  ;;  %v2384_v47 = vpop.f32.mrb[31].mxu1  ;;  %v4704_v5 = vpop.f32.mrb[30].mxu0 }
 0x211   : > { %v3823_v35 = vadd.f32 %v3822_v20, %v3821_v11  ;;  %v3737_v59 = vadd.f32 %v4735_v30, %v6125_v41  ;;  %v4737_v48 = vadd.f32 %v4704_v5, %v4568_v37  ;;  %v3656_v40 = vpop.f32.mrb[31].mxu0  ;;  %v3924_v58 = vadd.f32 %v3923_v4, %v3922_v38 }
 0x212   : > { %v3735_v43 = vadd.f32 %v4736_v36, %v6125_v41  ;;  %v4738_v46 = vadd.f32 %v3656_v40, %v2384_v47 }
 0x213   : > { %3769 = vst.msk [vmem:[%s6132_s27 + $0xf0] sm:$0xff] %vm887_vm1, %v3737_v59  ;;  %v3825_v55 = vadd.f32 %v3824_v0, %v3823_v35  ;;  %v3738_v53 = vadd.f32 %v4737_v48, %v6125_v41  ;;  %v3926_v7 = vadd.f32 %v3925_v27, %v3924_v58  ;;  %v3872_v16 = vmul.f32 %v3737_v59, %v3737_v59 }
 0x214   : > { %3767 = vst.msk [vmem:[%s6132_s27 + $0xe0] sm:$0xff] %vm887_vm1, %v3735_v43  ;;  %v3826_v3 = vsel %vm887_vm1, %v3735_v43, 0.0  ;;  %v3870_v29 = vmul.f32 %v3735_v43, %v3735_v43  ;;  %v3736_v8 = vadd.f32 %v4738_v46, %v6125_v41  ;;  %v3830_v44 = vsel %vm887_vm1, %v3737_v59, 0.0 }
 0x215   : > { %v3827_v10 = vadd.f32 %v3826_v3, %v3825_v55  ;;  %3770 = vst.msk [vmem:[%s6132_s27 + $0xf8] sm:$0xff] %vm887_vm1, %v3738_v53  ;;  %v3928_v28 = vadd.f32 %v3927_v52, %v3926_v7  ;;  %v3873_v18 = vmul.f32 %v3738_v53, %v3738_v53  ;;  %v3832_v22 = vsel %vm887_vm1, %v3738_v53, 0.0 }
 0x216   : > { %v3929_v17 = vsel %vm887_vm1, %v3870_v29, 0.0  ;;  %3768 = vst.msk [vmem:[%s6132_s27 + $0xe8] sm:$0xff] %vm887_vm1, %v3736_v8  ;;  %v3828_v12 = vsel %vm887_vm1, %v3736_v8, 0.0  ;;  %v3871_v21 = vmul.f32 %v3736_v8, %v3736_v8  ;;  %v3933_v45 = vsel %vm887_vm1, %v3872_v16, 0.0 }
 0x217   : > { %v3829_v26 = vadd.f32 %v3828_v12, %v3827_v10  ;;  %v3930_v32 = vadd.f32 %v3929_v17, %v3928_v28  ;;  %v3935_v33 = vsel %vm887_vm1, %v3873_v18, 0.0 }
 0x218   : > { %v3931_v41 = vsel %vm887_vm1, %v3871_v21, 0.0 }
 0x219   : > { %v3831_v14 = vadd.f32 %v3830_v44, %v3829_v26  ;;  %v3932_v56 = vadd.f32 %v3931_v41, %v3930_v32 }
 0x21b   : > { %v3833_v50 = vadd.f32 %v3832_v22, %v3831_v14  ;;  %v3934_v24 = vadd.f32 %v3933_v45, %v3932_v56 }
 0x21d   : > { %v3834_v63 = vrot.slane %v3833_v50, 4  ;;  %v3936_v62 = vadd.f32 %v3935_v33, %v3934_v24 }
 0x21f   : > { %v3835_v15 = vadd.f32 %v3834_v63, %v3833_v50  ;;  %v3937_v13 = vrot.slane %v3936_v62, 4 }
 0x221   : > { %v3836_v49 = vrot.slane %v3835_v15, 2  ;;  %v3938_v25 = vadd.f32 %v3937_v13, %v3936_v62 }
 0x223   : > { %v3837_v60 = vadd.f32 %v3836_v49, %v3835_v15  ;;  %v3939_v57 = vrot.slane %v3938_v25, 2 }
 0x225   : > { %v3838_v9 = vrot.slane %v3837_v60, 1  ;;  %v3940_v19 = vadd.f32 %v3939_v57, %v3938_v25 }
 0x227   : > { %v3839_v31 = vadd.f32 %v3838_v9, %v3837_v60  ;;  %v3941_v51 = vrot.slane %v3940_v19, 1 }
 0x229   : > { %3841 = vst.msk [vmem:[%s241_s29] sm:$0x1] %vm3840_vm0, %v3839_v31  ;;  %v3942_v34 = vadd.f32 %v3941_v51, %v3940_v19 }
 0x22b   : > { %3943 = vst.msk [vmem:[%s244_s7] sm:$0x1] %vm3840_vm0, %v3942_v34 }
 0x22c PF: > { %s16_s18 = sadd.s32 1, %s4989_s18  }
 0x22d   : > { %p13_p5 = scmp.ge.s32.totalorder %s16_s18, 4  }
 0x22f   :  { %15 = sbr.rel (!%p13_p5) target bundleno = 1 (0x1), region = 94 }

// kernel: residual_block_forward.3
= control target key start
LH: loop header
LB: loop body
LE: loop exit
PB: predicated region body
PF: predicated region fallthrough
CT: control target
= control target key end

     0   :  { %s5026_s21 = smov 0   ;;  %s6349_s0 = inlined_call_operand.vmem [shape: f32[512,4], index: 0, kind: input, shape index: {}]   ;;  %s6350_s1 = inlined_call_operand.vmem [shape: f32[512,4], index: 1, kind: input, shape index: {}]   ;;  %s6351_s2 = inlined_call_operand.vmem [shape: f32[1,4], index: 2, kind: input, shape index: {}]   ;;  %s6352_s3 = inlined_call_operand.vmem [shape: f32[1,4], index: 3, kind: input, shape index: {}]   ;;  %s6353_s4 = inlined_call_operand.vmem [shape: bf16[9,4,4], index: 4, kind: input, shape index: {}]   ;;  %s6354_s5 = inlined_call_operand.vmem [shape: f32[1,4], index: 5, kind: input, shape index: {}]   ;;  %s6355_s6 = inlined_call_operand.vmem [shape: f32[512,4], index: 6, kind: output, shape index: {}]  }
   0x1 LB: > { %s4045_s22 = sadd.s32 4294967295, %s4988_s21   ;;  %p4049_p0 = scmp.ge.s32.totalorder %s4988_s21, 1  ;;  %s4988_s21 = sphi %s5026_s21, %s16_s21  }
   0x2   : > { %p224_p1 = scmp.lt.s32.totalorder %s4988_s21, 3 }
   0x4   : > { %p225_p2 = pnand %p4049_p0, %p224_p1 }
   0x6   : > { %228 = sbr.rel (%p225_p2) target bundleno = 540 (0x21c), region = 44 }
   0xd   : > { %v4090_v0 = vld [vmem:[%s6353_s4 + $0x2] sm:$0x3]  ;;  %vm1247_vm0 = vcmask 1041408   ;;  %v4157_v1 = vld [vmem:[%s6353_s4 + $0x8] sm:$0x3]  ;;  %vm1029_vm1 = vcmask 31744   ;;  %v278_v8 = vlaneseq }
   0xe   : > { %4962 = vmatprep.subr.msk.bf16.mxu1 %vm1247_vm0, %v4090_v0  ;;  %4966 = vmatprep.subr.msk.bf16.mxu0 %vm1247_vm0, %v4157_v1  ;;  %v1249_v2 = vsel %vm1247_vm0, %v4090_v0, 0  ;;  %v5044_v3 = vsel %vm1247_vm0, %v4157_v1, 0  ;;  %s4050_s27 = sshll.u32 %s4045_s22, 5  ;;  %v6356_v4 = vmov 0.0   ;;  %v1148_v5 = vld [vmem:[%s6353_s4] sm:$0x3] }
   0xf   : > { %6420 = vst [vmem:[#allocation3_spill] sm:$0xff] %v5044_v3  ;;  %4399 = vmatpush3.bf16.msra.mxu1 %v1249_v2  ;;  %4535 = vmatpush3.bf16.msra.mxu0 %v5044_v3  ;;  %1031 = vst.msk [vmem:[#allocation2 + $0x8] sm:$0xff] %vm1029_vm1, %v6356_v4  ;;  %p260_p3 = scmp.lt.s32.totalorder %s4050_s27, 63  ;;  %v5066_v6 = vld [vmem:[%s6353_s4 + $0xa] sm:$0x3]  ;;  %v5096_v20 = vsel %vm1247_vm0, %v1148_v5, 0 }
  0x10   : > { %1032 = vst.msk [vmem:[#allocation2 + $0x10] sm:$0xff] %vm1029_vm1, %v6356_v4  ;;  %1030 = vst.msk [vmem:[#allocation2] sm:$0xff] %vm1029_vm1, %v6356_v4  ;;  %4963 = vmatprep.subr.msk.bf16.mxu1 %vm1247_vm0, %v1148_v5  ;;  %4968 = vmatprep.subr.msk.bf16.mxu0 %vm1247_vm0, %v5066_v6  ;;  %v5075_v7 = vld [vmem:[%s6351_s2] ss:$0 sm:$0xff]  ;;  %v5102_v25 = vshrl.u32 %v278_v8, 7 }
  0x11   : > { %1033 = vst.msk [vmem:[#allocation2 + $0x118] sm:$0xff] %vm1029_vm1, %v6356_v4  ;;  %1034 = vst.msk [vmem:[#allocation2 + $0x120] sm:$0xff] %vm1029_vm1, %v6356_v4  ;;  %s6576_s27 = smov (!%p260_p3, %s4050_s27), 63  ;;  %v5086_v9 = vld [vmem:[%s6352_s3] ss:$0 sm:$0xff] }
  0x12   : > { %1035 = vst.msk [vmem:[#allocation2 + $0x128] sm:$0xff] %vm1029_vm1, %v6356_v4  ;;  %s5070_s8 = sshll.u32 %s6576_s27, 3 }
  0x13   : > { %s5081_s13 = scalar_lea.vmem %s6349_s0, %s5070_s8  ;;  %s6199_s7 = scalar_lea.vmem %s6350_s1, %s5070_s8 }
  0x14   : > { %v887_v10 = vld [vmem:[%s5081_s13] sm:$0xff]  ;;  %v888_v11 = vld [vmem:[%s5081_s13 + $0x8] sm:$0xff]  ;;  %v889_v12 = vld [vmem:[%s5081_s13 + $0x10] sm:$0xff] }
  0x15   : > { %v926_v15 = vmul.f32 %v5075_v7, %v887_v10  ;;  %v927_v16 = vmul.f32 %v5075_v7, %v888_v11  ;;  %v890_v17 = vld [vmem:[%s5081_s13 + $0x18] sm:$0xff]  ;;  %v928_v18 = vmul.f32 %v5075_v7, %v889_v12  ;;  %v891_v22 = vld [vmem:[%s5081_s13 + $0x20] sm:$0xff]  ;;  %v892_v23 = vld [vmem:[%s5081_s13 + $0x28] sm:$0xff] }
  0x16   : > { %v1149_v13 = vld [vmem:[#allocation2 + $0x8] sm:$0xff]  ;;  %v929_v21 = vmul.f32 %v5075_v7, %v890_v17  ;;  %v893_v24 = vld [vmem:[%s5081_s13 + $0x30] sm:$0xff]  ;;  %v930_v29 = vmul.f32 %v5075_v7, %v891_v22  ;;  %v894_v30 = vld [vmem:[%s5081_s13 + $0x38] sm:$0xff]  ;;  %v931_v32 = vmul.f32 %v5075_v7, %v892_v23 }
  0x17   : > { %v1150_v14 = vld [vmem:[#allocation2 + $0x10] sm:$0xff]  ;;  %v965_v26 = vadd.f32 %v5086_v9, %v926_v15  ;;  %v966_v27 = vadd.f32 %v5086_v9, %v927_v16  ;;  %v967_v28 = vadd.f32 %v5086_v9, %v928_v18  ;;  %v932_v33 = vmul.f32 %v5075_v7, %v893_v24  ;;  %v895_v35 = vld [vmem:[%s5081_s13 + $0x40] sm:$0xff]  ;;  %v896_v36 = vld [vmem:[%s5081_s13 + $0x48] sm:$0xff] }
  0x18   : > { %v1181_v19 = vpack.c.bf16 %v1150_v14, %v1149_v13  ;;  %v968_v31 = vadd.f32 %v5086_v9, %v929_v21  ;;  %v933_v34 = vmul.f32 %v5075_v7, %v894_v30  ;;  %v897_v37 = vld [vmem:[%s5081_s13 + $0x50] sm:$0xff]  ;;  %v969_v41 = vadd.f32 %v5086_v9, %v930_v29  ;;  %v898_v42 = vld [vmem:[%s5081_s13 + $0x58] sm:$0xff]  ;;  %v899_v47 = vld [vmem:[%s5081_s13 + $0x60] sm:$0xff] }
  0x19   : > { %v997_v38 = vmax.f32 %v965_v26, 0.0  ;;  %v998_v39 = vmax.f32 %v966_v27, 0.0  ;;  %v999_v40 = vmax.f32 %v967_v28, 0.0  ;;  %v970_v44 = vadd.f32 %v5086_v9, %v931_v32  ;;  %v900_v52 = vld [vmem:[%s5081_s13 + $0x68] sm:$0xff]  ;;  %v901_v53 = vld [vmem:[%s5081_s13 + $0x70] sm:$0xff]  ;;  %v902_v54 = vld [vmem:[%s5081_s13 + $0x78] sm:$0xff] }
  0x1a   : > { %4400 = vmatprep.mubr.msk.bf16.mxu1 %vm1029_vm1, %v1181_v19  ;;  %v1000_v43 = vmax.f32 %v968_v31, 0.0  ;;  %v971_v45 = vadd.f32 %v5086_v9, %v932_v33  ;;  %v972_v46 = vadd.f32 %v5086_v9, %v933_v34  ;;  %v1001_v48 = vmax.f32 %v969_v41, 0.0  ;;  %v903_v5 = vld [vmem:[%s5081_s13 + $0x80] sm:$0xff]  ;;  %v904_v8 = vld [vmem:[%s5081_s13 + $0x88] sm:$0xff]  ;;  %v905_v10 = vld [vmem:[%s5081_s13 + $0x90] sm:$0xff] }
  0x1b   : > { %1036 = vst.msk [vmem:[#allocation2 + $0x18] sm:$0xff] %vm1029_vm1, %v997_v38  ;;  %1037 = vst.msk [vmem:[#allocation2 + $0x20] sm:$0xff] %vm1029_vm1, %v998_v39  ;;  %v934_v49 = vmul.f32 %v5075_v7, %v895_v35  ;;  %v935_v50 = vmul.f32 %v5075_v7, %v896_v36  ;;  %v936_v51 = vmul.f32 %v5075_v7, %v897_v37  ;;  %v1002_v55 = vmax.f32 %v970_v44, 0.0  ;;  %v906_v15 = vld [vmem:[%s5081_s13 + $0x98] sm:$0xff]  ;;  %v907_v26 = vld [vmem:[%s5081_s13 + $0xa0] sm:$0xff] }
  0x1c   : > { %1038 = vst.msk [vmem:[#allocation2 + $0x28] sm:$0xff] %vm1029_vm1, %v999_v40  ;;  %1039 = vst.msk [vmem:[#allocation2 + $0x30] sm:$0xff] %vm1029_vm1, %v1000_v43  ;;  %v1003_v56 = vmax.f32 %v971_v45, 0.0  ;;  %v1004_v57 = vmax.f32 %v972_v46, 0.0  ;;  %v937_v58 = vmul.f32 %v5075_v7, %v898_v42  ;;  %v938_v62 = vmul.f32 %v5075_v7, %v899_v47  ;;  %v5175_v42 = vld [vmem:[%s6353_s4 + $0xc] sm:$0x3] }
  0x1d   : > { %1040 = vst.msk [vmem:[#allocation2 + $0x38] sm:$0xff] %vm1029_vm1, %v1001_v48  ;;  %v973_v59 = vadd.f32 %v5086_v9, %v934_v49  ;;  %v974_v60 = vadd.f32 %v5086_v9, %v935_v50  ;;  %v975_v61 = vadd.f32 %v5086_v9, %v936_v51  ;;  %1041 = vst.msk [vmem:[#allocation2 + $0x40] sm:$0xff] %vm1029_vm1, %v1002_v55  ;;  %v2701_v40 = vsel %vm1247_vm0, %v5066_v6, 0  ;;  %v908_v44 = vld [vmem:[%s5081_s13 + $0xa8] sm:$0xff]  ;;  %v909_v49 = vld [vmem:[%s5081_s13 + $0xb0] sm:$0xff] }
  0x1e   : > { %1042 = vst.msk [vmem:[#allocation2 + $0x48] sm:$0xff] %vm1029_vm1, %v1003_v56  ;;  %1043 = vst.msk [vmem:[#allocation2 + $0x50] sm:$0xff] %vm1029_vm1, %v1004_v57  ;;  %v976_v63 = vadd.f32 %v5086_v9, %v937_v58  ;;  %v939_v0 = vmul.f32 %v5075_v7, %v900_v52  ;;  %v940_v1 = vmul.f32 %v5075_v7, %v901_v53  ;;  %v910_v50 = vld [vmem:[%s5081_s13 + $0xb8] sm:$0xff]  ;;  %v5189_v53 = vld [vmem:[%s6353_s4 + $0x4] sm:$0x3] }
  0x1f   : > { %v941_v2 = vmul.f32 %v5075_v7, %v902_v54  ;;  %v1005_v11 = vmax.f32 %v973_v59, 0.0  ;;  %v1006_v12 = vmax.f32 %v974_v60, 0.0  ;;  %v1007_v13 = vmax.f32 %v975_v61, 0.0  ;;  %v911_v57 = vld [vmem:[%s5081_s13 + $0xc0] sm:$0xff] }
  0x20   : > { %v977_v14 = vadd.f32 %v5086_v9, %v938_v62  ;;  %v1008_v16 = vmax.f32 %v976_v63, 0.0  ;;  %v978_v17 = vadd.f32 %v5086_v9, %v939_v0  ;;  %v979_v18 = vadd.f32 %v5086_v9, %v940_v1  ;;  %v912_v62 = vld [vmem:[%s5081_s13 + $0xc8] sm:$0xff] }
  0x21   : > { %v980_v19 = vadd.f32 %v5086_v9, %v941_v2  ;;  %1044 = vst.msk [vmem:[#allocation2 + $0x58] sm:$0xff] %vm1029_vm1, %v1005_v11  ;;  %1045 = vst.msk [vmem:[#allocation2 + $0x60] sm:$0xff] %vm1029_vm1, %v1006_v12  ;;  %v942_v22 = vmul.f32 %v5075_v7, %v903_v5  ;;  %v943_v23 = vmul.f32 %v5075_v7, %v904_v8  ;;  %v280_v63 = vadd.s32 8, %v5102_v25 }
  0x22   : > { %1046 = vst.msk [vmem:[#allocation2 + $0x68] sm:$0xff] %vm1029_vm1, %v1007_v13  ;;  %v1009_v21 = vmax.f32 %v977_v14, 0.0  ;;  %v944_v24 = vmul.f32 %v5075_v7, %v905_v10  ;;  %v1151_v27 = vld [vmem:[#allocation2 + $0x18] sm:$0xff]  ;;  %v1152_v28 = vld [vmem:[#allocation2 + $0x20] sm:$0xff]  ;;  %1047 = vst.msk [vmem:[#allocation2 + $0x70] sm:$0xff] %vm1029_vm1, %v1008_v16  ;;  %v1010_v30 = vmax.f32 %v978_v17, 0.0  ;;  %v945_v33 = vmul.f32 %v5075_v7, %v906_v15 }
  0x23   : > { %v2278_v29 = vld [vmem:[#allocation2 + $0x28] sm:$0xff]  ;;  %v1011_v31 = vmax.f32 %v979_v18, 0.0  ;;  %v1012_v32 = vmax.f32 %v980_v19, 0.0  ;;  %v1182_v34 = vpack.c.bf16 %v1152_v28, %v1151_v27  ;;  %v2279_v35 = vld [vmem:[#allocation2 + $0x30] sm:$0xff]  ;;  %v981_v36 = vadd.f32 %v5086_v9, %v942_v22  ;;  %v914_v15 = vld [vmem:[%s5081_s13 + $0xd8] sm:$0xff] }
  0x24   : > { %1048 = vst.msk [vmem:[#allocation2 + $0x78] sm:$0xff] %vm1029_vm1, %v1009_v21  ;;  %v982_v37 = vadd.f32 %v5086_v9, %v943_v23  ;;  %v983_v38 = vadd.f32 %v5086_v9, %v944_v24  ;;  %v2309_v39 = vpack.c.bf16 %v2279_v35, %v2278_v29  ;;  %v1155_v41 = vld [vmem:[#allocation2 + $0x38] sm:$0xff]  ;;  %1049 = vst.msk [vmem:[#allocation2 + $0x80] sm:$0xff] %vm1029_vm1, %v1010_v30  ;;  %v1156_v6 = vld [vmem:[#allocation2 + $0x40] sm:$0xff]  ;;  %v322_v17 = vand.u32 15, %v280_v63 }
  0x25   : > { %1050 = vst.msk [vmem:[#allocation2 + $0x88] sm:$0xff] %vm1029_vm1, %v1011_v31  ;;  %1051 = vst.msk [vmem:[#allocation2 + $0x90] sm:$0xff] %vm1029_vm1, %v1012_v32  ;;  %v984_v43 = vadd.f32 %v5086_v9, %v945_v33  ;;  %v946_v45 = vmul.f32 %v5075_v7, %v907_v26  ;;  %4401 = vmatmul.mubr.msk.bf16.vlgmr.msra.gmra.mrb[0].mxu1 %vm1029_vm1, %v1182_v34  ;;  %4536 = vmatprep.mubr.msk.bf16.mxu0 %vm1029_vm1, %v1182_v34  ;;  %v1013_v46 = vmax.f32 %v981_v36, 0.0  ;;  %v2282_v54 = vld [vmem:[#allocation2 + $0x48] sm:$0xff]  ;;  %v2283_v55 = vld [vmem:[#allocation2 + $0x50] sm:$0xff] }
  0x26   : > { %v1014_v47 = vmax.f32 %v982_v37, 0.0  ;;  %v1015_v48 = vmax.f32 %v983_v38, 0.0  ;;  %4433 = vmatpush3.bf16.msra.mxu1 %v5096_v20  ;;  %4537 = vmatmul.mubr.msk.bf16.vlgmr.msra.gmra.mrb[0].mxu0 %vm1029_vm1, %v2309_v39  ;;  %v1184_v51 = vpack.c.bf16 %v1156_v6, %v1155_v41  ;;  %v947_v20 = vmul.f32 %v5075_v7, %v908_v44  ;;  %v913_v14 = vld [vmem:[%s5081_s13 + $0xd0] sm:$0xff]  ;;  %v915_v24 = vld [vmem:[%s5081_s13 + $0xe0] sm:$0xff]  ;;  %v916_v26 = vld [vmem:[%s5081_s13 + $0xe8] sm:$0xff] }
  0x27   : > { %v1016_v52 = vmax.f32 %v984_v43, 0.0  ;;  %4569 = vmatpush3.bf16.msra.mxu0 %v2701_v40  ;;  %4404 = vmatprep.mubr.msk.bf16.mxu1 %vm1029_vm1, %v2309_v39  ;;  %1052 = vst.msk [vmem:[#allocation2 + $0x98] sm:$0xff] %vm1029_vm1, %v1013_v46  ;;  %v985_v56 = vadd.f32 %v5086_v9, %v946_v45  ;;  %v948_v60 = vmul.f32 %v5075_v7, %v909_v49  ;;  %v282_v33 = vadd.s32 24, %v5102_v25  ;;  %v5242_v46 = vld [vmem:[#allocation2 + $0x21] sm:$0xff] }
  0x28   : > { %1053 = vst.msk [vmem:[#allocation2 + $0xa0] sm:$0xff] %vm1029_vm1, %v1014_v47  ;;  %1054 = vst.msk [vmem:[#allocation2 + $0xa8] sm:$0xff] %vm1029_vm1, %v1015_v48  ;;  %4540 = vmatprep.mubr.msk.bf16.mxu0 %vm1029_vm1, %v1184_v51  ;;  %v1159_v58 = vld [vmem:[#allocation2 + $0x58] sm:$0xff]  ;;  %v1160_v59 = vld [vmem:[#allocation2 + $0x60] sm:$0xff]  ;;  %4969 = vmatprep.subr.msk.bf16.mxu0 %vm1247_vm0, %v5175_v42  ;;  %v949_v61 = vmul.f32 %v5075_v7, %v910_v50  ;;  %v986_v0 = vadd.f32 %v5086_v9, %v947_v20  ;;  %vm792_vm2 = vcmp.le.s32.totalorder %v322_v17, 14 }
  0x29   : > { %1055 = vst.msk [vmem:[#allocation2 + $0xb0] sm:$0xff] %vm1029_vm1, %v1016_v52  ;;  %v1017_v1 = vmax.f32 %v985_v56, 0.0  ;;  %4964 = vmatprep.subr.msk.bf16.mxu1 %vm1247_vm0, %v5189_v53  ;;  %v2311_v2 = vpack.c.bf16 %v2283_v55, %v2282_v54  ;;  %v1186_v5 = vpack.c.bf16 %v1160_v59, %v1159_v58  ;;  %v987_v8 = vadd.f32 %v5086_v9, %v948_v60  ;;  %v2286_v27 = vld [vmem:[#allocation2 + $0x68] sm:$0xff]  ;;  %v2287_v28 = vld [vmem:[#allocation2 + $0x70] sm:$0xff]  ;;  %v5254_v55 = vld [vmem:[#allocation2 + $0x19] sm:$0xff] }
  0x2a   : > { %v1018_v10 = vmax.f32 %v986_v0, 0.0  ;;  %v988_v11 = vadd.f32 %v5086_v9, %v949_v61  ;;  %v950_v12 = vmul.f32 %v5075_v7, %v911_v57  ;;  %v951_v13 = vmul.f32 %v5075_v7, %v912_v62  ;;  %6422 = vst [vmem:[#allocation5_spill] sm:$0xff] %v5254_v55  ;;  %v5262_v60 = vld [vmem:[#allocation2 + $0x31] sm:$0xff]  ;;  %v5267_v62 = vld [vmem:[#allocation2 + $0x41] sm:$0xff] }
  0x2b   : > { %1056 = vst.msk [vmem:[#allocation2 + $0xb8] sm:$0xff] %vm1029_vm1, %v1017_v1  ;;  %v1019_v16 = vmax.f32 %v987_v8, 0.0  ;;  %v952_v22 = vmul.f32 %v5075_v7, %v913_v14  ;;  %v953_v23 = vmul.f32 %v5075_v7, %v914_v15  ;;  %v1163_v31 = vld [vmem:[#allocation2 + $0x78] sm:$0xff]  ;;  %v1164_v32 = vld [vmem:[#allocation2 + $0x80] sm:$0xff]  ;;  %v284_v36 = vadd.s32 40, %v5102_v25  ;;  %v5275_v8 = vld [vmem:[#allocation2 + $0x29] sm:$0xff] }
  0x2c   : > { %1057 = vst.msk [vmem:[#allocation2 + $0xc0] sm:$0xff] %vm1029_vm1, %v1018_v10  ;;  %v1020_v18 = vmax.f32 %v988_v11, 0.0  ;;  %v989_v19 = vadd.f32 %v5086_v9, %v950_v12  ;;  %v990_v21 = vadd.f32 %v5086_v9, %v951_v13  ;;  %v954_v37 = vmul.f32 %v5075_v7, %v915_v24  ;;  %v2291_v52 = vld [vmem:[#allocation2 + $0x90] sm:$0xff]  ;;  %v5280_v14 = vld [vmem:[#allocation2 + $0x39] sm:$0xff] }
  0x2d   : > { %4405 = vmatmul.mubr.msk.bf16.gmra.mrb[4].mxu1 %vm1029_vm1, %v1184_v51  ;;  %1058 = vst.msk [vmem:[#allocation2 + $0xc8] sm:$0xff] %vm1029_vm1, %v1019_v16  ;;  %v991_v34 = vadd.f32 %v5086_v9, %v952_v22  ;;  %v992_v35 = vadd.f32 %v5086_v9, %v953_v23  ;;  %v955_v38 = vmul.f32 %v5075_v7, %v916_v26  ;;  %v5240_v6 = vsel %vm792_vm2, 1.0, %v6356_v4  ;;  %v2290_v51 = vld [vmem:[#allocation2 + $0x88] sm:$0xff]  ;;  %v5288_v22 = vld [vmem:[#allocation2 + $0x51] sm:$0xff] }
  0x2e   : > { %4541 = vmatmul.mubr.msk.bf16.gmra.mrb[4].mxu0 %vm1029_vm1, %v2311_v2  ;;  %4408 = vmatprep.mubr.msk.bf16.mxu1 %vm1029_vm1, %v2311_v2  ;;  %1059 = vst.msk [vmem:[#allocation2 + $0xd0] sm:$0xff] %vm1029_vm1, %v1020_v18  ;;  %v1021_v29 = vmax.f32 %v989_v19, 0.0  ;;  %v1022_v30 = vmax.f32 %v990_v21, 0.0  ;;  %v2313_v39 = vpack.c.bf16 %v2287_v28, %v2286_v27  ;;  %v1188_v43 = vpack.c.bf16 %v1164_v32, %v1163_v31  ;;  %v1167_v1 = vld [vmem:[#allocation2 + $0x98] sm:$0xff]  ;;  %v5295_v27 = vld [vmem:[#allocation2 + $0x61] sm:$0xff] }
  0x2f   : > { %4544 = vmatprep.mubr.msk.bf16.mxu0 %vm1029_vm1, %v1186_v5  ;;  %v1023_v40 = vmax.f32 %v991_v34, 0.0  ;;  %v1024_v41 = vmax.f32 %v992_v35, 0.0  ;;  %v993_v44 = vadd.f32 %v5086_v9, %v954_v37  ;;  %v994_v45 = vadd.f32 %v5086_v9, %v955_v38  ;;  %6421 = vst [vmem:[#allocation4_spill] sm:$0xff] %v5240_v6  ;;  %v1168_v2 = vld [vmem:[#allocation2 + $0xa0] sm:$0xff]  ;;  %v1169_v10 = vld [vmem:[#allocation2 + $0xa8] sm:$0xff] }
  0x30   : > { %1060 = vst.msk [vmem:[#allocation2 + $0xd8] sm:$0xff] %vm1029_vm1, %v1021_v29  ;;  %1061 = vst.msk [vmem:[#allocation2 + $0xe0] sm:$0xff] %vm1029_vm1, %v1022_v30  ;;  %v336_v47 = vand.u32 15, %v282_v33  ;;  %v350_v48 = vand.u32 15, %v284_v36  ;;  %v2603_v54 = vmul.f32 %v5240_v6, %v5242_v46  ;;  %v286_v20 = vadd.s32 56, %v5102_v25  ;;  %v1170_v11 = vld [vmem:[#allocation2 + $0xb0] sm:$0xff] }
  0x31   : > { %1062 = vst.msk [vmem:[#allocation2 + $0xe8] sm:$0xff] %vm1029_vm1, %v1023_v40  ;;  %1063 = vst.msk [vmem:[#allocation2 + $0xf0] sm:$0xff] %vm1029_vm1, %v1024_v41  ;;  %v1025_v49 = vmax.f32 %v993_v44, 0.0  ;;  %v1026_v50 = vmax.f32 %v994_v45, 0.0  ;;  %v288_v56 = vadd.s32 72, %v5102_v25  ;;  %v2315_v57 = vpack.c.bf16 %v2291_v52, %v2290_v51  ;;  %v917_v29 = vld [vmem:[%s5081_s13 + $0xf0] sm:$0xff] }
  0x32   : > { %vm794_vm3 = vcmp.le.s32.totalorder %v336_v47, 14  ;;  %vm796_vm4 = vcmp.le.s32.totalorder %v350_v48, 14  ;;  %v2634_v58 = vpack.c.bf16 %v2603_v54, %v5254_v55  ;;  %v364_v63 = vand.u32 15, %v286_v20  ;;  %v5302_v30 = vld [vmem:[%s6353_s4 + $0xe] sm:$0x3]  ;;  %v1171_v31 = vld [vmem:[#allocation2 + $0xb8] sm:$0xff] }
  0x33   : > { %1064 = vst.msk [vmem:[#allocation2 + $0xf8] sm:$0xff] %vm1029_vm1, %v1025_v49  ;;  %1065 = vst.msk [vmem:[#allocation2 + $0x100] sm:$0xff] %vm1029_vm1, %v1026_v50  ;;  %v5260_v59 = vsel %vm794_vm3, 1.0, %v6356_v4  ;;  %v5265_v61 = vsel %vm796_vm4, 1.0, %v6356_v4  ;;  %v378_v0 = vand.u32 15, %v288_v56  ;;  %v290_v13 = vadd.s32 88, %v5102_v25 }
  0x34   : > { %6423 = vst [vmem:[#allocation6_spill] sm:$0xff] %v5260_v59  ;;  %6424 = vst [vmem:[#allocation7_spill] sm:$0xff] %v5265_v61  ;;  %v2607_v12 = vmul.f32 %v5265_v61, %v5267_v62  ;;  %vm798_vm5 = vcmp.le.s32.totalorder %v364_v63, 14  ;;  %v292_v15 = vadd.s32 104, %v5102_v25  ;;  %v1190_v16 = vpack.c.bf16 %v1168_v2, %v1167_v1  ;;  %v5310_v34 = vld [vmem:[#allocation2 + $0x49] sm:$0xff]  ;;  %v5314_v38 = vld [vmem:[#allocation2 + $0x59] sm:$0xff] }
  0x35   : > { %4409 = vmatmul.mubr.msk.bf16.gmra.mrb[8].mxu1 %vm1029_vm1, %v1186_v5  ;;  %v2605_v5 = vmul.f32 %v5260_v59, %v5262_v60  ;;  %vm800_vm6 = vcmp.le.s32.totalorder %v378_v0, 14  ;;  %v1191_v18 = vpack.c.bf16 %v1170_v11, %v1169_v10  ;;  %v5286_v21 = vsel %vm798_vm5, 1.0, %v6356_v4  ;;  %6427 = vst [vmem:[#allocation10_spill] sm:$0xff] %v5302_v30  ;;  %v1173_v35 = vld [vmem:[#allocation2 + $0xc8] sm:$0xff]  ;;  %v1174_v36 = vld [vmem:[#allocation2 + $0xd0] sm:$0xff]  ;;  %v918_v48 = vld [vmem:[%s5081_s13 + $0xf8] sm:$0xff]  ;;  %s6213_s13 = scalar_lea.vmem %s6355_s6, %s5070_s8 }
  0x36   : > { %4545 = vmatmul.mubr.msk.bf16.gmra.mrb[8].mxu0 %vm1029_vm1, %v2313_v39  ;;  %4412 = vmatprep.mubr.msk.bf16.mxu1 %vm1029_vm1, %v2313_v39  ;;  %v2636_v19 = vpack.c.bf16 %v2607_v12, %v5280_v14  ;;  %6425 = vst [vmem:[#allocation8_spill] sm:$0xff] %v5286_v21  ;;  %v392_v23 = vand.u32 15, %v290_v13  ;;  %v3027_v24 = vsel %vm1247_vm0, %v5175_v42, 0  ;;  %v5293_v26 = vsel %vm800_vm6, 1.0, %v6356_v4  ;;  %v1172_v42 = vld [vmem:[#allocation2 + $0xc0] sm:$0xff]  ;;  %v5326_v50 = vld [vmem:[#allocation2 + $0x71] sm:$0xff] }
  0x37   : > { %4548 = vmatprep.mubr.msk.bf16.mxu0 %vm1029_vm1, %v1188_v43  ;;  %v2635_v17 = vpack.c.bf16 %v2605_v5, %v5275_v8  ;;  %6426 = vst [vmem:[#allocation9_spill] sm:$0xff] %v5293_v26  ;;  %v406_v28 = vand.u32 15, %v292_v15  ;;  %v2609_v32 = vmul.f32 %v5286_v21, %v5288_v22  ;;  %v294_v33 = vadd.s32 120, %v5102_v25  ;;  %v5331_v52 = vld [vmem:[#allocation2 + $0x81] sm:$0xff]  ;;  %v1175_v1 = vld [vmem:[#allocation2 + $0xd8] sm:$0xff]  ;;  %v5342_v5 = vld [vmem:[#allocation2 + $0x69] sm:$0xff] }
  0x38   : > { %v2611_v37 = vmul.f32 %v5293_v26, %v5295_v27  ;;  %vm802_vm7 = vcmp.le.s32.totalorder %v392_v23, 14  ;;  %v296_v39 = vadd.s32 136, %v5102_v25  ;;  %v956_v40 = vmul.f32 %v5075_v7, %v917_v29  ;;  %v1176_v2 = vld [vmem:[#allocation2 + $0xe0] sm:$0xff]  ;;  %v1177_v13 = vld [vmem:[#allocation2 + $0xe8] sm:$0xff]  ;;  %v5491_v3 = vld [vmem:[#allocation2 + $0xd1] sm:$0xff] }
  0x39   : > { %vm804_vm8 = vcmp.le.s32.totalorder %v406_v28, 14  ;;  %v1192_v41 = vpack.c.bf16 %v1172_v42, %v1171_v31  ;;  %v1193_v44 = vpack.c.bf16 %v1174_v36, %v1173_v35  ;;  %v5322_v45 = vsel %vm802_vm7, 1.0, %v6356_v4  ;;  %v5349_v15 = vld [vmem:[#allocation2 + $0x79] sm:$0xff]  ;;  %v5362_v31 = vld [vmem:[#allocation2 + $0x91] sm:$0xff]  ;;  %v5509_v6 = vld [vmem:[#allocation2 + $0x47] sm:$0xff] }
  0x3a   : > { %6428 = vst [vmem:[#allocation11_spill] sm:$0xff] %v5322_v45  ;;  %v420_v47 = vand.u32 15, %v294_v33  ;;  %v2638_v49 = vpack.c.bf16 %v2611_v37, %v5314_v38  ;;  %v5329_v51 = vsel %vm804_vm8, 1.0, %v6356_v4  ;;  %v315_v54 = vand.u32 15, %v5102_v25  ;;  %v1068_v37 = vld [vmem:[#allocation2 + $0x7] sm:$0xff]  ;;  %v2597_v55 = vld [vmem:[#allocation2 + $0xf1] sm:$0xff] }
  0x3b   : > { %6429 = vst [vmem:[#allocation12_spill] sm:$0xff] %v5329_v51  ;;  %v281_v20 = vadd.s32 16, %v5102_v25  ;;  %v434_v56 = vand.u32 15, %v296_v39  ;;  %v283_v63 = vadd.s32 32, %v5102_v25  ;;  %v957_v0 = vmul.f32 %v5075_v7, %v918_v48  ;;  %v1178_v7 = vld [vmem:[#allocation2 + $0xf0] sm:$0xff] }
  0x3c   : > { %v2613_v10 = vmul.f32 %v5322_v45, %v5326_v50  ;;  %v2615_v11 = vmul.f32 %v5329_v51, %v5331_v52  ;;  %vm806_vm9 = vcmp.le.s32.totalorder %v420_v47, 14  ;;  %vm5351_vm10 = vcmp.ge.s32.totalorder %v315_v54, 1  ;;  %v5389_v54 = vld [vmem:[#allocation2 + $0x89] sm:$0xff] }
  0x3d   : > { %4413 = vmatmul.mubr.msk.bf16.gmra.mrb[12].mxu1 %vm1029_vm1, %v1188_v43  ;;  %v2637_v43 = vpack.c.bf16 %v2609_v32, %v5310_v34  ;;  %vm808_vm11 = vcmp.le.s32.totalorder %v434_v56, 14  ;;  %v1194_v28 = vpack.c.bf16 %v1176_v2, %v1175_v1  ;;  %v5360_v29 = vsel %vm806_vm9, 1.0, %v6356_v4  ;;  %v1180_v1 = vld [vmem:[#allocation2 + $0x100] sm:$0xff] }
  0x3e   : > { %4549 = vmatmul.mubr.msk.bf16.gmra.mrb[12].mxu0 %vm1029_vm1, %v2315_v57  ;;  %4416 = vmatprep.mubr.msk.bf16.mxu1 %vm1029_vm1, %v2315_v57  ;;  %v298_v57 = vadd.s32 152, %v5102_v25  ;;  %6432 = vst [vmem:[#allocation13_spill] sm:$0xff] %v5360_v29  ;;  %v343_v42 = vand.u32 15, %v283_v63  ;;  %v2639_v33 = vpack.c.bf16 %v2613_v10, %v5342_v5  ;;  %v1195_v35 = vpack.c.bf16 %v1178_v7, %v1177_v13  ;;  %v5405_v10 = vld [vmem:[#allocation2 + $0x17] sm:$0xff] }
  0x3f   : > { %4570 = vmatprep.mubr.msk.bf16.mxu0 %vm1029_vm1, %v2634_v58  ;;  %v995_v58 = vadd.f32 %v5086_v9, %v956_v40  ;;  %v2640_v36 = vpack.c.bf16 %v2615_v11, %v5349_v15  ;;  %v5376_v40 = vsel %vm808_vm11, 1.0, %v6356_v4  ;;  %v2617_v47 = vmul.f32 %v5360_v29, %v5362_v31  ;;  %v5417_v7 = vld [vmem:[#allocation2 + $0xb1] sm:$0xff] }
  0x40   : > { %v448_v23 = vand.u32 15, %v298_v57  ;;  %6435 = vst [vmem:[#allocation14_spill] sm:$0xff] %v5376_v40  ;;  %vm5392_vm14 = vcmp.ge.s32.totalorder %v343_v42, 1  ;;  %v289_v63 = vadd.s32 80, %v5102_v25  ;;  %v5458_v57 = vld [vmem:[#allocation2 + $0xa9] sm:$0xff] }
  0x41   : > { %v1027_v12 = vmax.f32 %v995_v58, 0.0  ;;  %v287_v58 = vadd.s32 64, %v5102_v25 }
  0x42   : > { %vm5384_vm13 = vcmp.le.s32.totalorder %v448_v23, 14  ;;  %v5426_v23 = vld [vmem:[#allocation2 + $0x27] sm:$0xff] }
  0x43   : > { %1066 = vst.msk [vmem:[#allocation2 + $0x108] sm:$0xff] %vm1029_vm1, %v1027_v12  ;;  %v5410_v12 = vld [vmem:[#allocation2 + $0x99] sm:$0xff]  ;;  %v5415_v13 = vsel %vm5384_vm13, 1.0, %v6356_v4 }
  0x44   : > { %6440 = vst [vmem:[#allocation15_spill] sm:$0xff] %v5415_v13 }
  0x45   : > { %4417 = vmatmul.mubr.msk.bf16.gmra.mrb[16].mxu1 %vm1029_vm1, %v1190_v16 }
  0x46   : > { %4571 = vmatmul.mubr.msk.bf16.vlgmr.msra.gmra.mrb[0].mxu0 %vm1029_vm1, %v2635_v17  ;;  %4420 = vmatprep.mubr.msk.bf16.mxu1 %vm1029_vm1, %v1191_v18  ;;  %v329_v17 = vand.u32 15, %v281_v20  ;;  %v285_v18 = vadd.s32 48, %v5102_v25  ;;  %v1069_v20 = vld [vmem:[#allocation2 + $0xf] sm:$0xff] }
  0x47   : > { %4603 = vmatpush3.bf16.msra.mxu0 %v3027_v24  ;;  %4574 = vmatprep.mubr.msk.bf16.mxu0 %vm1029_vm1, %v2636_v19  ;;  %v996_v19 = vadd.f32 %v5086_v9, %v957_v0  ;;  %v300_v24 = vadd.s32 168, %v5102_v25  ;;  %v5369_v9 = vsel %vm5351_vm10, 1.0, %v6356_v4  ;;  %v1179_v0 = vld [vmem:[#allocation2 + $0xf8] sm:$0xff] }
  0x48   : > { %4970 = vmatprep.subr.msk.bf16.mxu0 %vm1247_vm0, %v5302_v30  ;;  %vm5371_vm12 = vcmp.ge.s32.totalorder %v329_v17, 1  ;;  %v1100_v56 = vmul.f32 %v5369_v9, %v1068_v37  ;;  %v304_v17 = vadd.s32 200, %v5102_v25  ;;  %v5436_v37 = vmul.f32 %v5415_v13, %v5417_v7  ;;  %v5528_v30 = vld [vmem:[#allocation2 + $0xc9] sm:$0xff] }
  0x49   : > { %v1028_v32 = vmax.f32 %v996_v19, 0.0  ;;  %v5403_v2 = vsel %vm5371_vm12, 1.0, %v6356_v4  ;;  %v5424_v19 = vsel %vm5392_vm14, 1.0, %v6356_v4  ;;  %6459 = vst [vmem:[#allocation27_spill] sm:$0xff] %v5528_v30 }
  0x4a   : > { %6441 = vst [vmem:[#allocation16_spill] sm:$0xff] %v5424_v19  ;;  %v1132_v42 = vpack.c.bf16 %v1069_v20, %v1100_v56  ;;  %v490_v56 = vand.u32 15, %v304_v17 }
  0x4b   : > { %1067 = vst.msk [vmem:[#allocation2 + $0x110] sm:$0xff] %vm1029_vm1, %v1028_v32  ;;  %v371_v32 = vand.u32 15, %v287_v58  ;;  %v5460_v58 = vld [vmem:[#allocation2 + $0x2f] sm:$0xff] }
  0x4c   : > { %6448 = vst [vmem:[#allocation21_spill] sm:$0xff] %v5460_v58  ;;  %vm816_vm6 = vcmp.le.s32.totalorder %v490_v56, 14 }
  0x4d   : > { %4421 = vmatmul.mubr.msk.bf16.gmra.mrb[20].mxu1 %vm1029_vm1, %v1192_v41  ;;  %v5378_v41 = vld [vmem:[#allocation2 + $0xa1] sm:$0xff]  ;;  %vm5469_vm4 = vcmp.ge.s32.totalorder %v371_v32, 1 }
  0x4e   : > { %4575 = vmatmul.mubr.msk.bf16.gmra.mrb[4].mxu0 %vm1029_vm1, %v2637_v43  ;;  %4424 = vmatprep.mubr.msk.bf16.mxu1 %vm1029_vm1, %v1193_v44  ;;  %v357_v43 = vand.u32 15, %v285_v18  ;;  %v302_v44 = vadd.s32 184, %v5102_v25  ;;  %v2619_v11 = vmul.f32 %v5376_v40, %v5378_v41  ;;  %v2641_v18 = vpack.c.bf16 %v2617_v47, %v5389_v54 }
  0x4f   : > { %4578 = vmatprep.mubr.msk.bf16.mxu0 %vm1029_vm1, %v2638_v49  ;;  %v462_v49 = vand.u32 15, %v300_v24  ;;  %v306_v24 = vadd.s32 216, %v5102_v25  ;;  %v5447_v47 = vmul.f32 %v5424_v19, %v5426_v23  ;;  %v310_v19 = vadd.s32 248, %v5102_v25 }
  0x50   : > { %vm701_vm15 = vcmp.ge.s32.totalorder %v357_v43, 1  ;;  %v476_v16 = vand.u32 15, %v302_v44  ;;  %v5441_v43 = vld [vmem:[#allocation2 + $0x37] sm:$0xff]  ;;  %v5443_v44 = vld [vmem:[#allocation2 + $0x1f] sm:$0xff] }
  0x51   : > { %vm812_vm2 = vcmp.le.s32.totalorder %v462_v49, 14  ;;  %v5439_v39 = vsel %vm701_vm15, 1.0, %v6356_v4  ;;  %6444 = vst [vmem:[#allocation19_spill] sm:$0xff] %v5443_v44  ;;  %v5452_v49 = vld [vmem:[#allocation2 + $0xc1] sm:$0xff] }
  0x52   : > { %6443 = vst [vmem:[#allocation18_spill] sm:$0xff] %v5439_v39  ;;  %v5450_v48 = vsel %vm812_vm2, 1.0, %v6356_v4  ;;  %vm5454_vm3 = vcmp.le.s32.totalorder %v476_v16, 14  ;;  %v5482_v4 = vld [vmem:[#allocation2 + $0x3f] sm:$0xff] }
  0x53   : > { %6445 = vst [vmem:[#allocation20_spill] sm:$0xff] %v5450_v48  ;;  %6453 = vst [vmem:[#allocation22_spill] sm:$0xff] %v5482_v4  ;;  %v2623_v32 = vmul.f32 %v5450_v48, %v5452_v49 }
  0x55   : > { %4425 = vmatmul.mubr.msk.bf16.gmra.mrb[24].mxu1 %vm1029_vm1, %v1194_v28  ;;  %v5429_v28 = vpack.c.bf16 %v1180_v1, %v1179_v0  ;;  %v291_v0 = vadd.s32 96, %v5102_v25  ;;  %v5467_v1 = vmul.f32 %v5439_v39, %v5441_v43 }
  0x56   : > { %4579 = vmatmul.mubr.msk.bf16.gmra.mrb[8].mxu0 %vm1029_vm1, %v2639_v33  ;;  %4428 = vmatprep.mubr.msk.bf16.mxu1 %vm1029_vm1, %v1195_v35  ;;  %v385_v33 = vand.u32 15, %v289_v63  ;;  %v1102_v35 = vmul.f32 %v5403_v2, %v5405_v10  ;;  %v504_v63 = vand.u32 15, %v306_v24  ;;  %v1755_v24 = vsel %vm1247_vm0, %v5189_v53, 0 }
  0x57   : > { %4582 = vmatprep.mubr.msk.bf16.mxu0 %vm1029_vm1, %v2640_v36  ;;  %6442 = vst [vmem:[#allocation17_spill] sm:$0xff] %v5429_v28  ;;  %v2642_v36 = vpack.c.bf16 %v2619_v11, %v5410_v12  ;;  %v1134_v53 = vpack.c.bf16 %v5460_v58, %v5447_v47  ;;  %v399_v47 = vand.u32 15, %v291_v0  ;;  %v308_v11 = vadd.s32 232, %v5102_v25 }
  0x58   : > { %vm5473_vm5 = vcmp.ge.s32.totalorder %v385_v33, 1  ;;  %v1133_v17 = vpack.c.bf16 %v5443_v44, %v1102_v35  ;;  %v5502_v35 = vmul.f32 %v5260_v59, %v5242_v46  ;;  %vm818_vm7 = vcmp.le.s32.totalorder %v504_v63, 14  ;;  %v2595_v63 = vld [vmem:[#allocation2 + $0xe1] sm:$0xff] }
  0x59   : > { %v293_v0 = vadd.s32 112, %v5102_v25  ;;  %v5536_v46 = vmul.f32 %v5265_v61, %v5262_v60  ;;  %vm5551_vm8 = vcmp.ge.s32.totalorder %v399_v47, 1  ;;  %v5559_v61 = vmul.f32 %v5293_v26, %v5288_v22  ;;  %v5568_v47 = vld [vmem:[#allocation2 + $0x4f] sm:$0xff]  ;;  %v5576_v22 = vld [vmem:[%s6353_s4 + $0x6] sm:$0x3]  ;;  %v5590_v26 = vld [vmem:[#allocation2 + $0xd9] sm:$0xff] }
  0x5a   : > { %6456 = vst [vmem:[#allocation24_spill] sm:$0xff] %v5502_v35  ;;  %v5549_v35 = vmul.f32 %v5286_v21, %v5267_v62  ;;  %6464 = vst [vmem:[#allocation30_spill] sm:$0xff] %v5568_v47  ;;  %v5570_v21 = vld [vmem:[#allocation2 + $0x5f] sm:$0xff]  ;;  %v518_v60 = vand.u32 15, %v308_v11 }
  0x5b   : > { %6465 = vst [vmem:[#allocation31_spill] sm:$0xff] %v5570_v21  ;;  %6466 = vst [vmem:[#allocation32_spill] sm:$0xff] %v5590_v26 }
  0x5c   : > { %vm820_vm9 = vcmp.le.s32.totalorder %v518_v60, 14  ;;  %v5635_v60 = vld [vmem:[#allocation2 + $0xe9] sm:$0xff] }
  0x5d   : > { %4429 = vmatmul.mubr.msk.bf16.gmra.mrb[28].mxu1 %vm1029_vm1, %v5429_v28  ;;  %v6454_v28 = vmov 0.0   ;;  %6469 = vst [vmem:[#allocation33_spill] sm:$0xff] %v5635_v60 }
  0x5e   : > { %4583 = vmatmul.mubr.msk.bf16.gmra.mrb[12].mxu0 %vm1029_vm1, %v2641_v18  ;;  %4434 = vmatprep.mubr.msk.bf16.mxu1 %vm1029_vm1, %v1132_v42  ;;  %v5489_v33 = vsel %vm5454_vm3, 1.0, %v6454_v28  ;;  %v2643_v18 = vpack.c.bf16 %v5436_v37, %v5458_v57  ;;  %v5498_v42 = vld [vmem:[#allocation2 + $0xb9] sm:$0xff]  ;;  %v5507_v20 = vsel %vm5469_vm4, 1.0, %v6454_v28  ;;  %v5531_v58 = vsel %vm816_vm6, 1.0, %v6454_v28 }
  0x5f   : > { %6455 = vst [vmem:[#allocation23_spill] sm:$0xff] %v5489_v33  ;;  %4586 = vmatprep.mubr.msk.bf16.mxu0 %vm1029_vm1, %v2642_v36  ;;  %6457 = vst [vmem:[#allocation25_spill] sm:$0xff] %v5507_v20  ;;  %v5514_v36 = vsel %vm5473_vm5, 1.0, %v6454_v28  ;;  %v5516_v37 = vld [vmem:[#allocation2 + $0x57] sm:$0xff]  ;;  %v5522_v56 = vmul.f32 %v5489_v33, %v5491_v3  ;;  %v2644_v16 = vpack.c.bf16 %v2623_v32, %v5498_v42  ;;  %v5545_v32 = vsel %vm818_vm7, 1.0, %v6454_v28 }
  0x60   : > { %6458 = vst [vmem:[#allocation26_spill] sm:$0xff] %v5514_v36  ;;  %6460 = vst [vmem:[#allocation28_spill] sm:$0xff] %v5531_v58  ;;  %v1108_v39 = vmul.f32 %v5507_v20, %v5509_v6  ;;  %v5542_v59 = vmul.f32 %v5514_v36, %v5516_v37  ;;  %v5563_v36 = vmul.f32 %v5322_v45, %v5295_v27 }
  0x61   : > { %6461 = vst [vmem:[#allocation29_spill] sm:$0xff] %v5545_v32  ;;  %v2645_v62 = vpack.c.bf16 %v5522_v56, %v5528_v30  ;;  %v2627_v20 = vmul.f32 %v5531_v58, %v2595_v63  ;;  %v413_v56 = vand.u32 15, %v293_v0  ;;  %v295_v0 = vadd.s32 128, %v5102_v25 }
  0x62   : > { %v5602_v45 = vmul.f32 %v5329_v51, %v5326_v50  ;;  %v1137_v11 = vpack.c.bf16 %v5570_v21, %v5542_v59  ;;  %v5616_v27 = vmul.f32 %v5376_v40, %v5362_v31  ;;  %v532_v31 = vand.u32 15, %v310_v19 }
  0x63   : > { %v2646_v59 = vpack.c.bf16 %v2627_v20, %v5590_v26  ;;  %vm5629_vm10 = vcmp.ge.s32.totalorder %v413_v56, 1  ;;  %v427_v50 = vand.u32 15, %v295_v0  ;;  %v5645_v20 = vmul.f32 %v5489_v33, %v5452_v49  ;;  %v5663_v49 = vld [vmem:[#allocation2 + $0x6f] sm:$0xff] }
  0x64   : > { %v5648_v56 = vsel %vm820_vm9, 1.0, %v6454_v28  ;;  %v5654_v0 = vmul.f32 %v5531_v58, %v5491_v3  ;;  %6474 = vst [vmem:[#allocation37_spill] sm:$0xff] %v5663_v49  ;;  %v297_v33 = vadd.s32 144, %v5102_v25  ;;  %v5693_v51 = vmul.f32 %v5369_v9, %v5405_v10  ;;  %v6481_v10 = vld [vmem:[#allocation18_spill] sm:$0xff]  ;;  %v5751_v58 = vld [vmem:[#allocation2 + $0x7f] sm:$0xff] }
  0x65   : > { %4435 = vmatmul.mubr.msk.bf16.vlgmr.msra.gmra.mrb[0].mxu1 %vm1029_vm1, %v1133_v17  ;;  %v5582_v17 = vmul.f32 %v5545_v32, %v2597_v55  ;;  %6470 = vst [vmem:[#allocation34_spill] sm:$0xff] %v5648_v56  ;;  %v5671_v3 = vmul.f32 %v5648_v56, %v2597_v55  ;;  %vm711_vm11 = vcmp.ge.s32.totalorder %v427_v50, 1  ;;  %vm822_vm12 = vcmp.le.s32.totalorder %v532_v31, 14 }
  0x66   : > { %4467 = vmatpush3.bf16.msra.mxu1 %v1755_v24  ;;  %4587 = vmatmul.mubr.msk.bf16.gmra.mrb[16].mxu0 %vm1029_vm1, %v2643_v18  ;;  %v5595_v24 = vsel %vm5551_vm8, 1.0, %v6454_v28  ;;  %v5597_v18 = vld [vmem:[#allocation2 + $0x67] sm:$0xff]  ;;  %6476 = vst [vmem:[#allocation39_spill] sm:$0xff] %v5693_v51  ;;  %v299_v19 = vadd.s32 160, %v5102_v25  ;;  %v5716_v31 = vsel %vm711_vm11, 1.0, %v6454_v28  ;;  %v301_v26 = vadd.s32 176, %v5102_v25 }
  0x67   : > { %4438 = vmatprep.mubr.msk.bf16.mxu1 %vm1029_vm1, %v1134_v53  ;;  %4590 = vmatprep.mubr.msk.bf16.mxu0 %vm1029_vm1, %v2644_v16  ;;  %v5606_v53 = vmul.f32 %v5360_v29, %v5331_v52  ;;  %v1136_v16 = vpack.c.bf16 %v5568_v47, %v1108_v39  ;;  %v5624_v39 = vmul.f32 %v5415_v13, %v5378_v41  ;;  %v5650_v13 = vld [vmem:[#allocation2 + $0x101] sm:$0xff] }
  0x68   : > { %4965 = vmatprep.subr.msk.bf16.mxu1 %vm1247_vm0, %v5576_v22  ;;  %v1112_v29 = vmul.f32 %v5595_v24, %v5597_v18  ;;  %v5641_v41 = vmul.f32 %v5450_v48, %v5417_v7  ;;  %6471 = vst [vmem:[#allocation35_spill] sm:$0xff] %v5650_v13  ;;  %v5657_v52 = vmul.f32 %v5545_v32, %v2595_v63  ;;  %6475 = vst [vmem:[#allocation38_spill] sm:$0xff] %v5671_v3  ;;  %v5718_v32 = vld [vmem:[#allocation2 + $0x87] sm:$0xff] }
  0x69   : > { %v6473_v7 = vpack.c.bf16 %v5482_v4, %v5467_v1  ;;  %v2647_v1 = vpack.c.bf16 %v5582_v17, %v5635_v60  ;;  %v5680_v63 = vsel %vm5629_vm10, 1.0, %v6454_v28  ;;  %v2631_v55 = vmul.f32 %v5648_v56, %v5650_v13  ;;  %v5713_v56 = vld [vmem:[#allocation2 + $0x77] sm:$0xff]  ;;  %v6484_v50 = vld [vmem:[#allocation25_spill] sm:$0xff]  ;;  %v6486_v51 = vld [vmem:[#allocation26_spill] sm:$0xff] }
  0x6a   : > { %6472 = vst [vmem:[#allocation36_spill] sm:$0xff] %v5657_v52  ;;  %v1138_v17 = vpack.c.bf16 %v5663_v49, %v1112_v29  ;;  %v5711_v29 = vmul.f32 %v6481_v10, %v5509_v6  ;;  %v5724_v40 = vmul.f32 %v6484_v50, %v5516_v37  ;;  %v5728_v44 = vmul.f32 %v6486_v51, %v5597_v18  ;;  %v5734_v13 = vld [vmem:[#allocation2 + $0x111] sm:$0xff]  ;;  %v5764_v52 = vld [vmem:[#allocation2 + $0x109] sm:$0xff] }
  0x6b   : > { %v5732_v3 = vsel %vm822_vm12, 1.0, %v6454_v28  ;;  %6488 = vst [vmem:[#allocation42_spill] sm:$0xff] %v5734_v13  ;;  %v5757_v30 = vmul.f32 %v5595_v24, %v5713_v56  ;;  %6491 = vst [vmem:[#allocation45_spill] sm:$0xff] %v5764_v52 }
  0x6c   : > { %6482 = vst [vmem:[#allocation18_spill] sm:$0xff] %v5711_v29  ;;  %6485 = vst [vmem:[#allocation25_spill] sm:$0xff] %v5724_v40 }
  0x6d   : > { %4439 = vmatmul.mubr.msk.bf16.gmra.mrb[4].mxu1 %vm1029_vm1, %v6473_v7  ;;  %v441_v7 = vand.u32 15, %v297_v33  ;;  %v6483_v33 = vld [vmem:[#allocation21_spill] sm:$0xff]  ;;  %6487 = vst [vmem:[#allocation26_spill] sm:$0xff] %v5728_v44  ;;  %6489 = vst [vmem:[#allocation43_spill] sm:$0xff] %v5757_v30  ;;  %v469_v30 = vand.u32 15, %v301_v26 }
  0x6e   : > { %4591 = vmatmul.mubr.msk.bf16.gmra.mrb[20].mxu0 %vm1029_vm1, %v2645_v62  ;;  %4442 = vmatprep.mubr.msk.bf16.mxu1 %vm1029_vm1, %v1136_v16  ;;  %v5696_v16 = vld [vmem:[#allocation2 + $0xf9] sm:$0xff]  ;;  %v5788_v44 = vld [vmem:[#allocation2 + $0xa7] sm:$0xff] }
  0x6f   : > { %4594 = vmatprep.mubr.msk.bf16.mxu0 %vm1029_vm1, %v2646_v59  ;;  %6477 = vst [vmem:[#allocation40_spill] sm:$0xff] %v5696_v16  ;;  %v5701_v59 = vmul.f32 %v5403_v2, %v5426_v23  ;;  %v6479_v62 = vld [vmem:[#allocation16_spill] sm:$0xff]  ;;  %v2648_v60 = vpack.c.bf16 %v2631_v55, %v5696_v16  ;;  %v1114_v55 = vmul.f32 %v5680_v63, %v5713_v56  ;;  %vm713_vm13 = vcmp.ge.s32.totalorder %v441_v7, 1 }
  0x70   : > { %v5707_v48 = vmul.f32 %v6479_v62, %v5441_v43  ;;  %v1116_v16 = vmul.f32 %v5716_v31, %v5718_v32  ;;  %vm717_vm15 = vcmp.ge.s32.totalorder %v469_v30, 1 }
  0x71   : > { %6478 = vst [vmem:[#allocation41_spill] sm:$0xff] %v5701_v59  ;;  %v455_v59 = vand.u32 15, %v299_v19  ;;  %v2633_v19 = vmul.f32 %v5732_v3, %v5734_v13  ;;  %v303_v13 = vadd.s32 192, %v5102_v25 }
  0x72   : > { %6480 = vst [vmem:[#allocation16_spill] sm:$0xff] %v5707_v48  ;;  %v5780_v48 = vsel %vm713_vm13, 1.0, %v6454_v28 }
  0x73   : > { %vm715_vm14 = vcmp.ge.s32.totalorder %v455_v59, 1  ;;  %v2649_v29 = vpack.c.bf16 %v2633_v19, %v5764_v52  ;;  %v483_v40 = vand.u32 15, %v303_v13  ;;  %v5797_v19 = vld [vmem:[#allocation2 + $0x9f] sm:$0xff]  ;;  %v5807_v13 = vmul.f32 %v5780_v48, %v5788_v44  ;;  %v6494_v52 = vld [vmem:[#allocation10_spill] sm:$0xff] }
  0x74   : > { %v5786_v59 = vsel %vm715_vm14, 1.0, %v6454_v28 }
  0x75   : > { %4443 = vmatmul.mubr.msk.bf16.gmra.mrb[8].mxu1 %vm1029_vm1, %v1137_v11  ;;  %v5761_v11 = vmul.f32 %v5680_v63, %v5718_v32  ;;  %6493 = vst [vmem:[#allocation47_spill] sm:$0xff] %v5807_v13  ;;  %vm719_vm2 = vcmp.ge.s32.totalorder %v483_v40, 1 }
  0x76   : > { %4595 = vmatmul.mubr.msk.bf16.gmra.mrb[24].mxu0 %vm1029_vm1, %v2647_v1  ;;  %4446 = vmatprep.mubr.msk.bf16.mxu1 %vm1029_vm1, %v1138_v17  ;;  %v5766_v1 = vld [vmem:[#allocation2 + $0x8f] sm:$0xff]  ;;  %v2928_v17 = vmul.f32 %v5369_v9, %v5426_v23  ;;  %v5782_v9 = vld [vmem:[#allocation2 + $0x97] sm:$0xff] }
  0x77   : > { %6490 = vst [vmem:[#allocation44_spill] sm:$0xff] %v5761_v11  ;;  %4598 = vmatprep.mubr.msk.bf16.mxu0 %vm1029_vm1, %v2648_v60  ;;  %v1139_v60 = vpack.c.bf16 %v5751_v58, %v1114_v55  ;;  %v1140_v7 = vpack.c.bf16 %v5766_v1, %v1116_v16  ;;  %v1118_v55 = vmul.f32 %v5780_v48, %v5782_v9 }
  0x78   : > { %v2960_v23 = vpack.c.bf16 %v6483_v33, %v2928_v17  ;;  %v2930_v16 = vmul.f32 %v5403_v2, %v5441_v43  ;;  %v1120_v17 = vmul.f32 %v5786_v59, %v5788_v44  ;;  %v5803_v26 = vmul.f32 %v5716_v31, %v5782_v9  ;;  %v5810_v2 = vld [vmem:[#allocation2 + $0xaf] sm:$0xff] }
  0x79   : > { %v2932_v43 = vmul.f32 %v6479_v62, %v5509_v6  ;;  %v1141_v11 = vpack.c.bf16 %v5797_v19, %v1118_v55  ;;  %v5824_v33 = vsel %vm717_vm15, 1.0, %v6454_v28  ;;  %v5826_v6 = vld [vmem:[#allocation2 + $0xb7] sm:$0xff]  ;;  %v5830_v62 = vsel %vm719_vm2, 1.0, %v6454_v28 }
  0x7a   : > { %6492 = vst [vmem:[#allocation46_spill] sm:$0xff] %v5803_v26  ;;  %v1142_v30 = vpack.c.bf16 %v5810_v2, %v1120_v17  ;;  %v3321_v55 = vsel %vm1247_vm0, %v6494_v52, 0  ;;  %v2934_v17 = vmul.f32 %v6481_v10, %v5516_v37  ;;  %v5861_v10 = vld [vmem:[#allocation2 + $0xcf] sm:$0xff] }
  0x7b   : > { %v2962_v40 = vpack.c.bf16 %v5568_v47, %v2932_v43  ;;  %v5844_v43 = vld [vmem:[%s6353_s4 + $0x10] sm:$0x3] }
  0x7c   : > { %v2963_v47 = vpack.c.bf16 %v5570_v21, %v2934_v17  ;;  %v5888_v17 = vld [vmem:[#allocation2 + $0xdf] sm:$0xff]  ;;  %v1625_v21 = vld [vmem:[#allocation2 + $0x11] sm:$0xff] }
  0x7d   : > { %4447 = vmatmul.mubr.msk.bf16.gmra.mrb[12].mxu1 %vm1029_vm1, %v1139_v60  ;;  %v307_v60 = vadd.s32 224, %v5102_v25 }
  0x7e   : > { %4599 = vmatmul.mubr.msk.bf16.gmra.mrb[28].mxu0 %vm1029_vm1, %v2649_v29  ;;  %4450 = vmatprep.mubr.msk.bf16.mxu1 %vm1029_vm1, %v1140_v7  ;;  %v305_v29 = vadd.s32 208, %v5102_v25  ;;  %v5832_v7 = vld [vmem:[#allocation2 + $0xc7] sm:$0xff] }
  0x7f   : > { %4604 = vmatprep.mubr.msk.bf16.mxu0 %vm1029_vm1, %v2960_v23  ;;  %v2961_v23 = vpack.c.bf16 %v5482_v4, %v2930_v16  ;;  %v511_v13 = vand.u32 15, %v307_v60  ;;  %v1122_v16 = vmul.f32 %v5824_v33, %v5826_v6  ;;  %v1124_v52 = vmul.f32 %v5830_v62, %v5832_v7  ;;  %v1096_v4 = vld [vmem:[#allocation2 + $0xe7] sm:$0xff] }
  0x80   : > { %v497_v26 = vand.u32 15, %v305_v29  ;;  %v5848_v29 = vld [vmem:[#allocation2 + $0xbf] sm:$0xff]  ;;  %v5858_v37 = vmul.f32 %v5824_v33, %v5832_v7  ;;  %v2936_v60 = vmul.f32 %v6484_v50, %v5597_v18 }
  0x81   : > { %vm723_vm4 = vcmp.ge.s32.totalorder %v511_v13, 1 }
  0x82   : > { %6496 = vst [vmem:[#allocation48_spill] sm:$0xff] %v5858_v37  ;;  %vm721_vm3 = vcmp.ge.s32.totalorder %v497_v26, 1  ;;  %v1144_v26 = vpack.c.bf16 %v5861_v10, %v1124_v52  ;;  %v2964_v50 = vpack.c.bf16 %v5663_v49, %v2936_v60  ;;  %v5880_v13 = vsel %vm723_vm4, 1.0, %v6454_v28  ;;  %v1098_v49 = vld [vmem:[#allocation2 + $0xf7] sm:$0xff] }
  0x83   : > { %v5876_v18 = vsel %vm721_vm3, 1.0, %v6454_v28  ;;  %v1128_v52 = vmul.f32 %v5880_v13, %v1096_v4 }
  0x85   : > { %4451 = vmatmul.mubr.msk.bf16.gmra.mrb[16].mxu1 %vm1029_vm1, %v1141_v11  ;;  %v5854_v11 = vmul.f32 %v5786_v59, %v5826_v6 }
  0x86   : > { %4605 = vmatmul.mubr.msk.bf16.vlgmr.msra.gmra.mrb[0].mxu0 %vm1029_vm1, %v2961_v23  ;;  %4454 = vmatprep.mubr.msk.bf16.mxu1 %vm1029_vm1, %v1142_v30  ;;  %v309_v23 = vadd.s32 240, %v5102_v25  ;;  %v1094_v25 = vld [vmem:[#allocation2 + $0xd7] sm:$0xff] }
  0x87   : > { %6495 = vst [vmem:[#allocation10_spill] sm:$0xff] %v5854_v11  ;;  %4637 = vmatpush3.bf16.msra.mxu0 %v3321_v55  ;;  %4608 = vmatprep.mubr.msk.bf16.mxu0 %vm1029_vm1, %v2962_v40  ;;  %v1143_v40 = vpack.c.bf16 %v5848_v29, %v1122_v16  ;;  %v1126_v55 = vmul.f32 %v5876_v18, %v1094_v25 }
  0x88   : > { %4971 = vmatprep.subr.msk.bf16.mxu0 %vm1247_vm0, %v5844_v43  ;;  %v525_v30 = vand.u32 15, %v309_v23  ;;  %v2938_v16 = vmul.f32 %v6486_v51, %v5713_v56  ;;  %v5892_v60 = vmul.f32 %v5830_v62, %v1094_v25  ;;  %v5895_v23 = vmul.f32 %v5876_v18, %v1096_v4  ;;  %v2924_v56 = vld [vmem:[#allocation2 + $0x107] sm:$0xff] }
  0x8a   : > { %6497 = vst [vmem:[#allocation49_spill] sm:$0xff] %v5892_v60  ;;  %6498 = vst [vmem:[#allocation50_spill] sm:$0xff] %v5895_v23  ;;  %vm725_vm5 = vcmp.ge.s32.totalorder %v525_v30, 1  ;;  %v2965_v37 = vpack.c.bf16 %v5751_v58, %v2938_v16  ;;  %v6499_v16 = vld [vmem:[#allocation4_spill] sm:$0xff] }
  0x8d   : > { %4455 = vmatmul.mubr.msk.bf16.gmra.mrb[20].mxu1 %vm1029_vm1, %v1143_v40  ;;  %v5898_v40 = vld [vmem:[#allocation2 + $0xef] sm:$0xff] }
  0x8e   : > { %4609 = vmatmul.mubr.msk.bf16.gmra.mrb[4].mxu0 %vm1029_vm1, %v2963_v47  ;;  %4458 = vmatprep.mubr.msk.bf16.mxu1 %vm1029_vm1, %v1144_v26  ;;  %v2940_v47 = vmul.f32 %v5595_v24, %v5718_v32  ;;  %v1145_v26 = vpack.c.bf16 %v5888_v17, %v1126_v55  ;;  %v1146_v11 = vpack.c.bf16 %v5898_v40, %v1128_v52  ;;  %v5916_v55 = vld [vmem:[#allocation2 + $0xff] sm:$0xff] }
  0x8f   : > { %4612 = vmatprep.mubr.msk.bf16.mxu0 %vm1029_vm1, %v2964_v50  ;;  %v4071_v50 = vsel %vm725_vm5, 1.0, %v6454_v28  ;;  %v2942_v24 = vmul.f32 %v5680_v63, %v5782_v9  ;;  %v1657_v52 = vmul.f32 %v6499_v16, %v1625_v21  ;;  %v5920_v28 = vmul.f32 %v5880_v13, %v1098_v49  ;;  %v5927_v9 = vld [vmem:[#allocation2 + $0x10f] sm:$0xff] }
  0x90   : > { %v2966_v30 = vpack.c.bf16 %v5766_v1, %v2940_v47  ;;  %v1130_v32 = vmul.f32 %v4071_v50, %v1098_v49  ;;  %v5922_v47 = vmul.f32 %v4071_v50, %v2924_v56  ;;  %v2944_v63 = vmul.f32 %v5716_v31, %v5788_v44 }
  0x91   : > { %v2967_v51 = vpack.c.bf16 %v5797_v19, %v2942_v24  ;;  %v2946_v44 = vmul.f32 %v5780_v48, %v5826_v6  ;;  %v2948_v31 = vmul.f32 %v5786_v59, %v5832_v7  ;;  %v2950_v48 = vmul.f32 %v5824_v33, %v1094_v25  ;;  %v4981_v7 = vld [vmem:[%s6353_s4 + $0x8] sm:$0x3] }
  0x92   : > { %v1147_v21 = vpack.c.bf16 %v5916_v55, %v1130_v32  ;;  %v2968_v60 = vpack.c.bf16 %v5810_v2, %v2944_v63  ;;  %v2081_v32 = vsel %vm1247_vm0, %v5576_v22, 0  ;;  %v6503_v59 = vpack.c.bf16 %v5536_v46, %v5275_v8  ;;  %v3227_v63 = vld [vmem:[#allocation2 + $0x50] sm:$0xff] }
  0x93   : > { %v2970_v24 = vpack.c.bf16 %v5861_v10, %v2948_v31  ;;  %v2952_v22 = vmul.f32 %v5830_v62, %v1096_v4  ;;  %v2971_v6 = vpack.c.bf16 %v5888_v17, %v2950_v48  ;;  %v6504_v33 = vpack.c.bf16 %v5549_v35, %v5280_v14  ;;  %v2926_v14 = vld [vmem:[#allocation2 + $0x117] sm:$0xff]  ;;  %v3229_v31 = vld [vmem:[#allocation2 + $0x60] sm:$0xff] }
  0x94   : > { %v6505_v4 = vpack.c.bf16 %v5559_v61, %v5310_v34  ;;  %v2954_v8 = vmul.f32 %v5876_v18, %v1098_v49  ;;  %v2956_v46 = vmul.f32 %v5880_v13, %v2924_v56  ;;  %v6506_v35 = vpack.c.bf16 %v5563_v36, %v5314_v38  ;;  %v2927_v49 = vld [vmem:[#allocation2 + $0x11f] sm:$0xff]  ;;  %v3222_v18 = vld [vmem:[#allocation2 + $0x28] sm:$0xff]  ;;  %v3223_v13 = vld [vmem:[#allocation2 + $0x30] sm:$0xff] }
  0x95   : > { %4459 = vmatmul.mubr.msk.bf16.gmra.mrb[24].mxu1 %vm1029_vm1, %v1145_v26  ;;  %v1624_v26 = vld [vmem:[#allocation2 + $0x9] sm:$0xff]  ;;  %v6507_v61 = vpack.c.bf16 %v5602_v45, %v5342_v5  ;;  %v2958_v34 = vmul.f32 %v4071_v50, %v2926_v14  ;;  %v3254_v56 = vpack.c.bf16 %v3223_v13, %v3222_v18  ;;  %v6508_v38 = vpack.c.bf16 %v5606_v53, %v5349_v15  ;;  %v3224_v5 = vld [vmem:[#allocation2 + $0x38] sm:$0xff]  ;;  %v3225_v36 = vld [vmem:[#allocation2 + $0x40] sm:$0xff] }
  0x96   : > { %4613 = vmatmul.mubr.msk.bf16.gmra.mrb[8].mxu0 %vm1029_vm1, %v2965_v37  ;;  %4462 = vmatprep.mubr.msk.bf16.mxu1 %vm1029_vm1, %v1146_v11  ;;  %v2028_v11 = vpack.c.bf16 %v5916_v55, %v5920_v28  ;;  %v2029_v37 = vpack.c.bf16 %v5927_v9, %v5922_v47  ;;  %v1688_v23 = vpack.c.bf16 %v1657_v52, %v1624_v26  ;;  %v6500_v52 = vld [vmem:[#allocation24_spill] sm:$0xff]  ;;  %v6501_v26 = vld [vmem:[#allocation5_spill] sm:$0xff]  ;;  %v3226_v50 = vld [vmem:[#allocation2 + $0x48] sm:$0xff]  ;;  %v3647_v15 = vsel %vm1247_vm0, %v5844_v43, 0 }
  0x97   : > { %4616 = vmatprep.mubr.msk.bf16.mxu0 %vm1029_vm1, %v2966_v30  ;;  %v2969_v30 = vpack.c.bf16 %v5848_v29, %v2946_v44  ;;  %v2973_v62 = vpack.c.bf16 %v5916_v55, %v2954_v8  ;;  %v2974_v25 = vpack.c.bf16 %v5927_v9, %v2956_v46  ;;  %v6509_v45 = vpack.c.bf16 %v5616_v27, %v5389_v54  ;;  %v3228_v27 = vld [vmem:[#allocation2 + $0x58] sm:$0xff]  ;;  %v3237_v8 = vld [vmem:[#allocation2 + $0xa0] sm:$0xff]  ;;  %v3238_v46 = vld [vmem:[#allocation2 + $0xa8] sm:$0xff] }
  0x98   : > { %v3256_v44 = vpack.c.bf16 %v3227_v63, %v3226_v50  ;;  %v6510_v53 = vpack.c.bf16 %v5624_v39, %v5410_v12  ;;  %v6511_v54 = vpack.c.bf16 %v5641_v41, %v5458_v57  ;;  %v3257_v43 = vpack.c.bf16 %v3229_v31, %v3228_v27  ;;  %v6513_v57 = vld [vmem:[#allocation27_spill] sm:$0xff]  ;;  %v3232_v41 = vld [vmem:[#allocation2 + $0x78] sm:$0xff]  ;;  %v6527_v50 = vld [vmem:[#allocation41_spill] sm:$0xff] }
  0x99   : > { %v6512_v12 = vpack.c.bf16 %v5645_v20, %v5498_v42  ;;  %v6514_v39 = vpack.c.bf16 %v5654_v0, %v6513_v57  ;;  %v6518_v20 = vld [vmem:[#allocation35_spill] sm:$0xff]  ;;  %v6519_v0 = vld [vmem:[#allocation38_spill] sm:$0xff]  ;;  %v3240_v13 = vld [vmem:[#allocation2 + $0xb8] sm:$0xff] }
  0x9a   : > { %v3245_v27 = vld [vmem:[#allocation2 + $0xe0] sm:$0xff]  ;;  %v3246_v31 = vld [vmem:[#allocation2 + $0xe8] sm:$0xff]  ;;  %v6567_v55 = vld [vmem:[#allocation15_spill] sm:$0xff] }
  0x9b   : > { %v6569_v47 = vld [vmem:[#allocation23_spill] sm:$0xff] }
  0x9d   : > { %4463 = vmatmul.mubr.msk.bf16.gmra.mrb[28].mxu1 %vm1029_vm1, %v1147_v21  ;;  %v3255_v21 = vpack.c.bf16 %v3225_v36, %v3224_v5  ;;  %v6526_v36 = vld [vmem:[#allocation21_spill] sm:$0xff] }
  0x9e   : > { %4617 = vmatmul.mubr.msk.bf16.gmra.mrb[12].mxu0 %vm1029_vm1, %v2967_v51  ;;  %4468 = vmatprep.mubr.msk.bf16.mxu1 %vm1029_vm1, %v1688_v23  ;;  %v6502_v51 = vpack.c.bf16 %v6500_v52, %v6501_v26  ;;  %v2975_v23 = vpack.c.bf16 %v2927_v49, %v2958_v34  ;;  %v3233_v52 = vld [vmem:[#allocation2 + $0x80] sm:$0xff]  ;;  %v3234_v26 = vld [vmem:[#allocation2 + $0x88] sm:$0xff]  ;;  %v6523_v34 = vld [vmem:[#allocation19_spill] sm:$0xff]  ;;  %v6528_v63 = vpack.c.bf16 %v6526_v36, %v6527_v50 }
  0x9f   : > { %4620 = vmatprep.mubr.msk.bf16.mxu0 %vm1029_vm1, %v2968_v60  ;;  %v2972_v60 = vpack.c.bf16 %v5898_v40, %v2952_v22  ;;  %v3259_v48 = vpack.c.bf16 %v3233_v52, %v3232_v41  ;;  %v6515_v22 = vld [vmem:[#allocation36_spill] sm:$0xff]  ;;  %v6524_v49 = vld [vmem:[#allocation39_spill] sm:$0xff]  ;;  %v6537_v41 = vld [vmem:[#allocation25_spill] sm:$0xff] }
  0xa0   : > { %v6525_v18 = vpack.c.bf16 %v6523_v34, %v6524_v49  ;;  %v3519_v34 = vld [vmem:[#allocation2 + $0x41] sm:$0xff]  ;;  %v3521_v49 = vld [vmem:[#allocation2 + $0x51] sm:$0xff] }
  0xa1   : > { %v6550_v36 = vld [vmem:[#allocation7_spill] sm:$0xff] }
  0xa2   : > { %v3553_v50 = vmul.f32 %v6550_v36, %v3521_v49  ;;  %v3530_v49 = vld [vmem:[#allocation2 + $0x99] sm:$0xff] }
  0xa5   : > { %4469 = vmatmul.mubr.msk.bf16.vlgmr.msra.gmra.mrb[0].mxu1 %vm1029_vm1, %v6502_v51  ;;  %v3235_v51 = vld [vmem:[#allocation2 + $0x90] sm:$0xff] }
  0xa6   : > { %4501 = vmatpush3.bf16.msra.mxu1 %v2081_v32  ;;  %4621 = vmatmul.mubr.msk.bf16.gmra.mrb[16].mxu0 %vm1029_vm1, %v2969_v30  ;;  %v3230_v30 = vld [vmem:[#allocation2 + $0x68] sm:$0xff]  ;;  %v3231_v32 = vld [vmem:[#allocation2 + $0x70] sm:$0xff] }
  0xa7   : > { %4472 = vmatprep.mubr.msk.bf16.mxu1 %vm1029_vm1, %v6503_v59  ;;  %4624 = vmatprep.mubr.msk.bf16.mxu0 %vm1029_vm1, %v2970_v24  ;;  %v3258_v24 = vpack.c.bf16 %v3231_v32, %v3230_v30  ;;  %v3260_v59 = vpack.c.bf16 %v3235_v51, %v3234_v26  ;;  %v3247_v30 = vld [vmem:[#allocation2 + $0xf0] sm:$0xff]  ;;  %v3250_v26 = vld [vmem:[#allocation2 + $0x108] sm:$0xff] }
  0xa8   : > { %4967 = vmatprep.subr.msk.bf16.mxu1 %vm1247_vm0, %v4981_v7  ;;  %v6516_v7 = vld [vmem:[#allocation32_spill] sm:$0xff]  ;;  %v3251_v51 = vld [vmem:[#allocation2 + $0x110] sm:$0xff] }
  0xa9   : > { %v6517_v42 = vpack.c.bf16 %v6515_v22, %v6516_v7  ;;  %v6539_v22 = vld [vmem:[#allocation37_spill] sm:$0xff]  ;;  %v6540_v7 = vld [vmem:[#allocation26_spill] sm:$0xff] }
  0xad   : > { %4473 = vmatmul.mubr.msk.bf16.gmra.mrb[4].mxu1 %vm1029_vm1, %v6504_v33 }
  0xae   : > { %4625 = vmatmul.mubr.msk.bf16.gmra.mrb[20].mxu0 %vm1029_vm1, %v2971_v6  ;;  %4476 = vmatprep.mubr.msk.bf16.mxu1 %vm1029_vm1, %v6505_v4  ;;  %v1687_v6 = vmul.f32 %v5732_v3, %v6518_v20  ;;  %v3236_v4 = vld [vmem:[#allocation2 + $0x98] sm:$0xff] }
  0xaf   : > { %4628 = vmatprep.mubr.msk.bf16.mxu0 %vm1029_vm1, %v2972_v60  ;;  %v6520_v60 = vld [vmem:[#allocation33_spill] sm:$0xff] }
  0xb0   : > { %v6521_v33 = vpack.c.bf16 %v6519_v0, %v6520_v60  ;;  %v6543_v0 = vld [vmem:[#allocation43_spill] sm:$0xff] }
  0xb1   : > { %v6544_v60 = vpack.c.bf16 %v5751_v58, %v6543_v0  ;;  %v6547_v58 = vld [vmem:[#allocation46_spill] sm:$0xff]  ;;  %v6562_v0 = vld [vmem:[#allocation12_spill] sm:$0xff] }
  0xb5   : > { %4477 = vmatmul.mubr.msk.bf16.gmra.mrb[8].mxu1 %vm1029_vm1, %v6506_v35  ;;  %v6035_v35 = vpack.c.bf16 %v3237_v8, %v3236_v4  ;;  %v3253_v4 = vld [vmem:[#allocation2 + $0x120] sm:$0xff] }
  0xb6   : > { %4629 = vmatmul.mubr.msk.bf16.gmra.mrb[24].mxu0 %vm1029_vm1, %v2973_v62  ;;  %4480 = vmatprep.mubr.msk.bf16.mxu1 %vm1029_vm1, %v6507_v61  ;;  %v3239_v62 = vld [vmem:[#allocation2 + $0xb0] sm:$0xff] }
  0xb7   : > { %4632 = vmatprep.mubr.msk.bf16.mxu0 %vm1029_vm1, %v2974_v25  ;;  %v6522_v25 = vld [vmem:[#allocation40_spill] sm:$0xff]  ;;  %v6037_v61 = vpack.c.bf16 %v3239_v62, %v3238_v46  ;;  %v3516_v46 = vld [vmem:[#allocation2 + $0x29] sm:$0xff] }
  0xb8   : > { %v1703_v14 = vpack.c.bf16 %v1687_v6, %v6522_v25  ;;  %v6542_v6 = vld [vmem:[#allocation17_spill] sm:$0xff] }
  0xbd   : > { %4481 = vmatmul.mubr.msk.bf16.gmra.mrb[12].mxu1 %vm1029_vm1, %v6508_v38  ;;  %v3243_v38 = vld [vmem:[#allocation2 + $0xd0] sm:$0xff] }
  0xbe   : > { %4633 = vmatmul.mubr.msk.bf16.gmra.mrb[28].mxu0 %vm1029_vm1, %v2975_v23  ;;  %4484 = vmatprep.mubr.msk.bf16.mxu1 %vm1029_vm1, %v6509_v45  ;;  %v3241_v23 = vld [vmem:[#allocation2 + $0xc0] sm:$0xff] }
  0xbf   : > { %4638 = vmatprep.mubr.msk.bf16.mxu0 %vm1029_vm1, %v3254_v56  ;;  %v3242_v56 = vld [vmem:[#allocation2 + $0xc8] sm:$0xff]  ;;  %v6048_v45 = vpack.c.bf16 %v3241_v23, %v3240_v13  ;;  %v6548_v23 = vpack.c.bf16 %v5797_v19, %v6547_v58 }
  0xc0   : > { %v6050_v5 = vpack.c.bf16 %v3243_v38, %v3242_v56  ;;  %v6549_v56 = vld [vmem:[#allocation6_spill] sm:$0xff] }
  0xc1   : > { %v3551_v38 = vmul.f32 %v6549_v56, %v3519_v34  ;;  %v6553_v19 = vld [vmem:[#allocation10_spill] sm:$0xff] }
  0xc2   : > { %v3532_v58 = vld [vmem:[#allocation2 + $0xa9] sm:$0xff] }
  0xc5   : > { %4485 = vmatmul.mubr.msk.bf16.gmra.mrb[16].mxu1 %vm1029_vm1, %v6510_v53 }
  0xc6   : > { %4639 = vmatmul.mubr.msk.bf16.vlgmr.msra.gmra.mrb[0].mxu0 %vm1029_vm1, %v3255_v21  ;;  %4488 = vmatprep.mubr.msk.bf16.mxu1 %vm1029_vm1, %v6511_v54  ;;  %v6529_v21 = vld [vmem:[#allocation3_spill] sm:$0xff]  ;;  %v3244_v54 = vld [vmem:[#allocation2 + $0xd8] sm:$0xff] }
  0xc7   : > { %4671 = vmatpush3.bf16.msra.mxu0 %v3647_v15  ;;  %4642 = vmatprep.mubr.msk.bf16.mxu0 %vm1029_vm1, %v3256_v44  ;;  %v6530_v44 = vld [vmem:[#allocation22_spill] sm:$0xff]  ;;  %v6531_v15 = vld [vmem:[#allocation16_spill] sm:$0xff]  ;;  %v6065_v32 = vpack.c.bf16 %v3245_v27, %v3244_v54  ;;  %v6554_v27 = vpack.c.bf16 %v5848_v29, %v6553_v19  ;;  %v6559_v29 = vld [vmem:[#allocation49_spill] sm:$0xff] }
  0xc8   : > { %v6532_v53 = vpack.c.bf16 %v6530_v44, %v6531_v15  ;;  %v3525_v15 = vld [vmem:[#allocation2 + $0x71] sm:$0xff] }
  0xcd   : > { %4489 = vmatmul.mubr.msk.bf16.gmra.mrb[20].mxu1 %vm1029_vm1, %v6512_v12  ;;  %v6534_v12 = vld [vmem:[#allocation18_spill] sm:$0xff] }
  0xce   : > { %4643 = vmatmul.mubr.msk.bf16.gmra.mrb[4].mxu0 %vm1029_vm1, %v3257_v43  ;;  %4492 = vmatprep.mubr.msk.bf16.mxu1 %vm1029_vm1, %v6514_v39  ;;  %v6067_v43 = vpack.c.bf16 %v3247_v30, %v3246_v31  ;;  %v6536_v39 = vld [vmem:[#allocation31_spill] sm:$0xff]  ;;  %v6555_v31 = vld [vmem:[#allocation8_spill] sm:$0xff] }
  0xcf   : > { %4646 = vmatprep.mubr.msk.bf16.mxu0 %vm1029_vm1, %v3258_v24  ;;  %v6533_v24 = vld [vmem:[#allocation30_spill] sm:$0xff]  ;;  %v6538_v52 = vpack.c.bf16 %v6536_v39, %v6537_v41 }
  0xd0   : > { %v6535_v57 = vpack.c.bf16 %v6533_v24, %v6534_v12  ;;  %v3522_v24 = vld [vmem:[#allocation2 + $0x59] sm:$0xff]  ;;  %v3524_v39 = vld [vmem:[#allocation2 + $0x69] sm:$0xff] }
  0xd1   : > { %v6556_v12 = vld [vmem:[#allocation9_spill] sm:$0xff] }
  0xd5   : > { %4493 = vmatmul.mubr.msk.bf16.gmra.mrb[24].mxu1 %vm1029_vm1, %v6517_v42  ;;  %v6541_v42 = vpack.c.bf16 %v6539_v22, %v6540_v7  ;;  %v6560_v22 = vpack.c.bf16 %v5888_v17, %v6559_v29  ;;  %v6561_v7 = vld [vmem:[#allocation11_spill] sm:$0xff]  ;;  %v6565_v17 = vld [vmem:[#allocation13_spill] sm:$0xff] }
  0xd6   : > { %4647 = vmatmul.mubr.msk.bf16.gmra.mrb[8].mxu0 %vm1029_vm1, %v3259_v48  ;;  %4496 = vmatprep.mubr.msk.bf16.mxu1 %vm1029_vm1, %v6521_v33  ;;  %v6081_v48 = vpack.c.bf16 %v3251_v51, %v3250_v26  ;;  %v3252_v33 = vld [vmem:[#allocation2 + $0x118] sm:$0xff] }
  0xd7   : > { %4650 = vmatprep.mubr.msk.bf16.mxu0 %vm1029_vm1, %v3260_v59  ;;  %v3517_v59 = vld [vmem:[#allocation2 + $0x31] sm:$0xff]  ;;  %v3269_v62 = vpack.c.bf16 %v3253_v4, %v3252_v33  ;;  %v3528_v33 = vld [vmem:[#allocation2 + $0x89] sm:$0xff] }
  0xd8   : > { %v3549_v8 = vmul.f32 %v6499_v16, %v3517_v59  ;;  %v3518_v16 = vld [vmem:[#allocation2 + $0x39] sm:$0xff]  ;;  %v3529_v26 = vld [vmem:[#allocation2 + $0x91] sm:$0xff] }
  0xd9   : > { %v6557_v51 = vld [vmem:[#allocation48_spill] sm:$0xff] }
  0xda   : > { %v6558_v59 = vpack.c.bf16 %v5861_v10, %v6557_v51  ;;  %v3531_v10 = vld [vmem:[#allocation2 + $0xa1] sm:$0xff] }
  0xdb   : > { %v3563_v34 = vmul.f32 %v6565_v17, %v3531_v10  ;;  %v6204_v10 = vld [vmem:[%s6354_s5] ss:$0 sm:$0xff] }
  0xdd   : > { %4497 = vmatmul.mubr.msk.bf16.gmra.mrb[28].mxu1 %vm1029_vm1, %v1703_v14  ;;  %v3580_v14 = vpack.c.bf16 %v3549_v8, %v3516_v46  ;;  %v3533_v46 = vld [vmem:[#allocation2 + $0xb1] sm:$0xff] }
  0xde   : > { %4651 = vmatmul.mubr.msk.bf16.gmra.mrb[12].mxu0 %vm1029_vm1, %v6035_v35  ;;  %4502 = vmatprep.mubr.msk.bf16.mxu1 %vm1029_vm1, %v6525_v18  ;;  %v6545_v18 = vld [vmem:[#allocation44_spill] sm:$0xff] }
  0xdf   : > { %4654 = vmatprep.mubr.msk.bf16.mxu0 %vm1029_vm1, %v6037_v61  ;;  %v6546_v13 = vpack.c.bf16 %v5766_v1, %v6545_v18  ;;  %v3523_v1 = vld [vmem:[#allocation2 + $0x61] sm:$0xff] }
  0xe0   : > { %v3555_v30 = vmul.f32 %v6555_v31, %v3523_v1  ;;  %v6566_v18 = vld [vmem:[#allocation14_spill] sm:$0xff]  ;;  %v3541_v1 = vld [vmem:[#allocation2 + $0xf1] sm:$0xff]  ;;  %v2305_v31 = vld [vmem:[#allocation2 + $0x100] sm:$0xff] }
  0xe2   : > { %v3583_v41 = vpack.c.bf16 %v3555_v30, %v3522_v24  ;;  %v6572_v30 = vld [vmem:[#allocation42_spill] sm:$0xff] }
  0xe3   : > { %v6573_v24 = vld [vmem:[#allocation34_spill] sm:$0xff] }
  0xe5   : > { %4503 = vmatmul.mubr.msk.bf16.vlgmr.msra.gmra.mrb[0].mxu1 %vm1029_vm1, %v6528_v63  ;;  %v3520_v63 = vld [vmem:[#allocation2 + $0x49] sm:$0xff] }
  0xe6   : > { %4705 = vmatpush3.bf16.msra.mxu1 %v6529_v21  ;;  %4655 = vmatmul.mubr.msk.bf16.gmra.mrb[16].mxu0 %vm1029_vm1, %v6048_v45  ;;  %v3581_v21 = vpack.c.bf16 %v3551_v38, %v3518_v16  ;;  %v3582_v44 = vpack.c.bf16 %v3553_v50, %v3520_v63  ;;  %v3537_v38 = vld [vmem:[#allocation2 + $0xd1] sm:$0xff]  ;;  %v3536_v50 = vld [vmem:[#allocation2 + $0xc9] sm:$0xff] }
  0xe7   : > { %4506 = vmatprep.mubr.msk.bf16.mxu1 %vm1029_vm1, %v6532_v53  ;;  %4658 = vmatprep.mubr.msk.bf16.mxu0 %vm1029_vm1, %v6050_v5  ;;  %v6551_v53 = vld [vmem:[#allocation47_spill] sm:$0xff]  ;;  %v6568_v16 = vld [vmem:[#allocation20_spill] sm:$0xff] }
  0xe8   : > { %v6552_v54 = vpack.c.bf16 %v5810_v2, %v6551_v53  ;;  %v3527_v2 = vld [vmem:[#allocation2 + $0x81] sm:$0xff]  ;;  %v3569_v36 = vmul.f32 %v6568_v16, %v3537_v38  ;;  %v3540_v53 = vld [vmem:[#allocation2 + $0xe9] sm:$0xff] }
  0xed   : > { %4507 = vmatmul.mubr.msk.bf16.gmra.mrb[4].mxu1 %vm1029_vm1, %v6535_v57  ;;  %v3557_v57 = vmul.f32 %v6556_v12, %v3525_v15  ;;  %v3577_v12 = vmul.f32 %v6573_v24, %v6572_v30 }
  0xee   : > { %4659 = vmatmul.mubr.msk.bf16.gmra.mrb[20].mxu0 %vm1029_vm1, %v6065_v32  ;;  %4510 = vmatprep.mubr.msk.bf16.mxu1 %vm1029_vm1, %v6538_v52 }
  0xef   : > { %4662 = vmatprep.mubr.msk.bf16.mxu0 %vm1029_vm1, %v6067_v43  ;;  %v3584_v52 = vpack.c.bf16 %v3557_v57, %v3524_v39 }
  0xf5   : > { %4511 = vmatmul.mubr.msk.bf16.gmra.mrb[8].mxu1 %vm1029_vm1, %v6541_v42  ;;  %v3559_v42 = vmul.f32 %v6561_v7, %v3527_v2 }
  0xf6   : > { %4663 = vmatmul.mubr.msk.bf16.gmra.mrb[24].mxu0 %vm1029_vm1, %v6542_v6  ;;  %4514 = vmatprep.mubr.msk.bf16.mxu1 %vm1029_vm1, %v6544_v60  ;;  %v3526_v6 = vld [vmem:[#allocation2 + $0x79] sm:$0xff]  ;;  %v3561_v60 = vmul.f32 %v6562_v0, %v3529_v26 }
  0xf7   : > { %4666 = vmatprep.mubr.msk.bf16.mxu0 %vm1029_vm1, %v6081_v48  ;;  %v3585_v4 = vpack.c.bf16 %v3559_v42, %v3526_v6 }
  0xf8   : > { %v3586_v8 = vpack.c.bf16 %v3561_v60, %v3528_v33 }
  0xfd   : > { %4515 = vmatmul.mubr.msk.bf16.gmra.mrb[12].mxu1 %vm1029_vm1, %v6546_v13  ;;  %v3565_v13 = vmul.f32 %v6566_v18, %v3533_v46  ;;  %v3881_v18 = vld [vmem:[%s6199_s7] sm:$0xff] }
  0xfe   : > { %4667 = vmatmul.mubr.msk.bf16.gmra.mrb[28].mxu0 %vm1029_vm1, %v3269_v62  ;;  %4518 = vmatprep.mubr.msk.bf16.mxu1 %vm1029_vm1, %v6548_v23  ;;  %v6563_v62 = vld [vmem:[#allocation50_spill] sm:$0xff]  ;;  %v3587_v23 = vpack.c.bf16 %v3563_v34, %v3530_v49 }
  0xff   : > { %4672 = vmatprep.mubr.msk.bf16.mxu0 %vm1029_vm1, %v3580_v14  ;;  %v6564_v14 = vpack.c.bf16 %v5898_v40, %v6563_v62  ;;  %v3588_v56 = vpack.c.bf16 %v3565_v13, %v3532_v58  ;;  %v3535_v40 = vld [vmem:[#allocation2 + $0xc1] sm:$0xff] }
 0x100   : > { %v3567_v28 = vmul.f32 %v6567_v55, %v3535_v40 }
 0x105   : > { %4519 = vmatmul.mubr.msk.bf16.gmra.mrb[16].mxu1 %vm1029_vm1, %v6552_v54 }
 0x106   : > { %4673 = vmatmul.mubr.msk.bf16.vlgmr.msra.gmra.mrb[0].mxu0 %vm1029_vm1, %v3581_v21  ;;  %4522 = vmatprep.mubr.msk.bf16.mxu1 %vm1029_vm1, %v6554_v27  ;;  %v3590_v21 = vpack.c.bf16 %v3569_v36, %v3536_v50  ;;  %v2304_v27 = vld [vmem:[#allocation2 + $0xf8] sm:$0xff] }
 0x107   : > { %4676 = vmatprep.mubr.msk.bf16.mxu0 %vm1029_vm1, %v3582_v44  ;;  %v3539_v44 = vld [vmem:[#allocation2 + $0xe1] sm:$0xff]  ;;  %v2322_v39 = vpack.c.bf16 %v2305_v31, %v2304_v27 }
 0x108   : > { %v3571_v9 = vmul.f32 %v6569_v47, %v3539_v44  ;;  %v3886_v31 = vld [vmem:[%s6199_s7 + $0x28] sm:$0xff] }
 0x10d   : > { %4523 = vmatmul.mubr.msk.bf16.gmra.mrb[20].mxu1 %vm1029_vm1, %v6558_v59 }
 0x10e   : > { %4677 = vmatmul.mubr.msk.bf16.gmra.mrb[4].mxu0 %vm1029_vm1, %v3583_v41  ;;  %4526 = vmatprep.mubr.msk.bf16.mxu1 %vm1029_vm1, %v6560_v22  ;;  %v6574_v41 = vld [vmem:[#allocation45_spill] sm:$0xff] }
 0x10f   : > { %4680 = vmatprep.mubr.msk.bf16.mxu0 %vm1029_vm1, %v3584_v52  ;;  %v3547_v52 = vld [vmem:[#allocation2 + $0x121] sm:$0xff] }
 0x115   : > { %4527 = vmatmul.mubr.msk.bf16.gmra.mrb[24].mxu1 %vm1029_vm1, %v6564_v14  ;;  %v3883_v14 = vld [vmem:[%s6199_s7 + $0x10] sm:$0xff] }
 0x116   : > { %4681 = vmatmul.mubr.msk.bf16.gmra.mrb[8].mxu0 %vm1029_vm1, %v3585_v4  ;;  %4530 = vmatprep.mubr.msk.bf16.mxu1 %vm1029_vm1, %v2028_v11  ;;  %v3534_v11 = vld [vmem:[#allocation2 + $0xb9] sm:$0xff] }
 0x117   : > { %4684 = vmatprep.mubr.msk.bf16.mxu0 %vm1029_vm1, %v3586_v8  ;;  %v3589_v63 = vpack.c.bf16 %v3567_v28, %v3534_v11  ;;  %v3882_v28 = vld [vmem:[%s6199_s7 + $0x8] sm:$0xff] }
 0x11d   : > { %4531 = vmatmul.mubr.msk.bf16.gmra.mrb[28].mxu1 %vm1029_vm1, %v2029_v37  ;;  %v3538_v37 = vld [vmem:[#allocation2 + $0xd9] sm:$0xff] }
 0x11e   : > { %4685 = vmatmul.mubr.msk.bf16.gmra.mrb[12].mxu0 %vm1029_vm1, %v3587_v23  ;;  %4552 = vmatprep.mubr.msk.bf16.mxu1 %vm1029_vm1, %v6035_v35  ;;  %v6570_v35 = vld [vmem:[#allocation28_spill] sm:$0xff]  ;;  %v3591_v54 = vpack.c.bf16 %v3571_v9, %v3538_v37 }
 0x11f   : > { %4688 = vmatprep.mubr.msk.bf16.mxu0 %vm1029_vm1, %v3588_v56  ;;  %v3573_v15 = vmul.f32 %v6570_v35, %v3541_v1  ;;  %v3884_v56 = vld [vmem:[%s6199_s7 + $0x18] sm:$0xff]  ;;  %v3887_v1 = vld [vmem:[%s6199_s7 + $0x30] sm:$0xff]  ;;  %v3885_v35 = vld [vmem:[%s6199_s7 + $0x20] sm:$0xff] }
 0x121   : > { %v3592_v19 = vpack.c.bf16 %v3573_v15, %v3540_v53 }
 0x125   : > { %4553 = vmatmul.mubr.msk.bf16.vlgmr.msra.gmra.mrb[16].mxu1 %vm1029_vm1, %v6037_v61  ;;  %v6571_v61 = vld [vmem:[#allocation29_spill] sm:$0xff] }
 0x126   : > { %4689 = vmatmul.mubr.msk.bf16.gmra.mrb[16].mxu0 %vm1029_vm1, %v3589_v63  ;;  %4556 = vmatprep.mubr.msk.bf16.mxu1 %vm1029_vm1, %v6048_v45  ;;  %v3575_v45 = vmul.f32 %v6571_v61, %v6518_v20  ;;  %v3579_v20 = vmul.f32 %v5732_v3, %v3547_v52  ;;  %v3891_v52 = vld [vmem:[%s6199_s7 + $0x50] sm:$0xff] }
 0x127   : > { %4692 = vmatprep.mubr.msk.bf16.mxu0 %vm1029_vm1, %v3590_v21 }
 0x128   : > { %v3593_v57 = vpack.c.bf16 %v3575_v45, %v6522_v25 }
 0x12d   : > { %4557 = vmatmul.mubr.msk.bf16.gmra.mrb[20].mxu1 %vm1029_vm1, %v6050_v5  ;;  %v3594_v5 = vpack.c.bf16 %v3577_v12, %v6574_v41 }
 0x12e   : > { %4693 = vmatmul.mubr.msk.bf16.gmra.mrb[20].mxu0 %vm1029_vm1, %v3591_v54  ;;  %4560 = vmatprep.mubr.msk.bf16.mxu1 %vm1029_vm1, %v6065_v32  ;;  %v3546_v32 = vld [vmem:[#allocation2 + $0x119] sm:$0xff] }
 0x12f   : > { %4696 = vmatprep.mubr.msk.bf16.mxu0 %vm1029_vm1, %v3592_v19  ;;  %v3595_v2 = vpack.c.bf16 %v3579_v20, %v3546_v32  ;;  %v3888_v19 = vld [vmem:[%s6199_s7 + $0x38] sm:$0xff] }
 0x135   : > { %4561 = vmatmul.mubr.msk.bf16.gmra.mrb[24].mxu1 %vm1029_vm1, %v6067_v43 }
 0x136   : > { %4697 = vmatmul.mubr.msk.bf16.gmra.mrb[24].mxu0 %vm1029_vm1, %v3593_v57  ;;  %4564 = vmatprep.mubr.msk.bf16.mxu1 %vm1029_vm1, %v2322_v39 }
 0x137   : > { %4700 = vmatprep.mubr.msk.bf16.mxu0 %vm1029_vm1, %v3594_v5 }
 0x13d   : > { %4565 = vmatmul.mubr.msk.bf16.gmra.mrb[28].mxu1 %vm1029_vm1, %v6081_v48 }
 0x13e   : > { %4701 = vmatmul.mubr.msk.bf16.gmra.mrb[28].mxu0 %vm1029_vm1, %v3595_v2 }
 0x1b8   : > { %v4504_v25 = vpop.f32.mrb[0].mxu1 }
 0x1b9   : > { %v2117_v26 = vpop.f32.mrb[1].mxu1 }
 0x1ba   : > { %v4505_v51 = vpop.f32.mrb[2].mxu1 }
 0x1bb   : > { %v2120_v43 = vpop.f32.mrb[3].mxu1 }
 0x1c0   : > { %v4508_v59 = vpop.f32.mrb[4].mxu1 }
 0x1c1   : > { %v2133_v29 = vpop.f32.mrb[5].mxu1 }
 0x1c2   : > { %v4509_v22 = vpop.f32.mrb[6].mxu1 }
 0x1c3   : > { %v2136_v7 = vpop.f32.mrb[7].mxu1 }
 0x1c8   : > { %v4512_v42 = vpop.f32.mrb[8].mxu1 }
 0x1c9   : > { %v2149_v3 = vpop.f32.mrb[9].mxu1 }
 0x1ca   : > { %v6183_v6 = vpop.f32.mrb[10].mxu1 }
 0x1cb   : > { %v6185_v0 = vpop.f32.mrb[11].mxu1 }
 0x1d0   : > { %v6187_v60 = vpop.f32.mrb[12].mxu1 }
 0x1d1   : > { %v6189_v48 = vpop.f32.mrb[13].mxu1 }
 0x1d2   : > { %v6191_v33 = vpop.f32.mrb[14].mxu1 }
 0x1d3   : > { %v6193_v4 = vpop.f32.mrb[15].mxu1 }
 0x1d9   : > { %v4674_v8 = vpop.f32.mrb[0].mxu0 }
 0x1da   : > { %v4706_v46 = vadd.f32 %v4674_v8, %v4504_v25  ;;  %v3683_v62 = vpop.f32.mrb[1].mxu0  ;;  %v3889_v25 = vld [vmem:[%s6199_s7 + $0x40] sm:$0xff] }
 0x1db   : > { %v4707_v17 = vadd.f32 %v3683_v62, %v2117_v26  ;;  %v4675_v34 = vpop.f32.mrb[2].mxu0 }
 0x1dc   : > { %v3851_v49 = vadd.f32 %v4706_v46, %v6204_v10  ;;  %v4708_v13 = vadd.f32 %v4675_v34, %v4505_v51  ;;  %v3686_v58 = vpop.f32.mrb[3].mxu0 }
 0x1dd   : > { %v3849_v23 = vadd.f32 %v4707_v17, %v6204_v10  ;;  %v4709_v40 = vadd.f32 %v3686_v58, %v2120_v43  ;;  %v3895_v17 = vld [vmem:[%s6199_s7 + $0x70] sm:$0xff] }
 0x1de   : > { %v3915_v38 = vadd.f32 %v3883_v14, %v3851_v49  ;;  %v3852_v55 = vadd.f32 %v4708_v13, %v6204_v10  ;;  %v3893_v13 = vld [vmem:[%s6199_s7 + $0x60] sm:$0xff] }
 0x1df   : > { %v3913_v11 = vadd.f32 %v3881_v18, %v3849_v23  ;;  %v3850_v16 = vadd.f32 %v4709_v40, %v6204_v10  ;;  %v3896_v40 = vld [vmem:[%s6199_s7 + $0x78] sm:$0xff] }
 0x1e0   : > { %3947 = vst.msk [vmem:[%s6213_s13 + $0x10] sm:$0xff] %vm1029_vm1, %v3915_v38  ;;  %v3916_v36 = vadd.f32 %v3884_v56, %v3852_v55 }
 0x1e1   : > { %3945 = vst.msk [vmem:[%s6213_s13] sm:$0xff] %vm1029_vm1, %v3913_v11  ;;  %v3914_v50 = vadd.f32 %v3882_v28, %v3850_v16  ;;  %v4678_v63 = vpop.f32.mrb[4].mxu0 }
 0x1e2   : > { %3948 = vst.msk [vmem:[%s6213_s13 + $0x18] sm:$0xff] %vm1029_vm1, %v3916_v36  ;;  %v4710_v21 = vadd.f32 %v4678_v63, %v4508_v59  ;;  %v3699_v44 = vpop.f32.mrb[5].mxu0  ;;  %v3892_v59 = vld [vmem:[%s6199_s7 + $0x58] sm:$0xff] }
 0x1e3   : > { %3946 = vst.msk [vmem:[%s6213_s13 + $0x8] sm:$0xff] %vm1029_vm1, %v3914_v50  ;;  %v4711_v47 = vadd.f32 %v3699_v44, %v2133_v29  ;;  %v4679_v9 = vpop.f32.mrb[6].mxu0 }
 0x1e4   : > { %v3855_v37 = vadd.f32 %v4710_v21, %v6204_v10  ;;  %v4712_v15 = vadd.f32 %v4679_v9, %v4509_v22  ;;  %v3702_v53 = vpop.f32.mrb[7].mxu0 }
 0x1e5   : > { %v3853_v54 = vadd.f32 %v4711_v47, %v6204_v10  ;;  %v4713_v61 = vadd.f32 %v3702_v53, %v2136_v7 }
 0x1e6   : > { %v3919_v45 = vadd.f32 %v3887_v1, %v3855_v37  ;;  %v3856_v27 = vadd.f32 %v4712_v15, %v6204_v10  ;;  %v3899_v1 = vld [vmem:[%s6199_s7 + $0x90] sm:$0xff]  ;;  %v3897_v15 = vld [vmem:[%s6199_s7 + $0x80] sm:$0xff] }
 0x1e7   : > { %v3917_v30 = vadd.f32 %v3885_v35, %v3853_v54  ;;  %v3854_v24 = vadd.f32 %v4713_v61, %v6204_v10  ;;  %v3900_v61 = vld [vmem:[%s6199_s7 + $0x98] sm:$0xff] }
 0x1e8   : > { %3951 = vst.msk [vmem:[%s6213_s13 + $0x30] sm:$0xff] %vm1029_vm1, %v3919_v45  ;;  %v3920_v12 = vadd.f32 %v3888_v19, %v3856_v27 }
 0x1e9   : > { %3949 = vst.msk [vmem:[%s6213_s13 + $0x20] sm:$0xff] %vm1029_vm1, %v3917_v30  ;;  %v3918_v57 = vadd.f32 %v3886_v31, %v3854_v24  ;;  %v4682_v39 = vpop.f32.mrb[8].mxu0  ;;  %v3898_v30 = vld [vmem:[%s6199_s7 + $0x88] sm:$0xff] }
 0x1ea   : > { %3952 = vst.msk [vmem:[%s6213_s13 + $0x38] sm:$0xff] %vm1029_vm1, %v3920_v12  ;;  %v4714_v41 = vadd.f32 %v4682_v39, %v4512_v42  ;;  %v3715_v5 = vpop.f32.mrb[9].mxu0  ;;  %v3890_v42 = vld [vmem:[%s6199_s7 + $0x48] sm:$0xff] }
 0x1eb   : > { %3950 = vst.msk [vmem:[%s6213_s13 + $0x28] sm:$0xff] %vm1029_vm1, %v3918_v57  ;;  %v4715_v20 = vadd.f32 %v3715_v5, %v2149_v3  ;;  %v4683_v32 = vpop.f32.mrb[10].mxu0 }
 0x1ec   : > { %v3859_v2 = vadd.f32 %v4714_v41, %v6204_v10  ;;  %v4716_v26 = vadd.f32 %v4683_v32, %v6183_v6  ;;  %v3718_v51 = vpop.f32.mrb[11].mxu0 }
 0x1ed   : > { %v3857_v43 = vadd.f32 %v4715_v20, %v6204_v10  ;;  %v4717_v29 = vadd.f32 %v3718_v51, %v6185_v0 }
 0x1ee   : > { %v3923_v22 = vadd.f32 %v3891_v52, %v3859_v2  ;;  %v3860_v7 = vadd.f32 %v4716_v26, %v6204_v10 }
 0x1ef   : > { %v3921_v3 = vadd.f32 %v3889_v25, %v3857_v43  ;;  %v3858_v8 = vadd.f32 %v4717_v29, %v6204_v10  ;;  %v3903_v25 = vld [vmem:[%s6199_s7 + $0xb0] sm:$0xff]  ;;  %v3901_v29 = vld [vmem:[%s6199_s7 + $0xa0] sm:$0xff] }
 0x1f0   : > { %3955 = vst.msk [vmem:[%s6213_s13 + $0x50] sm:$0xff] %vm1029_vm1, %v3923_v22  ;;  %v3924_v46 = vadd.f32 %v3892_v59, %v3860_v7 }
 0x1f1   : > { %3953 = vst.msk [vmem:[%s6213_s13 + $0x40] sm:$0xff] %vm1029_vm1, %v3921_v3  ;;  %v3922_v6 = vadd.f32 %v3890_v42, %v3858_v8  ;;  %v4686_v62 = vpop.f32.mrb[12].mxu0  ;;  %v3904_v3 = vld [vmem:[%s6199_s7 + $0xb8] sm:$0xff] }
 0x1f2   : > { %3956 = vst.msk [vmem:[%s6213_s13 + $0x58] sm:$0xff] %vm1029_vm1, %v3924_v46  ;;  %v4718_v0 = vadd.f32 %v4686_v62, %v6187_v60  ;;  %v3731_v14 = vpop.f32.mrb[13].mxu0  ;;  %v3902_v62 = vld [vmem:[%s6199_s7 + $0xa8] sm:$0xff] }
 0x1f3   : > { %3954 = vst.msk [vmem:[%s6213_s13 + $0x48] sm:$0xff] %vm1029_vm1, %v3922_v6  ;;  %v4719_v34 = vadd.f32 %v3731_v14, %v6189_v48  ;;  %v4687_v49 = vpop.f32.mrb[14].mxu0  ;;  %v3894_v48 = vld [vmem:[%s6199_s7 + $0x68] sm:$0xff] }
 0x1f4   : > { %v3863_v18 = vadd.f32 %v4718_v0, %v6204_v10  ;;  %v4720_v58 = vadd.f32 %v4687_v49, %v6191_v33  ;;  %v3734_v23 = vpop.f32.mrb[15].mxu0 }
 0x1f5   : > { %v3861_v56 = vadd.f32 %v4719_v34, %v6204_v10  ;;  %v4721_v60 = vadd.f32 %v3734_v23, %v6193_v4 }
 0x1f6   : > { %v3927_v38 = vadd.f32 %v3895_v17, %v3863_v18  ;;  %v3864_v55 = vadd.f32 %v4720_v58, %v6204_v10 }
 0x1f7   : > { %v3925_v28 = vadd.f32 %v3893_v13, %v3861_v56  ;;  %v3862_v11 = vadd.f32 %v4721_v60, %v6204_v10 }
 0x1f8   : > { %3959 = vst.msk [vmem:[%s6213_s13 + $0x70] sm:$0xff] %vm1029_vm1, %v3927_v38  ;;  %v3928_v16 = vadd.f32 %v3896_v40, %v3864_v55  ;;  %v4554_v33 = vpop.f32.mrb[16].mxu1  ;;  %v3907_v40 = vld [vmem:[%s6199_s7 + $0xd0] sm:$0xff] }
 0x1f9   : > { %3957 = vst.msk [vmem:[%s6213_s13 + $0x60] sm:$0xff] %vm1029_vm1, %v3925_v28  ;;  %v3926_v36 = vadd.f32 %v3894_v48, %v3862_v11  ;;  %v2475_v50 = vpop.f32.mrb[17].mxu1  ;;  %v4690_v4 = vpop.f32.mrb[16].mxu0  ;;  %v3905_v28 = vld [vmem:[%s6199_s7 + $0xc0] sm:$0xff] }
 0x1fa   : > { %3960 = vst.msk [vmem:[%s6213_s13 + $0x78] sm:$0xff] %vm1029_vm1, %v3928_v16  ;;  %v4722_v63 = vadd.f32 %v4690_v4, %v4554_v33  ;;  %v4555_v21 = vpop.f32.mrb[18].mxu1  ;;  %v3747_v44 = vpop.f32.mrb[17].mxu0 }
 0x1fb   : > { %3958 = vst.msk [vmem:[%s6213_s13 + $0x68] sm:$0xff] %vm1029_vm1, %v3926_v36  ;;  %v4723_v47 = vadd.f32 %v3747_v44, %v2475_v50  ;;  %v2478_v9 = vpop.f32.mrb[19].mxu1  ;;  %v4691_v37 = vpop.f32.mrb[18].mxu0  ;;  %v3908_v36 = vld [vmem:[%s6199_s7 + $0xd8] sm:$0xff] }
 0x1fc   : > { %v3867_v35 = vadd.f32 %v4722_v63, %v6204_v10  ;;  %v4724_v53 = vadd.f32 %v4691_v37, %v4555_v21  ;;  %v3750_v54 = vpop.f32.mrb[19].mxu0  ;;  %v3906_v21 = vld [vmem:[%s6199_s7 + $0xc8] sm:$0xff] }
 0x1fd   : > { %v3865_v19 = vadd.f32 %v4723_v47, %v6204_v10  ;;  %v4725_v45 = vadd.f32 %v3750_v54, %v2478_v9 }
 0x1fe   : > { %v3931_v27 = vadd.f32 %v3899_v1, %v3867_v35  ;;  %v3868_v31 = vadd.f32 %v4724_v53, %v6204_v10 }
 0x1ff   : > { %v3929_v24 = vadd.f32 %v3897_v15, %v3865_v19  ;;  %v3866_v12 = vadd.f32 %v4725_v45, %v6204_v10 }
 0x200   : > { %3963 = vst.msk [vmem:[%s6213_s13 + $0x90] sm:$0xff] %vm1029_vm1, %v3931_v27  ;;  %v3932_v57 = vadd.f32 %v3900_v61, %v3868_v31  ;;  %v4558_v39 = vpop.f32.mrb[20].mxu1  ;;  %v3911_v61 = vld [vmem:[%s6199_s7 + $0xf0] sm:$0xff] }
 0x201   : > { %3961 = vst.msk [vmem:[%s6213_s13 + $0x80] sm:$0xff] %vm1029_vm1, %v3929_v24  ;;  %v3930_v41 = vadd.f32 %v3898_v30, %v3866_v12  ;;  %v2491_v5 = vpop.f32.mrb[21].mxu1  ;;  %v4694_v52 = vpop.f32.mrb[20].mxu0  ;;  %v3909_v24 = vld [vmem:[%s6199_s7 + $0xe0] sm:$0xff] }
 0x202   : > { %3964 = vst.msk [vmem:[%s6213_s13 + $0x98] sm:$0xff] %vm1029_vm1, %v3932_v57  ;;  %v4726_v20 = vadd.f32 %v4694_v52, %v4558_v39  ;;  %v4559_v32 = vpop.f32.mrb[22].mxu1  ;;  %v3763_v2 = vpop.f32.mrb[21].mxu0 }
 0x203   : > { %3962 = vst.msk [vmem:[%s6213_s13 + $0x88] sm:$0xff] %vm1029_vm1, %v3930_v41  ;;  %v4727_v26 = vadd.f32 %v3763_v2, %v2491_v5  ;;  %v2494_v51 = vpop.f32.mrb[23].mxu1  ;;  %v4695_v43 = vpop.f32.mrb[22].mxu0  ;;  %v3912_v41 = vld [vmem:[%s6199_s7 + $0xf8] sm:$0xff] }
 0x204   : > { %v3871_v59 = vadd.f32 %v4726_v20, %v6204_v10  ;;  %v4728_v22 = vadd.f32 %v4695_v43, %v4559_v32  ;;  %v3766_v7 = vpop.f32.mrb[23].mxu0  ;;  %v3910_v32 = vld [vmem:[%s6199_s7 + $0xe8] sm:$0xff] }
 0x205   : > { %v3869_v42 = vadd.f32 %v4727_v26, %v6204_v10  ;;  %v4729_v8 = vadd.f32 %v3766_v7, %v2494_v51 }
 0x206   : > { %v3935_v46 = vadd.f32 %v3903_v25, %v3871_v59  ;;  %v3872_v6 = vadd.f32 %v4728_v22, %v6204_v10 }
 0x207   : > { %v3933_v0 = vadd.f32 %v3901_v29, %v3869_v42  ;;  %v3870_v14 = vadd.f32 %v4729_v8, %v6204_v10 }
 0x208   : > { %3967 = vst.msk [vmem:[%s6213_s13 + $0xb0] sm:$0xff] %vm1029_vm1, %v3935_v46  ;;  %v3936_v17 = vadd.f32 %v3904_v3, %v3872_v6  ;;  %v4562_v34 = vpop.f32.mrb[24].mxu1 }
 0x209   : > { %3965 = vst.msk [vmem:[%s6213_s13 + $0xa0] sm:$0xff] %vm1029_vm1, %v3933_v0  ;;  %v3934_v49 = vadd.f32 %v3902_v62, %v3870_v14  ;;  %v2507_v18 = vpop.f32.mrb[25].mxu1  ;;  %v4698_v13 = vpop.f32.mrb[24].mxu0 }
 0x20a   : > { %3968 = vst.msk [vmem:[%s6213_s13 + $0xb8] sm:$0xff] %vm1029_vm1, %v3936_v17  ;;  %v4730_v58 = vadd.f32 %v4698_v13, %v4562_v34  ;;  %v4563_v23 = vpop.f32.mrb[26].mxu1  ;;  %v3779_v56 = vpop.f32.mrb[25].mxu0 }
 0x20b   : > { %3966 = vst.msk [vmem:[%s6213_s13 + $0xa8] sm:$0xff] %vm1029_vm1, %v3934_v49  ;;  %v4731_v60 = vadd.f32 %v3779_v56, %v2507_v18  ;;  %v2510_v38 = vpop.f32.mrb[27].mxu1  ;;  %v4699_v55 = vpop.f32.mrb[26].mxu0 }
 0x20c   : > { %v3875_v48 = vadd.f32 %v4730_v58, %v6204_v10  ;;  %v4732_v11 = vadd.f32 %v4699_v55, %v4563_v23  ;;  %v3782_v16 = vpop.f32.mrb[27].mxu0 }
 0x20d   : > { %v3873_v33 = vadd.f32 %v4731_v60, %v6204_v10  ;;  %v4733_v50 = vadd.f32 %v3782_v16, %v2510_v38 }
 0x20e   : > { %v3939_v4 = vadd.f32 %v3907_v40, %v3875_v48  ;;  %v3876_v63 = vadd.f32 %v4732_v11, %v6204_v10 }
 0x20f   : > { %v3937_v44 = vadd.f32 %v3905_v28, %v3873_v33  ;;  %v3874_v1 = vadd.f32 %v4733_v50, %v6204_v10 }
 0x210   : > { %3971 = vst.msk [vmem:[%s6213_s13 + $0xd0] sm:$0xff] %vm1029_vm1, %v3939_v4  ;;  %v3940_v47 = vadd.f32 %v3908_v36, %v3876_v63  ;;  %v4566_v9 = vpop.f32.mrb[28].mxu1 }
 0x211   : > { %3969 = vst.msk [vmem:[%s6213_s13 + $0xc0] sm:$0xff] %vm1029_vm1, %v3937_v44  ;;  %v3938_v37 = vadd.f32 %v3906_v21, %v3874_v1  ;;  %v2523_v35 = vpop.f32.mrb[29].mxu1  ;;  %v4702_v15 = vpop.f32.mrb[28].mxu0 }
 0x212   : > { %3972 = vst.msk [vmem:[%s6213_s13 + $0xd8] sm:$0xff] %vm1029_vm1, %v3940_v47  ;;  %v4734_v53 = vadd.f32 %v4702_v15, %v4566_v9  ;;  %v4567_v54 = vpop.f32.mrb[30].mxu1  ;;  %v3795_v19 = vpop.f32.mrb[29].mxu0 }
 0x213   : > { %3970 = vst.msk [vmem:[%s6213_s13 + $0xc8] sm:$0xff] %vm1029_vm1, %v3938_v37  ;;  %v4735_v45 = vadd.f32 %v3795_v19, %v2523_v35  ;;  %v2526_v27 = vpop.f32.mrb[31].mxu1  ;;  %v4703_v31 = vpop.f32.mrb[30].mxu0 }
 0x214   : > { %v3879_v30 = vadd.f32 %v4734_v53, %v6204_v10  ;;  %v4736_v12 = vadd.f32 %v4703_v31, %v4567_v54  ;;  %v3798_v57 = vpop.f32.mrb[31].mxu0 }
 0x215   : > { %v3877_v39 = vadd.f32 %v4735_v45, %v6204_v10  ;;  %v4737_v5 = vadd.f32 %v3798_v57, %v2526_v27 }
 0x216   : > { %v3943_v52 = vadd.f32 %v3911_v61, %v3879_v30  ;;  %v3880_v20 = vadd.f32 %v4736_v12, %v6204_v10 }
 0x217   : > { %v3941_v2 = vadd.f32 %v3909_v24, %v3877_v39  ;;  %v3878_v25 = vadd.f32 %v4737_v5, %v6204_v10 }
 0x218   : > { %3975 = vst.msk [vmem:[%s6213_s13 + $0xf0] sm:$0xff] %vm1029_vm1, %v3943_v52  ;;  %v3944_v26 = vadd.f32 %v3912_v41, %v3880_v20 }
 0x219   : > { %3973 = vst.msk [vmem:[%s6213_s13 + $0xe0] sm:$0xff] %vm1029_vm1, %v3941_v2  ;;  %v3942_v51 = vadd.f32 %v3910_v32, %v3878_v25 }
 0x21a   : > { %3976 = vst.msk [vmem:[%s6213_s13 + $0xf8] sm:$0xff] %vm1029_vm1, %v3944_v26 }
 0x21b   : > { %3974 = vst.msk [vmem:[%s6213_s13 + $0xe8] sm:$0xff] %vm1029_vm1, %v3942_v51 }
 0x21c PF: > { %s16_s21 = sadd.s32 1, %s4988_s21  }
 0x21d   : > { %p13_p4 = scmp.ge.s32.totalorder %s16_s21, 4  }
 0x21f   :  { %15 = sbr.rel (!%p13_p4) target bundleno = 1 (0x1), region = 85 }

</bundles_post_ra>
